<compile_context>
chip_gen: v7x
topology: tpu7x:2x2x1
jax: 0.10.0
libtpu: 0.0.40
codegen_flags: <defaults>
</compile_context>

<pallas_src>
import functools

import jax
import jax.numpy as jnp
from jax import lax
from jax.experimental import pallas as pl
from jax.experimental.pallas import tpu as pltpu


def _round_up(v, m):
    return ((v + m - 1) // m) * m


_GELU_C0 = 0.7978845608028654   # sqrt(2/pi)
_GELU_C1 = 0.044715


def _gelu(x):
    # tanh-form GELU: the transcendental runs in the (otherwise idle) EUP slot and the VALU op
    # count per element drops ~3x vs. the erf polynomial.  gelu(0) == 0 exactly, which the halo
    # writes below rely on (the unused lane half must stay zero).
    inner = _GELU_C0 * (x + _GELU_C1 * x * x * x)
    return 0.5 * x * (1.0 + jnp.tanh(inner))


def convffn_kernel(x_ref, w1t_ref, w1b_ref, b1t_ref, b1b_ref, dww_ref, dwb_ref,
                   w2t_ref, w2b_ref, b2_ref, o_ref, pad_ref, *, H, W, ksize, rs, col0):
    pad = (ksize - 1) // 2
    Hh = H // 2                      # packed rows: top half in lanes [0,Hd), bottom in [Hd,2Hd)
    C2 = pad_ref.shape[-1]           # 2 * hidden_features (packed lane width)
    w_scr = pad_ref.shape[1]

    # ---- hoisted weight/bias loads (the strip loops below are Python-unrolled at trace time
    # and JAX does not CSE per-strip reloads).
    w1t = w1t_ref[...]               # (Cin, 2Hd) = [w1 | 0]
    w1b = w1b_ref[...]               # (Cin, 2Hd) = [0 | w1]
    b1t = b1t_ref[...]               # (1, 2Hd)  = [b1 | 0]
    b1b = b1b_ref[...]               # (1, 2Hd)  = [0 | b1]
    b1p = b1t + b1b                  # packed fc1 bias
    w_all = dww_ref[...]             # (K*K, 2Hd), per-channel weights duplicated per lane half
    dwb = dwb_ref[...]               # (1, 2Hd)
    w2t = w2t_ref[...]               # (2Hd, Cout) = [w2 ; 0]
    w2b = w2b_ref[...]               # (2Hd, Cout) = [0 ; w2]
    b2 = b2_ref[...]                 # (1, Cout)

    # ---- zero only the scratch border (halo rows + left/right column bands).  Phase 1 fully
    # overwrites the interior, so a full-scratch memset would just burn store slots (v5e has a
    # single vst slot) and serialize against the phase-1 stores.
    pad_ref[0:pad, :, :] = jnp.zeros((pad, w_scr, C2), jnp.float32)
    pad_ref[pad + Hh:pad + Hh + pad, :, :] = jnp.zeros((pad, w_scr, C2), jnp.float32)
    pad_ref[pad:pad + Hh, 0:col0, :] = jnp.zeros((Hh, col0, C2), jnp.float32)
    if col0 + W < w_scr:
        pad_ref[pad:pad + Hh, col0 + W:w_scr, :] = (
            jnp.zeros((Hh, w_scr - (col0 + W), C2), jnp.float32))

    # ---- phase 1: fc1 + GELU, lane-packed.  The split weights make the MXU emit full 128-lane
    # tiles directly, so GELU runs on full vregs and no in-kernel lane concat is needed.
    x_top = x_ref[0, 0:Hh * W, :]                       # tokens of image rows [0, Hh)
    x_bot = x_ref[0, Hh * W:H * W, :]                   # tokens of image rows [Hh, H)
    pre = (jnp.dot(x_top, w1t, preferred_element_type=jnp.float32)
           + jnp.dot(x_bot, w1b, preferred_element_type=jnp.float32) + b1p)
    hp = _gelu(pre).reshape(Hh, W, C2)                  # packed hidden image
    pad_ref[pad:pad + Hh, col0:col0 + W, :] = hp

    # Duplicated halo rows at the half split: the bottom half's conv needs hidden rows
    # Hh-pad..Hh-1 above its interior (in lanes [Hd,2Hd)), the top half needs rows Hh..Hh+pad-1
    # below its interior (in lanes [0,Hd)).  Recompute fc1 for those 2*pad image rows (tiny
    # matmuls); gelu(0)==0 keeps the opposite lane half exactly zero (= image zero padding).
    x_h_top = x_ref[0, (Hh - pad) * W:Hh * W, :]        # image rows Hh-pad .. Hh-1
    halo_top = _gelu(jnp.dot(x_h_top, w1b, preferred_element_type=jnp.float32) + b1b)
    pad_ref[0:pad, col0:col0 + W, :] = halo_top.reshape(pad, W, C2)
    x_h_bot = x_ref[0, Hh * W:(Hh + pad) * W, :]        # image rows Hh .. Hh+pad-1
    halo_bot = _gelu(jnp.dot(x_h_bot, w1t, preferred_element_type=jnp.float32) + b1t)
    pad_ref[pad + Hh:pad + Hh + pad, col0:col0 + W, :] = halo_bot.reshape(pad, W, C2)

    # ---- phase 2: depthwise KxK conv + GELU + residual + fc2, per packed row strip.
    for r0 in range(0, Hh, rs):
        # Two interleaved accumulators (dh parity) break the 25-deep serial add chain.
        acc0 = jnp.zeros((rs, W, C2), jnp.float32)
        acc1 = jnp.zeros((rs, W, C2), jnp.float32)
        for dw in range(ksize):
            # One sublane-offset window load per column shift (ksize per strip); the row (dh)
            # shift is a free outer-dim slice of the slab.
            c_lo = col0 - pad + dw
            slab = pad_ref[r0:r0 + rs + 2 * pad, c_lo:c_lo + W, :]   # (rs+2p, W, 2Hd)
            for dh in range(ksize):
                k = dh * ksize + dw
                tap = slab[dh:dh + rs] * w_all[k:k + 1, :]
                if dh % 2 == 0:
                    acc0 = acc0 + tap
                else:
                    acc1 = acc1 + tap
        d = _gelu(acc0 + acc1 + dwb)                                 # (rs, W, 2Hd)

        # Residual: re-read this strip's packed post-GELU fc1 activation (aligned load) instead
        # of keeping it live across the whole conv.
        h_s = pad_ref[pad + r0:pad + r0 + rs, col0:col0 + W, :]
        s = (h_s + d).reshape(rs * W, C2)

        # fc2 for both lane halves via the block weights [w2;0] / [0;w2] (no lane slicing).
        out_top = jnp.dot(s, w2t, preferred_element_type=jnp.float32) + b2
        out_bot = jnp.dot(s, w2b, preferred_element_type=jnp.float32) + b2
        o_ref[0, r0 * W:(r0 + rs) * W, :] = out_top.astype(o_ref.dtype)
        o_ref[0, (Hh + r0) * W:(Hh + r0 + rs) * W, :] = out_bot.astype(o_ref.dtype)


def conv_ffn(x, x_size, params, ksize=5):
    B, L, Cin = x.shape
    H, W = x_size
    assert L == H * W
    w1, b1, dww, dwb, w2, b2 = params
    Hd = w1.shape[1]
    Cout = w2.shape[1]
    pad = (ksize - 1) // 2
    # TODO(synk): lane packing pairs the image's top/bottom halves; odd H would need an
    # unpacked fallback path (not needed at these shapes).
    assert H % 2 == 0, "lane-packed kernel requires an even image height"
    Hh = H // 2
    assert Hh >= pad, "half-image height must cover the conv halo"

    # Packed row-strip size over the Hh packed rows: bounds the conv live set (2 accumulators
    # + one (rs+2*pad)-row full-lane slab ~ 40 vregs for rs=4) under the 64-entry vreg file.
    rs = 4 if Hh % 4 == 0 else (2 if Hh % 2 == 0 else 1)

    # Padded hidden-image scratch: interior columns at [col0, col0+W) with `pad` zero columns
    # on either side; col0 is a sublane multiple so interior writes and residual reads are
    # aligned.  Total width rounded up to a sublane multiple.
    col0 = _round_up(pad, 8)
    w_scratch = _round_up(col0 + W + pad, 8)

    # Wrapper-built split/duplicated weights so the kernel never lane-concats or lane-slices:
    #   fc1:   x_top @ [w1|0] + x_bot @ [0|w1]  -> packed (.., 2Hd) pre-activation
    #   dconv: per-channel weights/bias tiled to both lane halves
    #   fc2:   s @ [w2;0] -> top-half outputs, s @ [0;w2] -> bottom-half outputs
    z_w1 = jnp.zeros_like(w1)
    z_b1 = jnp.zeros_like(b1)
    z_w2 = jnp.zeros_like(w2)
    w1_top = jnp.concatenate([w1, z_w1], axis=1)
    w1_bot = jnp.concatenate([z_w1, w1], axis=1)
    b1_top = jnp.concatenate([b1, z_b1], axis=1)
    b1_bot = jnp.concatenate([z_b1, b1], axis=1)
    dww_p = jnp.concatenate([dww, dww], axis=1)
    dwb_p = jnp.concatenate([dwb, dwb], axis=1)
    w2_top = jnp.concatenate([w2, z_w2], axis=0)
    w2_bot = jnp.concatenate([z_w2, w2], axis=0)

    kern = functools.partial(convffn_kernel, H=H, W=W, ksize=ksize, rs=rs, col0=col0)
    return pl.pallas_call(
        kern,
        out_shape=jax.ShapeDtypeStruct((B, L, Cout), x.dtype),
        grid_spec=pltpu.PrefetchScalarGridSpec(
            num_scalar_prefetch=0,
            grid=(B,),
            in_specs=[
                pl.BlockSpec((1, L, Cin), lambda b: (b, 0, 0)),           # x
                pl.BlockSpec((Cin, 2 * Hd), lambda b: (0, 0)),            # fc1 weight -> top lanes
                pl.BlockSpec((Cin, 2 * Hd), lambda b: (0, 0)),            # fc1 weight -> bottom lanes
                pl.BlockSpec((1, 2 * Hd), lambda b: (0, 0)),              # fc1 bias (top lanes)
                pl.BlockSpec((1, 2 * Hd), lambda b: (0, 0)),              # fc1 bias (bottom lanes)
                pl.BlockSpec((ksize * ksize, 2 * Hd), lambda b: (0, 0)),  # dw conv weight (K*K, 2Hd)
                pl.BlockSpec((1, 2 * Hd), lambda b: (0, 0)),              # dw conv bias
                pl.BlockSpec((2 * Hd, Cout), lambda b: (0, 0)),           # fc2 weight (top lanes)
                pl.BlockSpec((2 * Hd, Cout), lambda b: (0, 0)),           # fc2 weight (bottom lanes)
                pl.BlockSpec((1, Cout), lambda b: (0, 0)),                # fc2 bias
            ],
            out_specs=pl.BlockSpec((1, L, Cout), lambda b: (b, 0, 0)),
            scratch_shapes=[
                pltpu.VMEM((Hh + 2 * pad, w_scratch, 2 * Hd), jnp.float32),  # packed padded hidden
            ],
        ),
        compiler_params=pltpu.CompilerParams(
            dimension_semantics=("parallel",),
            vmem_limit_bytes=4 * 1024 * 1024,
        ),
    )(x, w1_top, w1_bot, b1_top, b1_bot, dww_p, dwb_p, w2_top, w2_bot, b2)


def reference_conv_ffn(x, x_size, params, ksize=5):
    """Pure-JAX reference matching the PyTorch module semantics (exact erf-GELU)."""
    H, W = x_size
    B, L, Cin = x.shape
    w1, b1, dww, dwb, w2, b2 = params
    Hd = w1.shape[1]

    h = jax.nn.gelu(x @ w1 + b1, approximate=False)                 # (B, L, Hd)
    img = h.reshape(B, H, W, Hd)                                    # NHWC
    w_hwio = dww.reshape(ksize, ksize, 1, Hd)                       # depthwise filter (K,K,1,Hd)
    conv = lax.conv_general_dilated(
        img, w_hwio, window_strides=(1, 1), padding="SAME",
        dimension_numbers=("NHWC", "HWIO", "NHWC"),
        feature_group_count=Hd,
    )
    d = jax.nn.gelu(conv + dwb, approximate=False).reshape(B, L, Hd)
    s = h + d
    return s @ w2 + b2


if __name__ == "__main__":
    # Small shapes consistent with the module: tokens of a 16x16 feature map.
    B, H, W = 2, 16, 16
    L = H * W
    in_features = 32
    hidden_features = 64
    out_features = in_features          # module default: out_features = in_features
    ksize = 5

    key = jax.random.PRNGKey(0)
    kx, k1, k2, k3, k4, k5, k6 = jax.random.split(key, 7)

    x = jax.random.normal(kx, (B, L, in_features), dtype=jnp.float32)

    # Deterministic synthetic parameters (shapes follow the PyTorch module __init__).
    scale = 0.1
    w1 = scale * jax.random.normal(k1, (in_features, hidden_features), jnp.float32)    # fc1.weight.T
    b1 = scale * jax.random.normal(k2, (1, hidden_features), jnp.float32)               # fc1.bias
    # Conv2d(hid, hid, 5, groups=hid) weight is (hid, 1, 5, 5) in torch; stored here as (25, hid):
    # dww[dh*5+dw, c] == torch_weight[c, 0, dh, dw]
    dww = scale * jax.random.normal(k3, (ksize * ksize, hidden_features), jnp.float32)
    dwb = scale * jax.random.normal(k4, (1, hidden_features), jnp.float32)               # conv bias
    w2 = scale * jax.random.normal(k5, (hidden_features, out_features), jnp.float32)     # fc2.weight.T
    b2 = scale * jax.random.normal(k6, (1, out_features), jnp.float32)                   # fc2.bias

    params = (w1, b1, dww, dwb, w2, b2)

    out = conv_ffn(x, (H, W), params, ksize=ksize)
    out = jax.block_until_ready(out)

    ref = jax.block_until_ready(reference_conv_ffn(x, (H, W), params, ksize=ksize))

    max_err = float(jnp.max(jnp.abs(out - ref)))
    assert out.shape == (B, L, out_features), out.shape
    assert max_err < 1e-3, f"max abs err {max_err}"

    print("KERNEL_OK")
</pallas_src>

<mosaic_0001>
module attributes {stable_mosaic.version = 11 : i64} {
  func.func @convffn_kernel(%arg0: i32, %arg1: memref<1x256x32xf32, #tpu.memory_space<vmem>>, %arg2: memref<32x128xf32, #tpu.memory_space<vmem>>, %arg3: memref<32x128xf32, #tpu.memory_space<vmem>>, %arg4: memref<1x128xf32, #tpu.memory_space<vmem>>, %arg5: memref<1x128xf32, #tpu.memory_space<vmem>>, %arg6: memref<25x128xf32, #tpu.memory_space<vmem>>, %arg7: memref<1x128xf32, #tpu.memory_space<vmem>>, %arg8: memref<128x32xf32, #tpu.memory_space<vmem>>, %arg9: memref<128x32xf32, #tpu.memory_space<vmem>>, %arg10: memref<1x32xf32, #tpu.memory_space<vmem>>, %arg11: memref<1x256x32xf32, #tpu.memory_space<vmem>>, %arg12: memref<12x32x128xf32, #tpu.memory_space<vmem>>) attributes {dimension_semantics = [#tpu.dimension_semantics<parallel>], iteration_bounds = array<i64: 2>, scalar_prefetch = 0 : i64, scratch_operands = 1 : i64, tpu.core_type = #tpu.core_type<tc>, window_params = [{transform_indices = @transform_0, window_bounds = array<i64: 1, 256, 32>}, {pipeline_mode = #tpu.pipeline_mode<synchronous>, transform_indices = @transform_1, window_bounds = array<i64: 32, 128>}, {pipeline_mode = #tpu.pipeline_mode<synchronous>, transform_indices = @transform_2, window_bounds = array<i64: 32, 128>}, {pipeline_mode = #tpu.pipeline_mode<synchronous>, transform_indices = @transform_3, window_bounds = array<i64: 1, 128>}, {pipeline_mode = #tpu.pipeline_mode<synchronous>, transform_indices = @transform_4, window_bounds = array<i64: 1, 128>}, {pipeline_mode = #tpu.pipeline_mode<synchronous>, transform_indices = @transform_5, window_bounds = array<i64: 25, 128>}, {pipeline_mode = #tpu.pipeline_mode<synchronous>, transform_indices = @transform_6, window_bounds = array<i64: 1, 128>}, {pipeline_mode = #tpu.pipeline_mode<synchronous>, transform_indices = @transform_7, window_bounds = array<i64: 128, 32>}, {pipeline_mode = #tpu.pipeline_mode<synchronous>, transform_indices = @transform_8, window_bounds = array<i64: 128, 32>}, {pipeline_mode = #tpu.pipeline_mode<synchronous>, transform_indices = @transform_9, window_bounds = array<i64: 1, 32>}, {transform_indices = @transform_10, window_bounds = array<i64: 1, 256, 32>}]} {
    %c0 = arith.constant 0 : index
    %c0_0 = arith.constant 0 : index
    %0 = vector.load %arg2[%c0, %c0_0] : memref<32x128xf32, #tpu.memory_space<vmem>>, vector<32x128xf32>
    %c0_1 = arith.constant 0 : index
    %c0_2 = arith.constant 0 : index
    %1 = vector.load %arg3[%c0_1, %c0_2] : memref<32x128xf32, #tpu.memory_space<vmem>>, vector<32x128xf32>
    %c0_3 = arith.constant 0 : index
    %c0_4 = arith.constant 0 : index
    %2 = vector.load %arg4[%c0_3, %c0_4] : memref<1x128xf32, #tpu.memory_space<vmem>>, vector<1x128xf32>
    %c0_5 = arith.constant 0 : index
    %c0_6 = arith.constant 0 : index
    %3 = vector.load %arg5[%c0_5, %c0_6] : memref<1x128xf32, #tpu.memory_space<vmem>>, vector<1x128xf32>
    %4 = arith.addf %2, %3 : vector<1x128xf32>
    %c0_7 = arith.constant 0 : index
    %c0_8 = arith.constant 0 : index
    %5 = vector.load %arg6[%c0_7, %c0_8] : memref<25x128xf32, #tpu.memory_space<vmem>>, vector<25x128xf32>
    %c0_9 = arith.constant 0 : index
    %c0_10 = arith.constant 0 : index
    %6 = vector.load %arg7[%c0_9, %c0_10] : memref<1x128xf32, #tpu.memory_space<vmem>>, vector<1x128xf32>
    %c0_11 = arith.constant 0 : index
    %c0_12 = arith.constant 0 : index
    %7 = vector.load %arg8[%c0_11, %c0_12] : memref<128x32xf32, #tpu.memory_space<vmem>>, vector<128x32xf32>
    %c0_13 = arith.constant 0 : index
    %c0_14 = arith.constant 0 : index
    %8 = vector.load %arg9[%c0_13, %c0_14] : memref<128x32xf32, #tpu.memory_space<vmem>>, vector<128x32xf32>
    %c0_15 = arith.constant 0 : index
    %c0_16 = arith.constant 0 : index
    %9 = vector.load %arg10[%c0_15, %c0_16] : memref<1x32xf32, #tpu.memory_space<vmem>>, vector<1x32xf32>
    %cst = arith.constant 0.000000e+00 : f32
    %10 = vector.broadcast %cst : f32 to vector<2x32x128xf32>
    %c0_17 = arith.constant 0 : index
    %c0_18 = arith.constant 0 : index
    %c0_19 = arith.constant 0 : index
    %11 = vector.load %arg12[%c0_17, %c0_18, %c0_19] : memref<12x32x128xf32, #tpu.memory_space<vmem>>, vector<2x32x128xf32>
    tpu.vector_store %arg12[%c0_17, %c0_18, %c0_19], %10 {strides = array<i32>} : memref<12x32x128xf32, #tpu.memory_space<vmem>>, vector<2x32x128xf32>,
    %cst_20 = arith.constant 0.000000e+00 : f32
    %12 = vector.broadcast %cst_20 : f32 to vector<2x32x128xf32>
    %c10 = arith.constant 10 : index
    %c0_21 = arith.constant 0 : index
    %c0_22 = arith.constant 0 : index
    %13 = vector.load %arg12[%c10, %c0_21, %c0_22] : memref<12x32x128xf32, #tpu.memory_space<vmem>>, vector<2x32x128xf32>
    tpu.vector_store %arg12[%c10, %c0_21, %c0_22], %12 {strides = array<i32>} : memref<12x32x128xf32, #tpu.memory_space<vmem>>, vector<2x32x128xf32>,
    %cst_23 = arith.constant 0.000000e+00 : f32
    %14 = vector.broadcast %cst_23 : f32 to vector<8x8x128xf32>
    %c2 = arith.constant 2 : index
    %c0_24 = arith.constant 0 : index
    %c0_25 = arith.constant 0 : index
    %15 = vector.load %arg12[%c2, %c0_24, %c0_25] : memref<12x32x128xf32, #tpu.memory_space<vmem>>, vector<8x8x128xf32>
    tpu.vector_store %arg12[%c2, %c0_24, %c0_25], %14 {strides = array<i32>} : memref<12x32x128xf32, #tpu.memory_space<vmem>>, vector<8x8x128xf32>,
    %cst_26 = arith.constant 0.000000e+00 : f32
    %16 = vector.broadcast %cst_26 : f32 to vector<8x8x128xf32>
    %c2_27 = arith.constant 2 : index
    %c24 = arith.constant 24 : index
    %c0_28 = arith.constant 0 : index
    %17 = vector.load %arg12[%c2_27, %c24, %c0_28] : memref<12x32x128xf32, #tpu.memory_space<vmem>>, vector<8x8x128xf32>
    tpu.vector_store %arg12[%c2_27, %c24, %c0_28], %16 {strides = array<i32>} : memref<12x32x128xf32, #tpu.memory_space<vmem>>, vector<8x8x128xf32>,
    %c0_29 = arith.constant 0 : index
    %c0_30 = arith.constant 0 : index
    %c0_31 = arith.constant 0 : index
    %18 = vector.load %arg1[%c0_29, %c0_30, %c0_31] : memref<1x256x32xf32, #tpu.memory_space<vmem>>, vector<1x128x32xf32>
    %19 = vector.shape_cast %18 : vector<1x128x32xf32> to vector<128x32xf32>
    %c0_32 = arith.constant 0 : index
    %c128 = arith.constant 128 : index
    %c0_33 = arith.constant 0 : index
    %20 = vector.load %arg1[%c0_32, %c128, %c0_33] : memref<1x256x32xf32, #tpu.memory_space<vmem>>, vector<1x128x32xf32>
    %21 = vector.shape_cast %20 : vector<1x128x32xf32> to vector<128x32xf32>
    %cst_34 = arith.constant dense<0.000000e+00> : vector<128x128xf32>
    %22 = tpu.matmul %19, %0, %cst_34 {dimension_numbers = #tpu.dot_dimension_numbers<[1], [0], [0], [1], [0, 0, 1, 1], [], []>} : vector<128x32xf32>, vector<32x128xf32>, vector<128x128xf32> -> vector<128x128xf32>
    %cst_35 = arith.constant dense<0.000000e+00> : vector<128x128xf32>
    %23 = tpu.matmul %21, %1, %cst_35 {dimension_numbers = #tpu.dot_dimension_numbers<[1], [0], [0], [1], [0, 0, 1, 1], [], []>} : vector<128x32xf32>, vector<32x128xf32>, vector<128x128xf32> -> vector<128x128xf32>
    %24 = arith.addf %22, %23 : vector<128x128xf32>
    %25 = vector.broadcast %4 : vector<1x128xf32> to vector<128x128xf32>
    %26 = arith.addf %24, %25 : vector<128x128xf32>
    %cst_36 = arith.constant 4.471500e-02 : f32
    %27 = vector.broadcast %cst_36 : f32 to vector<128x128xf32>
    %28 = arith.mulf %27, %26 : vector<128x128xf32>
    %29 = arith.mulf %28, %26 : vector<128x128xf32>
    %30 = arith.mulf %29, %26 : vector<128x128xf32>
    %31 = arith.addf %26, %30 : vector<128x128xf32>
    %cst_37 = arith.constant 0.797884583 : f32
    %32 = vector.broadcast %cst_37 : f32 to vector<128x128xf32>
    %33 = arith.mulf %32, %31 : vector<128x128xf32>
    %cst_38 = arith.constant 5.000000e-01 : f32
    %34 = vector.broadcast %cst_38 : f32 to vector<128x128xf32>
    %35 = arith.mulf %34, %26 : vector<128x128xf32>
    %36 = math.tanh %33 : vector<128x128xf32>
    %cst_39 = arith.constant 1.000000e+00 : f32
    %37 = vector.broadcast %cst_39 : f32 to vector<128x128xf32>
    %38 = arith.addf %37, %36 : vector<128x128xf32>
    %39 = arith.mulf %35, %38 : vector<128x128xf32>
    %40 = vector.shape_cast %39 : vector<128x128xf32> to vector<8x16x128xf32>
    %c2_40 = arith.constant 2 : index
    %c8 = arith.constant 8 : index
    %c0_41 = arith.constant 0 : index
    %41 = vector.load %arg12[%c2_40, %c8, %c0_41] : memref<12x32x128xf32, #tpu.memory_space<vmem>>, vector<8x16x128xf32>
    tpu.vector_store %arg12[%c2_40, %c8, %c0_41], %40 {strides = array<i32>} : memref<12x32x128xf32, #tpu.memory_space<vmem>>, vector<8x16x128xf32>,
    %c0_42 = arith.constant 0 : index
    %c96 = arith.constant 96 : index
    %c0_43 = arith.constant 0 : index
    %42 = vector.load %arg1[%c0_42, %c96, %c0_43] : memref<1x256x32xf32, #tpu.memory_space<vmem>>, vector<1x32x32xf32>
    %43 = vector.shape_cast %42 : vector<1x32x32xf32> to vector<32x32xf32>
    %cst_44 = arith.constant dense<0.000000e+00> : vector<32x128xf32>
    %44 = tpu.matmul %43, %1, %cst_44 {dimension_numbers = #tpu.dot_dimension_numbers<[1], [0], [0], [1], [0, 0, 1, 1], [], []>} : vector<32x32xf32>, vector<32x128xf32>, vector<32x128xf32> -> vector<32x128xf32>
    %45 = vector.broadcast %3 : vector<1x128xf32> to vector<32x128xf32>
    %46 = arith.addf %44, %45 : vector<32x128xf32>
    %cst_45 = arith.constant 4.471500e-02 : f32
    %47 = vector.broadcast %cst_45 : f32 to vector<32x128xf32>
    %48 = arith.mulf %47, %46 : vector<32x128xf32>
    %49 = arith.mulf %48, %46 : vector<32x128xf32>
    %50 = arith.mulf %49, %46 : vector<32x128xf32>
    %51 = arith.addf %46, %50 : vector<32x128xf32>
    %cst_46 = arith.constant 0.797884583 : f32
    %52 = vector.broadcast %cst_46 : f32 to vector<32x128xf32>
    %53 = arith.mulf %52, %51 : vector<32x128xf32>
    %cst_47 = arith.constant 5.000000e-01 : f32
    %54 = vector.broadcast %cst_47 : f32 to vector<32x128xf32>
    %55 = arith.mulf %54, %46 : vector<32x128xf32>
    %56 = math.tanh %53 : vector<32x128xf32>
    %cst_48 = arith.constant 1.000000e+00 : f32
    %57 = vector.broadcast %cst_48 : f32 to vector<32x128xf32>
    %58 = arith.addf %57, %56 : vector<32x128xf32>
    %59 = arith.mulf %55, %58 : vector<32x128xf32>
    %60 = vector.shape_cast %59 : vector<32x128xf32> to vector<2x16x128xf32>
    %c0_49 = arith.constant 0 : index
    %c8_50 = arith.constant 8 : index
    %c0_51 = arith.constant 0 : index
    %61 = vector.load %arg12[%c0_49, %c8_50, %c0_51] : memref<12x32x128xf32, #tpu.memory_space<vmem>>, vector<2x16x128xf32>
    tpu.vector_store %arg12[%c0_49, %c8_50, %c0_51], %60 {strides = array<i32>} : memref<12x32x128xf32, #tpu.memory_space<vmem>>, vector<2x16x128xf32>,
    %c0_52 = arith.constant 0 : index
    %c128_53 = arith.constant 128 : index
    %c0_54 = arith.constant 0 : index
    %62 = vector.load %arg1[%c0_52, %c128_53, %c0_54] : memref<1x256x32xf32, #tpu.memory_space<vmem>>, vector<1x32x32xf32>
    %63 = vector.shape_cast %62 : vector<1x32x32xf32> to vector<32x32xf32>
    %cst_55 = arith.constant dense<0.000000e+00> : vector<32x128xf32>
    %64 = tpu.matmul %63, %0, %cst_55 {dimension_numbers = #tpu.dot_dimension_numbers<[1], [0], [0], [1], [0, 0, 1, 1], [], []>} : vector<32x32xf32>, vector<32x128xf32>, vector<32x128xf32> -> vector<32x128xf32>
    %65 = vector.broadcast %2 : vector<1x128xf32> to vector<32x128xf32>
    %66 = arith.addf %64, %65 : vector<32x128xf32>
    %cst_56 = arith.constant 4.471500e-02 : f32
    %67 = vector.broadcast %cst_56 : f32 to vector<32x128xf32>
    %68 = arith.mulf %67, %66 : vector<32x128xf32>
    %69 = arith.mulf %68, %66 : vector<32x128xf32>
    %70 = arith.mulf %69, %66 : vector<32x128xf32>
    %71 = arith.addf %66, %70 : vector<32x128xf32>
    %cst_57 = arith.constant 0.797884583 : f32
    %72 = vector.broadcast %cst_57 : f32 to vector<32x128xf32>
    %73 = arith.mulf %72, %71 : vector<32x128xf32>
    %cst_58 = arith.constant 5.000000e-01 : f32
    %74 = vector.broadcast %cst_58 : f32 to vector<32x128xf32>
    %75 = arith.mulf %74, %66 : vector<32x128xf32>
    %76 = math.tanh %73 : vector<32x128xf32>
    %cst_59 = arith.constant 1.000000e+00 : f32
    %77 = vector.broadcast %cst_59 : f32 to vector<32x128xf32>
    %78 = arith.addf %77, %76 : vector<32x128xf32>
    %79 = arith.mulf %75, %78 : vector<32x128xf32>
    %80 = vector.shape_cast %79 : vector<32x128xf32> to vector<2x16x128xf32>
    %c10_60 = arith.constant 10 : index
    %c8_61 = arith.constant 8 : index
    %c0_62 = arith.constant 0 : index
    %81 = vector.load %arg12[%c10_60, %c8_61, %c0_62] : memref<12x32x128xf32, #tpu.memory_space<vmem>>, vector<2x16x128xf32>
    tpu.vector_store %arg12[%c10_60, %c8_61, %c0_62], %80 {strides = array<i32>} : memref<12x32x128xf32, #tpu.memory_space<vmem>>, vector<2x16x128xf32>,
    %cst_63 = arith.constant 0.000000e+00 : f32
    %82 = vector.broadcast %cst_63 : f32 to vector<4x16x128xf32>
    %cst_64 = arith.constant 0.000000e+00 : f32
    %83 = vector.broadcast %cst_64 : f32 to vector<4x16x128xf32>
    %c0_65 = arith.constant 0 : index
    %c6 = arith.constant 6 : index
    %c0_66 = arith.constant 0 : index
    %84 = vector.load %arg12[%c0_65, %c6, %c0_66] : memref<12x32x128xf32, #tpu.memory_space<vmem>>, vector<8x16x128xf32>
    %85 = vector.extract_strided_slice %84 {offsets = [0, 0, 0], sizes = [4, 16, 128], strides = [1, 1, 1]} : vector<8x16x128xf32> to vector<4x16x128xf32>
    %86 = vector.extract_strided_slice %5 {offsets = [0, 0], sizes = [1, 128], strides = [1, 1]} : vector<25x128xf32> to vector<1x128xf32>
    %87 = vector.shape_cast %86 : vector<1x128xf32> to vector<1x1x128xf32>
    %88 = vector.broadcast %87 : vector<1x1x128xf32> to vector<4x16x128xf32>
    %89 = arith.mulf %85, %88 : vector<4x16x128xf32>
    %90 = arith.addf %82, %89 : vector<4x16x128xf32>
    %91 = vector.extract_strided_slice %84 {offsets = [1, 0, 0], sizes = [4, 16, 128], strides = [1, 1, 1]} : vector<8x16x128xf32> to vector<4x16x128xf32>
    %92 = vector.extract_strided_slice %5 {offsets = [5, 0], sizes = [1, 128], strides = [1, 1]} : vector<25x128xf32> to vector<1x128xf32>
    %93 = vector.shape_cast %92 : vector<1x128xf32> to vector<1x1x128xf32>
    %94 = vector.broadcast %93 : vector<1x1x128xf32> to vector<4x16x128xf32>
    %95 = arith.mulf %91, %94 : vector<4x16x128xf32>
    %96 = arith.addf %83, %95 : vector<4x16x128xf32>
    %97 = vector.extract_strided_slice %84 {offsets = [2, 0, 0], sizes = [4, 16, 128], strides = [1, 1, 1]} : vector<8x16x128xf32> to vector<4x16x128xf32>
    %98 = vector.extract_strided_slice %5 {offsets = [10, 0], sizes = [1, 128], strides = [1, 1]} : vector<25x128xf32> to vector<1x128xf32>
    %99 = vector.shape_cast %98 : vector<1x128xf32> to vector<1x1x128xf32>
    %100 = vector.broadcast %99 : vector<1x1x128xf32> to vector<4x16x128xf32>
    %101 = arith.mulf %97, %100 : vector<4x16x128xf32>
    %102 = arith.addf %90, %101 : vector<4x16x128xf32>
    %103 = vector.extract_strided_slice %84 {offsets = [3, 0, 0], sizes = [4, 16, 128], strides = [1, 1, 1]} : vector<8x16x128xf32> to vector<4x16x128xf32>
    %104 = vector.extract_strided_slice %5 {offsets = [15, 0], sizes = [1, 128], strides = [1, 1]} : vector<25x128xf32> to vector<1x128xf32>
    %105 = vector.shape_cast %104 : vector<1x128xf32> to vector<1x1x128xf32>
    %106 = vector.broadcast %105 : vector<1x1x128xf32> to vector<4x16x128xf32>
    %107 = arith.mulf %103, %106 : vector<4x16x128xf32>
    %108 = arith.addf %96, %107 : vector<4x16x128xf32>
    %109 = vector.extract_strided_slice %84 {offsets = [4, 0, 0], sizes = [4, 16, 128], strides = [1, 1, 1]} : vector<8x16x128xf32> to vector<4x16x128xf32>
    %110 = vector.extract_strided_slice %5 {offsets = [20, 0], sizes = [1, 128], strides = [1, 1]} : vector<25x128xf32> to vector<1x128xf32>
    %111 = vector.shape_cast %110 : vector<1x128xf32> to vector<1x1x128xf32>
    %112 = vector.broadcast %111 : vector<1x1x128xf32> to vector<4x16x128xf32>
    %113 = arith.mulf %109, %112 : vector<4x16x128xf32>
    %114 = arith.addf %102, %113 : vector<4x16x128xf32>
    %c0_67 = arith.constant 0 : index
    %c7 = arith.constant 7 : index
    %c0_68 = arith.constant 0 : index
    %115 = vector.load %arg12[%c0_67, %c7, %c0_68] : memref<12x32x128xf32, #tpu.memory_space<vmem>>, vector<8x16x128xf32>
    %116 = vector.extract_strided_slice %115 {offsets = [0, 0, 0], sizes = [4, 16, 128], strides = [1, 1, 1]} : vector<8x16x128xf32> to vector<4x16x128xf32>
    %117 = vector.extract_strided_slice %5 {offsets = [1, 0], sizes = [1, 128], strides = [1, 1]} : vector<25x128xf32> to vector<1x128xf32>
    %118 = vector.shape_cast %117 : vector<1x128xf32> to vector<1x1x128xf32>
    %119 = vector.broadcast %118 : vector<1x1x128xf32> to vector<4x16x128xf32>
    %120 = arith.mulf %116, %119 : vector<4x16x128xf32>
    %121 = arith.addf %114, %120 : vector<4x16x128xf32>
    %122 = vector.extract_strided_slice %115 {offsets = [1, 0, 0], sizes = [4, 16, 128], strides = [1, 1, 1]} : vector<8x16x128xf32> to vector<4x16x128xf32>
    %123 = vector.extract_strided_slice %5 {offsets = [6, 0], sizes = [1, 128], strides = [1, 1]} : vector<25x128xf32> to vector<1x128xf32>
    %124 = vector.shape_cast %123 : vector<1x128xf32> to vector<1x1x128xf32>
    %125 = vector.broadcast %124 : vector<1x1x128xf32> to vector<4x16x128xf32>
    %126 = arith.mulf %122, %125 : vector<4x16x128xf32>
    %127 = arith.addf %108, %126 : vector<4x16x128xf32>
    %128 = vector.extract_strided_slice %115 {offsets = [2, 0, 0], sizes = [4, 16, 128], strides = [1, 1, 1]} : vector<8x16x128xf32> to vector<4x16x128xf32>
    %129 = vector.extract_strided_slice %5 {offsets = [11, 0], sizes = [1, 128], strides = [1, 1]} : vector<25x128xf32> to vector<1x128xf32>
    %130 = vector.shape_cast %129 : vector<1x128xf32> to vector<1x1x128xf32>
    %131 = vector.broadcast %130 : vector<1x1x128xf32> to vector<4x16x128xf32>
    %132 = arith.mulf %128, %131 : vector<4x16x128xf32>
    %133 = arith.addf %121, %132 : vector<4x16x128xf32>
    %134 = vector.extract_strided_slice %115 {offsets = [3, 0, 0], sizes = [4, 16, 128], strides = [1, 1, 1]} : vector<8x16x128xf32> to vector<4x16x128xf32>
    %135 = vector.extract_strided_slice %5 {offsets = [16, 0], sizes = [1, 128], strides = [1, 1]} : vector<25x128xf32> to vector<1x128xf32>
    %136 = vector.shape_cast %135 : vector<1x128xf32> to vector<1x1x128xf32>
    %137 = vector.broadcast %136 : vector<1x1x128xf32> to vector<4x16x128xf32>
    %138 = arith.mulf %134, %137 : vector<4x16x128xf32>
    %139 = arith.addf %127, %138 : vector<4x16x128xf32>
    %140 = vector.extract_strided_slice %115 {offsets = [4, 0, 0], sizes = [4, 16, 128], strides = [1, 1, 1]} : vector<8x16x128xf32> to vector<4x16x128xf32>
    %141 = vector.extract_strided_slice %5 {offsets = [21, 0], sizes = [1, 128], strides = [1, 1]} : vector<25x128xf32> to vector<1x128xf32>
    %142 = vector.shape_cast %141 : vector<1x128xf32> to vector<1x1x128xf32>
    %143 = vector.broadcast %142 : vector<1x1x128xf32> to vector<4x16x128xf32>
    %144 = arith.mulf %140, %143 : vector<4x16x128xf32>
    %145 = arith.addf %133, %144 : vector<4x16x128xf32>
    %c0_69 = arith.constant 0 : index
    %c8_70 = arith.constant 8 : index
    %c0_71 = arith.constant 0 : index
    %146 = vector.load %arg12[%c0_69, %c8_70, %c0_71] : memref<12x32x128xf32, #tpu.memory_space<vmem>>, vector<8x16x128xf32>
    %147 = vector.extract_strided_slice %146 {offsets = [0, 0, 0], sizes = [4, 16, 128], strides = [1, 1, 1]} : vector<8x16x128xf32> to vector<4x16x128xf32>
    %148 = vector.extract_strided_slice %5 {offsets = [2, 0], sizes = [1, 128], strides = [1, 1]} : vector<25x128xf32> to vector<1x128xf32>
    %149 = vector.shape_cast %148 : vector<1x128xf32> to vector<1x1x128xf32>
    %150 = vector.broadcast %149 : vector<1x1x128xf32> to vector<4x16x128xf32>
    %151 = arith.mulf %147, %150 : vector<4x16x128xf32>
    %152 = arith.addf %145, %151 : vector<4x16x128xf32>
    %153 = vector.extract_strided_slice %146 {offsets = [1, 0, 0], sizes = [4, 16, 128], strides = [1, 1, 1]} : vector<8x16x128xf32> to vector<4x16x128xf32>
    %154 = vector.extract_strided_slice %5 {offsets = [7, 0], sizes = [1, 128], strides = [1, 1]} : vector<25x128xf32> to vector<1x128xf32>
    %155 = vector.shape_cast %154 : vector<1x128xf32> to vector<1x1x128xf32>
    %156 = vector.broadcast %155 : vector<1x1x128xf32> to vector<4x16x128xf32>
    %157 = arith.mulf %153, %156 : vector<4x16x128xf32>
    %158 = arith.addf %139, %157 : vector<4x16x128xf32>
    %159 = vector.extract_strided_slice %146 {offsets = [2, 0, 0], sizes = [4, 16, 128], strides = [1, 1, 1]} : vector<8x16x128xf32> to vector<4x16x128xf32>
    %160 = vector.extract_strided_slice %5 {offsets = [12, 0], sizes = [1, 128], strides = [1, 1]} : vector<25x128xf32> to vector<1x128xf32>
    %161 = vector.shape_cast %160 : vector<1x128xf32> to vector<1x1x128xf32>
    %162 = vector.broadcast %161 : vector<1x1x128xf32> to vector<4x16x128xf32>
    %163 = arith.mulf %159, %162 : vector<4x16x128xf32>
    %164 = arith.addf %152, %163 : vector<4x16x128xf32>
    %165 = vector.extract_strided_slice %146 {offsets = [3, 0, 0], sizes = [4, 16, 128], strides = [1, 1, 1]} : vector<8x16x128xf32> to vector<4x16x128xf32>
    %166 = vector.extract_strided_slice %5 {offsets = [17, 0], sizes = [1, 128], strides = [1, 1]} : vector<25x128xf32> to vector<1x128xf32>
    %167 = vector.shape_cast %166 : vector<1x128xf32> to vector<1x1x128xf32>
    %168 = vector.broadcast %167 : vector<1x1x128xf32> to vector<4x16x128xf32>
    %169 = arith.mulf %165, %168 : vector<4x16x128xf32>
    %170 = arith.addf %158, %169 : vector<4x16x128xf32>
    %171 = vector.extract_strided_slice %146 {offsets = [4, 0, 0], sizes = [4, 16, 128], strides = [1, 1, 1]} : vector<8x16x128xf32> to vector<4x16x128xf32>
    %172 = vector.extract_strided_slice %5 {offsets = [22, 0], sizes = [1, 128], strides = [1, 1]} : vector<25x128xf32> to vector<1x128xf32>
    %173 = vector.shape_cast %172 : vector<1x128xf32> to vector<1x1x128xf32>
    %174 = vector.broadcast %173 : vector<1x1x128xf32> to vector<4x16x128xf32>
    %175 = arith.mulf %171, %174 : vector<4x16x128xf32>
    %176 = arith.addf %164, %175 : vector<4x16x128xf32>
    %c0_72 = arith.constant 0 : index
    %c9 = arith.constant 9 : index
    %c0_73 = arith.constant 0 : index
    %177 = vector.load %arg12[%c0_72, %c9, %c0_73] : memref<12x32x128xf32, #tpu.memory_space<vmem>>, vector<8x16x128xf32>
    %178 = vector.extract_strided_slice %177 {offsets = [0, 0, 0], sizes = [4, 16, 128], strides = [1, 1, 1]} : vector<8x16x128xf32> to vector<4x16x128xf32>
    %179 = vector.extract_strided_slice %5 {offsets = [3, 0], sizes = [1, 128], strides = [1, 1]} : vector<25x128xf32> to vector<1x128xf32>
    %180 = vector.shape_cast %179 : vector<1x128xf32> to vector<1x1x128xf32>
    %181 = vector.broadcast %180 : vector<1x1x128xf32> to vector<4x16x128xf32>
    %182 = arith.mulf %178, %181 : vector<4x16x128xf32>
    %183 = arith.addf %176, %182 : vector<4x16x128xf32>
    %184 = vector.extract_strided_slice %177 {offsets = [1, 0, 0], sizes = [4, 16, 128], strides = [1, 1, 1]} : vector<8x16x128xf32> to vector<4x16x128xf32>
    %185 = vector.extract_strided_slice %5 {offsets = [8, 0], sizes = [1, 128], strides = [1, 1]} : vector<25x128xf32> to vector<1x128xf32>
    %186 = vector.shape_cast %185 : vector<1x128xf32> to vector<1x1x128xf32>
    %187 = vector.broadcast %186 : vector<1x1x128xf32> to vector<4x16x128xf32>
    %188 = arith.mulf %184, %187 : vector<4x16x128xf32>
    %189 = arith.addf %170, %188 : vector<4x16x128xf32>
    %190 = vector.extract_strided_slice %177 {offsets = [2, 0, 0], sizes = [4, 16, 128], strides = [1, 1, 1]} : vector<8x16x128xf32> to vector<4x16x128xf32>
    %191 = vector.extract_strided_slice %5 {offsets = [13, 0], sizes = [1, 128], strides = [1, 1]} : vector<25x128xf32> to vector<1x128xf32>
    %192 = vector.shape_cast %191 : vector<1x128xf32> to vector<1x1x128xf32>
    %193 = vector.broadcast %192 : vector<1x1x128xf32> to vector<4x16x128xf32>
    %194 = arith.mulf %190, %193 : vector<4x16x128xf32>
    %195 = arith.addf %183, %194 : vector<4x16x128xf32>
    %196 = vector.extract_strided_slice %177 {offsets = [3, 0, 0], sizes = [4, 16, 128], strides = [1, 1, 1]} : vector<8x16x128xf32> to vector<4x16x128xf32>
    %197 = vector.extract_strided_slice %5 {offsets = [18, 0], sizes = [1, 128], strides = [1, 1]} : vector<25x128xf32> to vector<1x128xf32>
    %198 = vector.shape_cast %197 : vector<1x128xf32> to vector<1x1x128xf32>
    %199 = vector.broadcast %198 : vector<1x1x128xf32> to vector<4x16x128xf32>
    %200 = arith.mulf %196, %199 : vector<4x16x128xf32>
    %201 = arith.addf %189, %200 : vector<4x16x128xf32>
    %202 = vector.extract_strided_slice %177 {offsets = [4, 0, 0], sizes = [4, 16, 128], strides = [1, 1, 1]} : vector<8x16x128xf32> to vector<4x16x128xf32>
    %203 = vector.extract_strided_slice %5 {offsets = [23, 0], sizes = [1, 128], strides = [1, 1]} : vector<25x128xf32> to vector<1x128xf32>
    %204 = vector.shape_cast %203 : vector<1x128xf32> to vector<1x1x128xf32>
    %205 = vector.broadcast %204 : vector<1x1x128xf32> to vector<4x16x128xf32>
    %206 = arith.mulf %202, %205 : vector<4x16x128xf32>
    %207 = arith.addf %195, %206 : vector<4x16x128xf32>
    %c0_74 = arith.constant 0 : index
    %c10_75 = arith.constant 10 : index
    %c0_76 = arith.constant 0 : index
    %208 = vector.load %arg12[%c0_74, %c10_75, %c0_76] : memref<12x32x128xf32, #tpu.memory_space<vmem>>, vector<8x16x128xf32>
    %209 = vector.extract_strided_slice %208 {offsets = [0, 0, 0], sizes = [4, 16, 128], strides = [1, 1, 1]} : vector<8x16x128xf32> to vector<4x16x128xf32>
    %210 = vector.extract_strided_slice %5 {offsets = [4, 0], sizes = [1, 128], strides = [1, 1]} : vector<25x128xf32> to vector<1x128xf32>
    %211 = vector.shape_cast %210 : vector<1x128xf32> to vector<1x1x128xf32>
    %212 = vector.broadcast %211 : vector<1x1x128xf32> to vector<4x16x128xf32>
    %213 = arith.mulf %209, %212 : vector<4x16x128xf32>
    %214 = arith.addf %207, %213 : vector<4x16x128xf32>
    %215 = vector.extract_strided_slice %208 {offsets = [1, 0, 0], sizes = [4, 16, 128], strides = [1, 1, 1]} : vector<8x16x128xf32> to vector<4x16x128xf32>
    %216 = vector.extract_strided_slice %5 {offsets = [9, 0], sizes = [1, 128], strides = [1, 1]} : vector<25x128xf32> to vector<1x128xf32>
    %217 = vector.shape_cast %216 : vector<1x128xf32> to vector<1x1x128xf32>
    %218 = vector.broadcast %217 : vector<1x1x128xf32> to vector<4x16x128xf32>
    %219 = arith.mulf %215, %218 : vector<4x16x128xf32>
    %220 = arith.addf %201, %219 : vector<4x16x128xf32>
    %221 = vector.extract_strided_slice %208 {offsets = [2, 0, 0], sizes = [4, 16, 128], strides = [1, 1, 1]} : vector<8x16x128xf32> to vector<4x16x128xf32>
    %222 = vector.extract_strided_slice %5 {offsets = [14, 0], sizes = [1, 128], strides = [1, 1]} : vector<25x128xf32> to vector<1x128xf32>
    %223 = vector.shape_cast %222 : vector<1x128xf32> to vector<1x1x128xf32>
    %224 = vector.broadcast %223 : vector<1x1x128xf32> to vector<4x16x128xf32>
    %225 = arith.mulf %221, %224 : vector<4x16x128xf32>
    %226 = arith.addf %214, %225 : vector<4x16x128xf32>
    %227 = vector.extract_strided_slice %208 {offsets = [3, 0, 0], sizes = [4, 16, 128], strides = [1, 1, 1]} : vector<8x16x128xf32> to vector<4x16x128xf32>
    %228 = vector.extract_strided_slice %5 {offsets = [19, 0], sizes = [1, 128], strides = [1, 1]} : vector<25x128xf32> to vector<1x128xf32>
    %229 = vector.shape_cast %228 : vector<1x128xf32> to vector<1x1x128xf32>
    %230 = vector.broadcast %229 : vector<1x1x128xf32> to vector<4x16x128xf32>
    %231 = arith.mulf %227, %230 : vector<4x16x128xf32>
    %232 = arith.addf %220, %231 : vector<4x16x128xf32>
    %233 = vector.extract_strided_slice %208 {offsets = [4, 0, 0], sizes = [4, 16, 128], strides = [1, 1, 1]} : vector<8x16x128xf32> to vector<4x16x128xf32>
    %234 = vector.extract_strided_slice %5 {offsets = [24, 0], sizes = [1, 128], strides = [1, 1]} : vector<25x128xf32> to vector<1x128xf32>
    %235 = vector.shape_cast %234 : vector<1x128xf32> to vector<1x1x128xf32>
    %236 = vector.broadcast %235 : vector<1x1x128xf32> to vector<4x16x128xf32>
    %237 = arith.mulf %233, %236 : vector<4x16x128xf32>
    %238 = arith.addf %226, %237 : vector<4x16x128xf32>
    %239 = arith.addf %238, %232 : vector<4x16x128xf32>
    %240 = vector.shape_cast %6 : vector<1x128xf32> to vector<1x1x128xf32>
    %241 = vector.broadcast %240 : vector<1x1x128xf32> to vector<4x16x128xf32>
    %242 = arith.addf %239, %241 : vector<4x16x128xf32>
    %cst_77 = arith.constant 4.471500e-02 : f32
    %243 = vector.broadcast %cst_77 : f32 to vector<4x16x128xf32>
    %244 = arith.mulf %243, %242 : vector<4x16x128xf32>
    %245 = arith.mulf %244, %242 : vector<4x16x128xf32>
    %246 = arith.mulf %245, %242 : vector<4x16x128xf32>
    %247 = arith.addf %242, %246 : vector<4x16x128xf32>
    %cst_78 = arith.constant 0.797884583 : f32
    %248 = vector.broadcast %cst_78 : f32 to vector<4x16x128xf32>
    %249 = arith.mulf %248, %247 : vector<4x16x128xf32>
    %cst_79 = arith.constant 5.000000e-01 : f32
    %250 = vector.broadcast %cst_79 : f32 to vector<4x16x128xf32>
    %251 = arith.mulf %250, %242 : vector<4x16x128xf32>
    %252 = math.tanh %249 : vector<4x16x128xf32>
    %cst_80 = arith.constant 1.000000e+00 : f32
    %253 = vector.broadcast %cst_80 : f32 to vector<4x16x128xf32>
    %254 = arith.addf %253, %252 : vector<4x16x128xf32>
    %255 = arith.mulf %251, %254 : vector<4x16x128xf32>
    %c2_81 = arith.constant 2 : index
    %c8_82 = arith.constant 8 : index
    %c0_83 = arith.constant 0 : index
    %256 = vector.load %arg12[%c2_81, %c8_82, %c0_83] : memref<12x32x128xf32, #tpu.memory_space<vmem>>, vector<4x16x128xf32>
    %257 = arith.addf %256, %255 : vector<4x16x128xf32>
    %258 = vector.shape_cast %257 : vector<4x16x128xf32> to vector<64x128xf32>
    %cst_84 = arith.constant dense<0.000000e+00> : vector<64x32xf32>
    %259 = tpu.matmul %258, %7, %cst_84 {dimension_numbers = #tpu.dot_dimension_numbers<[1], [0], [0], [1], [0, 0, 1, 1], [], []>} : vector<64x128xf32>, vector<128x32xf32>, vector<64x32xf32> -> vector<64x32xf32>
    %260 = vector.broadcast %9 : vector<1x32xf32> to vector<64x32xf32>
    %261 = arith.addf %259, %260 : vector<64x32xf32>
    %cst_85 = arith.constant dense<0.000000e+00> : vector<64x32xf32>
    %262 = tpu.matmul %258, %8, %cst_85 {dimension_numbers = #tpu.dot_dimension_numbers<[1], [0], [0], [1], [0, 0, 1, 1], [], []>} : vector<64x128xf32>, vector<128x32xf32>, vector<64x32xf32> -> vector<64x32xf32>
    %263 = vector.broadcast %9 : vector<1x32xf32> to vector<64x32xf32>
    %264 = arith.addf %262, %263 : vector<64x32xf32>
    %c0_86 = arith.constant 0 : index
    %c0_87 = arith.constant 0 : index
    %c0_88 = arith.constant 0 : index
    %265 = vector.load %arg11[%c0_86, %c0_87, %c0_88] : memref<1x256x32xf32, #tpu.memory_space<vmem>>, vector<1x64x32xf32>
    %266 = vector.shape_cast %265 : vector<1x64x32xf32> to vector<64x32xf32>
    %267 = vector.shape_cast %261 : vector<64x32xf32> to vector<1x64x32xf32>
    tpu.vector_store %arg11[%c0_86, %c0_87, %c0_88], %267 {strides = array<i32>} : memref<1x256x32xf32, #tpu.memory_space<vmem>>, vector<1x64x32xf32>,
    %c0_89 = arith.constant 0 : index
    %c128_90 = arith.constant 128 : index
    %c0_91 = arith.constant 0 : index
    %268 = vector.load %arg11[%c0_89, %c128_90, %c0_91] : memref<1x256x32xf32, #tpu.memory_space<vmem>>, vector<1x64x32xf32>
    %269 = vector.shape_cast %268 : vector<1x64x32xf32> to vector<64x32xf32>
    %270 = vector.shape_cast %264 : vector<64x32xf32> to vector<1x64x32xf32>
    tpu.vector_store %arg11[%c0_89, %c128_90, %c0_91], %270 {strides = array<i32>} : memref<1x256x32xf32, #tpu.memory_space<vmem>>, vector<1x64x32xf32>,
    %cst_92 = arith.constant 0.000000e+00 : f32
    %271 = vector.broadcast %cst_92 : f32 to vector<4x16x128xf32>
    %cst_93 = arith.constant 0.000000e+00 : f32
    %272 = vector.broadcast %cst_93 : f32 to vector<4x16x128xf32>
    %c4 = arith.constant 4 : index
    %c6_94 = arith.constant 6 : index
    %c0_95 = arith.constant 0 : index
    %273 = vector.load %arg12[%c4, %c6_94, %c0_95] : memref<12x32x128xf32, #tpu.memory_space<vmem>>, vector<8x16x128xf32>
    %274 = vector.extract_strided_slice %273 {offsets = [0, 0, 0], sizes = [4, 16, 128], strides = [1, 1, 1]} : vector<8x16x128xf32> to vector<4x16x128xf32>
    %275 = vector.extract_strided_slice %5 {offsets = [0, 0], sizes = [1, 128], strides = [1, 1]} : vector<25x128xf32> to vector<1x128xf32>
    %276 = vector.shape_cast %275 : vector<1x128xf32> to vector<1x1x128xf32>
    %277 = vector.broadcast %276 : vector<1x1x128xf32> to vector<4x16x128xf32>
    %278 = arith.mulf %274, %277 : vector<4x16x128xf32>
    %279 = arith.addf %271, %278 : vector<4x16x128xf32>
    %280 = vector.extract_strided_slice %273 {offsets = [1, 0, 0], sizes = [4, 16, 128], strides = [1, 1, 1]} : vector<8x16x128xf32> to vector<4x16x128xf32>
    %281 = vector.extract_strided_slice %5 {offsets = [5, 0], sizes = [1, 128], strides = [1, 1]} : vector<25x128xf32> to vector<1x128xf32>
    %282 = vector.shape_cast %281 : vector<1x128xf32> to vector<1x1x128xf32>
    %283 = vector.broadcast %282 : vector<1x1x128xf32> to vector<4x16x128xf32>
    %284 = arith.mulf %280, %283 : vector<4x16x128xf32>
    %285 = arith.addf %272, %284 : vector<4x16x128xf32>
    %286 = vector.extract_strided_slice %273 {offsets = [2, 0, 0], sizes = [4, 16, 128], strides = [1, 1, 1]} : vector<8x16x128xf32> to vector<4x16x128xf32>
    %287 = vector.extract_strided_slice %5 {offsets = [10, 0], sizes = [1, 128], strides = [1, 1]} : vector<25x128xf32> to vector<1x128xf32>
    %288 = vector.shape_cast %287 : vector<1x128xf32> to vector<1x1x128xf32>
    %289 = vector.broadcast %288 : vector<1x1x128xf32> to vector<4x16x128xf32>
    %290 = arith.mulf %286, %289 : vector<4x16x128xf32>
    %291 = arith.addf %279, %290 : vector<4x16x128xf32>
    %292 = vector.extract_strided_slice %273 {offsets = [3, 0, 0], sizes = [4, 16, 128], strides = [1, 1, 1]} : vector<8x16x128xf32> to vector<4x16x128xf32>
    %293 = vector.extract_strided_slice %5 {offsets = [15, 0], sizes = [1, 128], strides = [1, 1]} : vector<25x128xf32> to vector<1x128xf32>
    %294 = vector.shape_cast %293 : vector<1x128xf32> to vector<1x1x128xf32>
    %295 = vector.broadcast %294 : vector<1x1x128xf32> to vector<4x16x128xf32>
    %296 = arith.mulf %292, %295 : vector<4x16x128xf32>
    %297 = arith.addf %285, %296 : vector<4x16x128xf32>
    %298 = vector.extract_strided_slice %273 {offsets = [4, 0, 0], sizes = [4, 16, 128], strides = [1, 1, 1]} : vector<8x16x128xf32> to vector<4x16x128xf32>
    %299 = vector.extract_strided_slice %5 {offsets = [20, 0], sizes = [1, 128], strides = [1, 1]} : vector<25x128xf32> to vector<1x128xf32>
    %300 = vector.shape_cast %299 : vector<1x128xf32> to vector<1x1x128xf32>
    %301 = vector.broadcast %300 : vector<1x1x128xf32> to vector<4x16x128xf32>
    %302 = arith.mulf %298, %301 : vector<4x16x128xf32>
    %303 = arith.addf %291, %302 : vector<4x16x128xf32>
    %c4_96 = arith.constant 4 : index
    %c7_97 = arith.constant 7 : index
    %c0_98 = arith.constant 0 : index
    %304 = vector.load %arg12[%c4_96, %c7_97, %c0_98] : memref<12x32x128xf32, #tpu.memory_space<vmem>>, vector<8x16x128xf32>
    %305 = vector.extract_strided_slice %304 {offsets = [0, 0, 0], sizes = [4, 16, 128], strides = [1, 1, 1]} : vector<8x16x128xf32> to vector<4x16x128xf32>
    %306 = vector.extract_strided_slice %5 {offsets = [1, 0], sizes = [1, 128], strides = [1, 1]} : vector<25x128xf32> to vector<1x128xf32>
    %307 = vector.shape_cast %306 : vector<1x128xf32> to vector<1x1x128xf32>
    %308 = vector.broadcast %307 : vector<1x1x128xf32> to vector<4x16x128xf32>
    %309 = arith.mulf %305, %308 : vector<4x16x128xf32>
    %310 = arith.addf %303, %309 : vector<4x16x128xf32>
    %311 = vector.extract_strided_slice %304 {offsets = [1, 0, 0], sizes = [4, 16, 128], strides = [1, 1, 1]} : vector<8x16x128xf32> to vector<4x16x128xf32>
    %312 = vector.extract_strided_slice %5 {offsets = [6, 0], sizes = [1, 128], strides = [1, 1]} : vector<25x128xf32> to vector<1x128xf32>
    %313 = vector.shape_cast %312 : vector<1x128xf32> to vector<1x1x128xf32>
    %314 = vector.broadcast %313 : vector<1x1x128xf32> to vector<4x16x128xf32>
    %315 = arith.mulf %311, %314 : vector<4x16x128xf32>
    %316 = arith.addf %297, %315 : vector<4x16x128xf32>
    %317 = vector.extract_strided_slice %304 {offsets = [2, 0, 0], sizes = [4, 16, 128], strides = [1, 1, 1]} : vector<8x16x128xf32> to vector<4x16x128xf32>
    %318 = vector.extract_strided_slice %5 {offsets = [11, 0], sizes = [1, 128], strides = [1, 1]} : vector<25x128xf32> to vector<1x128xf32>
    %319 = vector.shape_cast %318 : vector<1x128xf32> to vector<1x1x128xf32>
    %320 = vector.broadcast %319 : vector<1x1x128xf32> to vector<4x16x128xf32>
    %321 = arith.mulf %317, %320 : vector<4x16x128xf32>
    %322 = arith.addf %310, %321 : vector<4x16x128xf32>
    %323 = vector.extract_strided_slice %304 {offsets = [3, 0, 0], sizes = [4, 16, 128], strides = [1, 1, 1]} : vector<8x16x128xf32> to vector<4x16x128xf32>
    %324 = vector.extract_strided_slice %5 {offsets = [16, 0], sizes = [1, 128], strides = [1, 1]} : vector<25x128xf32> to vector<1x128xf32>
    %325 = vector.shape_cast %324 : vector<1x128xf32> to vector<1x1x128xf32>
    %326 = vector.broadcast %325 : vector<1x1x128xf32> to vector<4x16x128xf32>
    %327 = arith.mulf %323, %326 : vector<4x16x128xf32>
    %328 = arith.addf %316, %327 : vector<4x16x128xf32>
    %329 = vector.extract_strided_slice %304 {offsets = [4, 0, 0], sizes = [4, 16, 128], strides = [1, 1, 1]} : vector<8x16x128xf32> to vector<4x16x128xf32>
    %330 = vector.extract_strided_slice %5 {offsets = [21, 0], sizes = [1, 128], strides = [1, 1]} : vector<25x128xf32> to vector<1x128xf32>
    %331 = vector.shape_cast %330 : vector<1x128xf32> to vector<1x1x128xf32>
    %332 = vector.broadcast %331 : vector<1x1x128xf32> to vector<4x16x128xf32>
    %333 = arith.mulf %329, %332 : vector<4x16x128xf32>
    %334 = arith.addf %322, %333 : vector<4x16x128xf32>
    %c4_99 = arith.constant 4 : index
    %c8_100 = arith.constant 8 : index
    %c0_101 = arith.constant 0 : index
    %335 = vector.load %arg12[%c4_99, %c8_100, %c0_101] : memref<12x32x128xf32, #tpu.memory_space<vmem>>, vector<8x16x128xf32>
    %336 = vector.extract_strided_slice %335 {offsets = [0, 0, 0], sizes = [4, 16, 128], strides = [1, 1, 1]} : vector<8x16x128xf32> to vector<4x16x128xf32>
    %337 = vector.extract_strided_slice %5 {offsets = [2, 0], sizes = [1, 128], strides = [1, 1]} : vector<25x128xf32> to vector<1x128xf32>
    %338 = vector.shape_cast %337 : vector<1x128xf32> to vector<1x1x128xf32>
    %339 = vector.broadcast %338 : vector<1x1x128xf32> to vector<4x16x128xf32>
    %340 = arith.mulf %336, %339 : vector<4x16x128xf32>
    %341 = arith.addf %334, %340 : vector<4x16x128xf32>
    %342 = vector.extract_strided_slice %335 {offsets = [1, 0, 0], sizes = [4, 16, 128], strides = [1, 1, 1]} : vector<8x16x128xf32> to vector<4x16x128xf32>
    %343 = vector.extract_strided_slice %5 {offsets = [7, 0], sizes = [1, 128], strides = [1, 1]} : vector<25x128xf32> to vector<1x128xf32>
    %344 = vector.shape_cast %343 : vector<1x128xf32> to vector<1x1x128xf32>
    %345 = vector.broadcast %344 : vector<1x1x128xf32> to vector<4x16x128xf32>
    %346 = arith.mulf %342, %345 : vector<4x16x128xf32>
    %347 = arith.addf %328, %346 : vector<4x16x128xf32>
    %348 = vector.extract_strided_slice %335 {offsets = [2, 0, 0], sizes = [4, 16, 128], strides = [1, 1, 1]} : vector<8x16x128xf32> to vector<4x16x128xf32>
    %349 = vector.extract_strided_slice %5 {offsets = [12, 0], sizes = [1, 128], strides = [1, 1]} : vector<25x128xf32> to vector<1x128xf32>
    %350 = vector.shape_cast %349 : vector<1x128xf32> to vector<1x1x128xf32>
    %351 = vector.broadcast %350 : vector<1x1x128xf32> to vector<4x16x128xf32>
    %352 = arith.mulf %348, %351 : vector<4x16x128xf32>
    %353 = arith.addf %341, %352 : vector<4x16x128xf32>
    %354 = vector.extract_strided_slice %335 {offsets = [3, 0, 0], sizes = [4, 16, 128], strides = [1, 1, 1]} : vector<8x16x128xf32> to vector<4x16x128xf32>
    %355 = vector.extract_strided_slice %5 {offsets = [17, 0], sizes = [1, 128], strides = [1, 1]} : vector<25x128xf32> to vector<1x128xf32>
    %356 = vector.shape_cast %355 : vector<1x128xf32> to vector<1x1x128xf32>
    %357 = vector.broadcast %356 : vector<1x1x128xf32> to vector<4x16x128xf32>
    %358 = arith.mulf %354, %357 : vector<4x16x128xf32>
    %359 = arith.addf %347, %358 : vector<4x16x128xf32>
    %360 = vector.extract_strided_slice %335 {offsets = [4, 0, 0], sizes = [4, 16, 128], strides = [1, 1, 1]} : vector<8x16x128xf32> to vector<4x16x128xf32>
    %361 = vector.extract_strided_slice %5 {offsets = [22, 0], sizes = [1, 128], strides = [1, 1]} : vector<25x128xf32> to vector<1x128xf32>
    %362 = vector.shape_cast %361 : vector<1x128xf32> to vector<1x1x128xf32>
    %363 = vector.broadcast %362 : vector<1x1x128xf32> to vector<4x16x128xf32>
    %364 = arith.mulf %360, %363 : vector<4x16x128xf32>
    %365 = arith.addf %353, %364 : vector<4x16x128xf32>
    %c4_102 = arith.constant 4 : index
    %c9_103 = arith.constant 9 : index
    %c0_104 = arith.constant 0 : index
    %366 = vector.load %arg12[%c4_102, %c9_103, %c0_104] : memref<12x32x128xf32, #tpu.memory_space<vmem>>, vector<8x16x128xf32>
    %367 = vector.extract_strided_slice %366 {offsets = [0, 0, 0], sizes = [4, 16, 128], strides = [1, 1, 1]} : vector<8x16x128xf32> to vector<4x16x128xf32>
    %368 = vector.extract_strided_slice %5 {offsets = [3, 0], sizes = [1, 128], strides = [1, 1]} : vector<25x128xf32> to vector<1x128xf32>
    %369 = vector.shape_cast %368 : vector<1x128xf32> to vector<1x1x128xf32>
    %370 = vector.broadcast %369 : vector<1x1x128xf32> to vector<4x16x128xf32>
    %371 = arith.mulf %367, %370 : vector<4x16x128xf32>
    %372 = arith.addf %365, %371 : vector<4x16x128xf32>
    %373 = vector.extract_strided_slice %366 {offsets = [1, 0, 0], sizes = [4, 16, 128], strides = [1, 1, 1]} : vector<8x16x128xf32> to vector<4x16x128xf32>
    %374 = vector.extract_strided_slice %5 {offsets = [8, 0], sizes = [1, 128], strides = [1, 1]} : vector<25x128xf32> to vector<1x128xf32>
    %375 = vector.shape_cast %374 : vector<1x128xf32> to vector<1x1x128xf32>
    %376 = vector.broadcast %375 : vector<1x1x128xf32> to vector<4x16x128xf32>
    %377 = arith.mulf %373, %376 : vector<4x16x128xf32>
    %378 = arith.addf %359, %377 : vector<4x16x128xf32>
    %379 = vector.extract_strided_slice %366 {offsets = [2, 0, 0], sizes = [4, 16, 128], strides = [1, 1, 1]} : vector<8x16x128xf32> to vector<4x16x128xf32>
    %380 = vector.extract_strided_slice %5 {offsets = [13, 0], sizes = [1, 128], strides = [1, 1]} : vector<25x128xf32> to vector<1x128xf32>
    %381 = vector.shape_cast %380 : vector<1x128xf32> to vector<1x1x128xf32>
    %382 = vector.broadcast %381 : vector<1x1x128xf32> to vector<4x16x128xf32>
    %383 = arith.mulf %379, %382 : vector<4x16x128xf32>
    %384 = arith.addf %372, %383 : vector<4x16x128xf32>
    %385 = vector.extract_strided_slice %366 {offsets = [3, 0, 0], sizes = [4, 16, 128], strides = [1, 1, 1]} : vector<8x16x128xf32> to vector<4x16x128xf32>
    %386 = vector.extract_strided_slice %5 {offsets = [18, 0], sizes = [1, 128], strides = [1, 1]} : vector<25x128xf32> to vector<1x128xf32>
    %387 = vector.shape_cast %386 : vector<1x128xf32> to vector<1x1x128xf32>
    %388 = vector.broadcast %387 : vector<1x1x128xf32> to vector<4x16x128xf32>
    %389 = arith.mulf %385, %388 : vector<4x16x128xf32>
    %390 = arith.addf %378, %389 : vector<4x16x128xf32>
    %391 = vector.extract_strided_slice %366 {offsets = [4, 0, 0], sizes = [4, 16, 128], strides = [1, 1, 1]} : vector<8x16x128xf32> to vector<4x16x128xf32>
    %392 = vector.extract_strided_slice %5 {offsets = [23, 0], sizes = [1, 128], strides = [1, 1]} : vector<25x128xf32> to vector<1x128xf32>
    %393 = vector.shape_cast %392 : vector<1x128xf32> to vector<1x1x128xf32>
    %394 = vector.broadcast %393 : vector<1x1x128xf32> to vector<4x16x128xf32>
    %395 = arith.mulf %391, %394 : vector<4x16x128xf32>
    %396 = arith.addf %384, %395 : vector<4x16x128xf32>
    %c4_105 = arith.constant 4 : index
    %c10_106 = arith.constant 10 : index
    %c0_107 = arith.constant 0 : index
    %397 = vector.load %arg12[%c4_105, %c10_106, %c0_107] : memref<12x32x128xf32, #tpu.memory_space<vmem>>, vector<8x16x128xf32>
    %398 = vector.extract_strided_slice %397 {offsets = [0, 0, 0], sizes = [4, 16, 128], strides = [1, 1, 1]} : vector<8x16x128xf32> to vector<4x16x128xf32>
    %399 = vector.extract_strided_slice %5 {offsets = [4, 0], sizes = [1, 128], strides = [1, 1]} : vector<25x128xf32> to vector<1x128xf32>
    %400 = vector.shape_cast %399 : vector<1x128xf32> to vector<1x1x128xf32>
    %401 = vector.broadcast %400 : vector<1x1x128xf32> to vector<4x16x128xf32>
    %402 = arith.mulf %398, %401 : vector<4x16x128xf32>
    %403 = arith.addf %396, %402 : vector<4x16x128xf32>
    %404 = vector.extract_strided_slice %397 {offsets = [1, 0, 0], sizes = [4, 16, 128], strides = [1, 1, 1]} : vector<8x16x128xf32> to vector<4x16x128xf32>
    %405 = vector.extract_strided_slice %5 {offsets = [9, 0], sizes = [1, 128], strides = [1, 1]} : vector<25x128xf32> to vector<1x128xf32>
    %406 = vector.shape_cast %405 : vector<1x128xf32> to vector<1x1x128xf32>
    %407 = vector.broadcast %406 : vector<1x1x128xf32> to vector<4x16x128xf32>
    %408 = arith.mulf %404, %407 : vector<4x16x128xf32>
    %409 = arith.addf %390, %408 : vector<4x16x128xf32>
    %410 = vector.extract_strided_slice %397 {offsets = [2, 0, 0], sizes = [4, 16, 128], strides = [1, 1, 1]} : vector<8x16x128xf32> to vector<4x16x128xf32>
    %411 = vector.extract_strided_slice %5 {offsets = [14, 0], sizes = [1, 128], strides = [1, 1]} : vector<25x128xf32> to vector<1x128xf32>
    %412 = vector.shape_cast %411 : vector<1x128xf32> to vector<1x1x128xf32>
    %413 = vector.broadcast %412 : vector<1x1x128xf32> to vector<4x16x128xf32>
    %414 = arith.mulf %410, %413 : vector<4x16x128xf32>
    %415 = arith.addf %403, %414 : vector<4x16x128xf32>
    %416 = vector.extract_strided_slice %397 {offsets = [3, 0, 0], sizes = [4, 16, 128], strides = [1, 1, 1]} : vector<8x16x128xf32> to vector<4x16x128xf32>
    %417 = vector.extract_strided_slice %5 {offsets = [19, 0], sizes = [1, 128], strides = [1, 1]} : vector<25x128xf32> to vector<1x128xf32>
    %418 = vector.shape_cast %417 : vector<1x128xf32> to vector<1x1x128xf32>
    %419 = vector.broadcast %418 : vector<1x1x128xf32> to vector<4x16x128xf32>
    %420 = arith.mulf %416, %419 : vector<4x16x128xf32>
    %421 = arith.addf %409, %420 : vector<4x16x128xf32>
    %422 = vector.extract_strided_slice %397 {offsets = [4, 0, 0], sizes = [4, 16, 128], strides = [1, 1, 1]} : vector<8x16x128xf32> to vector<4x16x128xf32>
    %423 = vector.extract_strided_slice %5 {offsets = [24, 0], sizes = [1, 128], strides = [1, 1]} : vector<25x128xf32> to vector<1x128xf32>
    %424 = vector.shape_cast %423 : vector<1x128xf32> to vector<1x1x128xf32>
    %425 = vector.broadcast %424 : vector<1x1x128xf32> to vector<4x16x128xf32>
    %426 = arith.mulf %422, %425 : vector<4x16x128xf32>
    %427 = arith.addf %415, %426 : vector<4x16x128xf32>
    %428 = arith.addf %427, %421 : vector<4x16x128xf32>
    %429 = vector.shape_cast %6 : vector<1x128xf32> to vector<1x1x128xf32>
    %430 = vector.broadcast %429 : vector<1x1x128xf32> to vector<4x16x128xf32>
    %431 = arith.addf %428, %430 : vector<4x16x128xf32>
    %cst_108 = arith.constant 4.471500e-02 : f32
    %432 = vector.broadcast %cst_108 : f32 to vector<4x16x128xf32>
    %433 = arith.mulf %432, %431 : vector<4x16x128xf32>
    %434 = arith.mulf %433, %431 : vector<4x16x128xf32>
    %435 = arith.mulf %434, %431 : vector<4x16x128xf32>
    %436 = arith.addf %431, %435 : vector<4x16x128xf32>
    %cst_109 = arith.constant 0.797884583 : f32
    %437 = vector.broadcast %cst_109 : f32 to vector<4x16x128xf32>
    %438 = arith.mulf %437, %436 : vector<4x16x128xf32>
    %cst_110 = arith.constant 5.000000e-01 : f32
    %439 = vector.broadcast %cst_110 : f32 to vector<4x16x128xf32>
    %440 = arith.mulf %439, %431 : vector<4x16x128xf32>
    %441 = math.tanh %438 : vector<4x16x128xf32>
    %cst_111 = arith.constant 1.000000e+00 : f32
    %442 = vector.broadcast %cst_111 : f32 to vector<4x16x128xf32>
    %443 = arith.addf %442, %441 : vector<4x16x128xf32>
    %444 = arith.mulf %440, %443 : vector<4x16x128xf32>
    %c6_112 = arith.constant 6 : index
    %c8_113 = arith.constant 8 : index
    %c0_114 = arith.constant 0 : index
    %445 = vector.load %arg12[%c6_112, %c8_113, %c0_114] : memref<12x32x128xf32, #tpu.memory_space<vmem>>, vector<4x16x128xf32>
    %446 = arith.addf %445, %444 : vector<4x16x128xf32>
    %447 = vector.shape_cast %446 : vector<4x16x128xf32> to vector<64x128xf32>
    %cst_115 = arith.constant dense<0.000000e+00> : vector<64x32xf32>
    %448 = tpu.matmul %447, %7, %cst_115 {dimension_numbers = #tpu.dot_dimension_numbers<[1], [0], [0], [1], [0, 0, 1, 1], [], []>} : vector<64x128xf32>, vector<128x32xf32>, vector<64x32xf32> -> vector<64x32xf32>
    %449 = vector.broadcast %9 : vector<1x32xf32> to vector<64x32xf32>
    %450 = arith.addf %448, %449 : vector<64x32xf32>
    %cst_116 = arith.constant dense<0.000000e+00> : vector<64x32xf32>
    %451 = tpu.matmul %447, %8, %cst_116 {dimension_numbers = #tpu.dot_dimension_numbers<[1], [0], [0], [1], [0, 0, 1, 1], [], []>} : vector<64x128xf32>, vector<128x32xf32>, vector<64x32xf32> -> vector<64x32xf32>
    %452 = vector.broadcast %9 : vector<1x32xf32> to vector<64x32xf32>
    %453 = arith.addf %451, %452 : vector<64x32xf32>
    %c0_117 = arith.constant 0 : index
    %c64 = arith.constant 64 : index
    %c0_118 = arith.constant 0 : index
    %454 = vector.load %arg11[%c0_117, %c64, %c0_118] : memref<1x256x32xf32, #tpu.memory_space<vmem>>, vector<1x64x32xf32>
    %455 = vector.shape_cast %454 : vector<1x64x32xf32> to vector<64x32xf32>
    %456 = vector.shape_cast %450 : vector<64x32xf32> to vector<1x64x32xf32>
    tpu.vector_store %arg11[%c0_117, %c64, %c0_118], %456 {strides = array<i32>} : memref<1x256x32xf32, #tpu.memory_space<vmem>>, vector<1x64x32xf32>,
    %c0_119 = arith.constant 0 : index
    %c192 = arith.constant 192 : index
    %c0_120 = arith.constant 0 : index
    %457 = vector.load %arg11[%c0_119, %c192, %c0_120] : memref<1x256x32xf32, #tpu.memory_space<vmem>>, vector<1x64x32xf32>
    %458 = vector.shape_cast %457 : vector<1x64x32xf32> to vector<64x32xf32>
    %459 = vector.shape_cast %453 : vector<64x32xf32> to vector<1x64x32xf32>
    tpu.vector_store %arg11[%c0_119, %c192, %c0_120], %459 {strides = array<i32>} : memref<1x256x32xf32, #tpu.memory_space<vmem>>, vector<1x64x32xf32>,
    return
  }
  func.func @transform_0(%arg0: i32) -> (i32, i32, i32) {
    %c0_i32 = arith.constant 0 : i32
    %c0_i32_0 = arith.constant 0 : i32
    %c0_i32_1 = arith.constant 0 : i32
    return %arg0, %c0_i32, %c0_i32_0 : i32, i32, i32
  }
  func.func @transform_1(%arg0: i32) -> (i32, i32) {
    %c0_i32 = arith.constant 0 : i32
    %c0_i32_0 = arith.constant 0 : i32
    %c0_i32_1 = arith.constant 0 : i32
    return %c0_i32, %c0_i32_0 : i32, i32
  }
  func.func @transform_2(%arg0: i32) -> (i32, i32) {
    %c0_i32 = arith.constant 0 : i32
    %c0_i32_0 = arith.constant 0 : i32
    %c0_i32_1 = arith.constant 0 : i32
    return %c0_i32, %c0_i32_0 : i32, i32
  }
  func.func @transform_3(%arg0: i32) -> (i32, i32) {
    %c0_i32 = arith.constant 0 : i32
    %c0_i32_0 = arith.constant 0 : i32
    %c0_i32_1 = arith.constant 0 : i32
    return %c0_i32, %c0_i32_0 : i32, i32
  }
  func.func @transform_4(%arg0: i32) -> (i32, i32) {
    %c0_i32 = arith.constant 0 : i32
    %c0_i32_0 = arith.constant 0 : i32
    %c0_i32_1 = arith.constant 0 : i32
    return %c0_i32, %c0_i32_0 : i32, i32
  }
  func.func @transform_5(%arg0: i32) -> (i32, i32) {
    %c0_i32 = arith.constant 0 : i32
    %c0_i32_0 = arith.constant 0 : i32
    %c0_i32_1 = arith.constant 0 : i32
    return %c0_i32, %c0_i32_0 : i32, i32
  }
  func.func @transform_6(%arg0: i32) -> (i32, i32) {
    %c0_i32 = arith.constant 0 : i32
    %c0_i32_0 = arith.constant 0 : i32
    %c0_i32_1 = arith.constant 0 : i32
    return %c0_i32, %c0_i32_0 : i32, i32
  }
  func.func @transform_7(%arg0: i32) -> (i32, i32) {
    %c0_i32 = arith.constant 0 : i32
    %c0_i32_0 = arith.constant 0 : i32
    %c0_i32_1 = arith.constant 0 : i32
    return %c0_i32, %c0_i32_0 : i32, i32
  }
  func.func @transform_8(%arg0: i32) -> (i32, i32) {
    %c0_i32 = arith.constant 0 : i32
    %c0_i32_0 = arith.constant 0 : i32
    %c0_i32_1 = arith.constant 0 : i32
    return %c0_i32, %c0_i32_0 : i32, i32
  }
  func.func @transform_9(%arg0: i32) -> (i32, i32) {
    %c0_i32 = arith.constant 0 : i32
    %c0_i32_0 = arith.constant 0 : i32
    %c0_i32_1 = arith.constant 0 : i32
    return %c0_i32, %c0_i32_0 : i32, i32
  }
  func.func @transform_10(%arg0: i32) -> (i32, i32, i32) {
    %c0_i32 = arith.constant 0 : i32
    %c0_i32_0 = arith.constant 0 : i32
    %c0_i32_1 = arith.constant 0 : i32
    return %arg0, %c0_i32, %c0_i32_0 : i32, i32, i32
  }
}

</mosaic_0001>

<bundles_post_ra>
// kernel: tpu_custom_call.1
= control target key start
LH: loop header
LB: loop body
LE: loop exit
PB: predicated region body
PF: predicated region fallthrough
CT: control target
= control target key end

     0   :  { %s3971_s13 = smov 0   ;;  %s6004_s0 = inlined_call_operand.vmem [shape: f32[2,256,32], index: 0, kind: input, shape index: {}]   ;;  %s6005_s1 = inlined_call_operand.vmem [shape: f32[32,128], index: 1, kind: input, shape index: {}]   ;;  %s6006_s2 = inlined_call_operand.vmem [shape: f32[32,128], index: 2, kind: input, shape index: {}]   ;;  %s6007_s3 = inlined_call_operand.vmem [shape: f32[1,128], index: 3, kind: input, shape index: {}]   ;;  %s6008_s4 = inlined_call_operand.vmem [shape: f32[1,128], index: 4, kind: input, shape index: {}]   ;;  %s6009_s5 = inlined_call_operand.vmem [shape: f32[25,128], index: 5, kind: input, shape index: {}]   ;;  %s6010_s6 = inlined_call_operand.vmem [shape: f32[1,128], index: 6, kind: input, shape index: {}]   ;;  %s6011_s7 = inlined_call_operand.vmem [shape: f32[128,32], index: 7, kind: input, shape index: {}]   ;;  %s6012_s8 = inlined_call_operand.vmem [shape: f32[128,32], index: 8, kind: input, shape index: {}]   ;;  %s6013_s9 = inlined_call_operand.vmem [shape: f32[1,32], index: 9, kind: input, shape index: {}]   ;;  %s6014_s10 = inlined_call_operand.vmem [shape: f32[2,256,32], index: 10, kind: output, shape index: {}]  }
   0x1 LB: > { %s3127_s14 = sadd.s32 4294967295, %s3913_s13   ;;  %p3131_p0 = scmp.ge.s32.totalorder %s3913_s13, 1  ;;  %s3913_s13 = sphi %s3971_s13, %s20_s13  }
   0x2   : > { %p312_p1 = scmp.lt.s32.totalorder %s3913_s13, 3 }
   0x4   : > { %p313_p2 = pnand %p3131_p0, %p312_p1 }
   0x6   : > { %316 = sbr.rel (%p313_p2) target bundleno = 814 (0x32e), region = 60 }
   0xd   : > { %v364_v0 = vld [vmem:[%s6006_s2] sm:$0xff]  ;;  %v365_v1 = vld [vmem:[%s6006_s2 + $0x8] sm:$0xff]  ;;  %v366_v2 = vld [vmem:[%s6006_s2 + $0x10] sm:$0xff]  ;;  %p350_p3 = scmp.lt.s32.totalorder %s3127_s14, 1  ;;  %vm475_vm0 = vcmask 261120   ;;  %v3915_v44 = vmov 0.0  }
   0xe   : > { %v3603_v3 = vpack.c.bf16 %v365_v1, %v364_v0  ;;  %v367_v4 = vld [vmem:[%s6006_s2 + $0x18] sm:$0xff]  ;;  %v360_v6 = vld [vmem:[%s6005_s1] sm:$0xff]  ;;  %v361_v7 = vld [vmem:[%s6005_s1 + $0x8] sm:$0xff]  ;;  %409 = vst [vmem:[#allocation2] sm:$0xff] %v3915_v44 }
   0xf   : > { %v3607_v5 = vpack.c.bf16 %v367_v4, %v366_v2  ;;  %s6527_s14 = smov (!%p350_p3, %s3127_s14), 1  ;;  %v3611_v8 = vpack.c.bf16 %v361_v7, %v360_v6  ;;  %v362_v11 = vld [vmem:[%s6005_s1 + $0x10] sm:$0xff]  ;;  %v363_v12 = vld [vmem:[%s6005_s1 + $0x18] sm:$0xff]  ;;  %412 = vst [vmem:[#allocation2 + $0x18] sm:$0xff] %v3915_v44  ;;  %413 = vst [vmem:[#allocation2 + $0x20] sm:$0xff] %v3915_v44 }
  0x10   : > { %3604 = vmatprep.subr.bf16.mxu0 %v3603_v3  ;;  %3763 = vmatprep.subr.bf16.mxu1 %v3603_v3  ;;  %s3181_s27 = sshll.u32 %s6527_s14, 8  ;;  %v3615_v17 = vpack.c.bf16 %v363_v12, %v362_v11  ;;  %416 = vst [vmem:[#allocation2 + $0x38] sm:$0xff] %v3915_v44  ;;  %418 = vst [vmem:[#allocation2 + $0x140] sm:$0xff] %v3915_v44  ;;  %v376_v45 = vld [vmem:[%s6011_s7] sm:$0xff]  ;;  %v377_v46 = vld [vmem:[%s6011_s7 + $0x8] sm:$0xff] }
  0x11   : > { %3606 = vmatpush3.bf16.msra.mxu0 %v3603_v3  ;;  %3765 = vmatpush3.bf16.msra.mxu1 %v3603_v3  ;;  %s4005_s30 = scalar_lea.vmem %s6004_s0, %s3181_s27  ;;  %421 = vst [vmem:[#allocation2 + $0x158] sm:$0xff] %v3915_v44  ;;  %422 = vst [vmem:[#allocation2 + $0x160] sm:$0xff] %v3915_v44  ;;  %v392_v47 = vld [vmem:[%s6012_s8] sm:$0xff]  ;;  %v4094_v48 = vpack.c.bf16 %v377_v46, %v376_v45  ;;  %v393_v49 = vld [vmem:[%s6012_s8 + $0x8] sm:$0xff]  ;;  %s5903_s18 = scalar_lea.vmem %s6014_s10, %s3181_s27 }
  0x12   : > { %3608 = vmatprep.subr.bf16.mxu0 %v3607_v5  ;;  %3764 = vmatprep.subr.bf16.mxu1 %v3607_v5  ;;  %v459_v9 = vld [vmem:[%s4005_s30 + $0x80] sm:$0xff]  ;;  %v469_v10 = vld [vmem:[%s4005_s30 + $0xd0] sm:$0xff]  ;;  %v460_v13 = vld [vmem:[%s4005_s30 + $0x88] sm:$0xff]  ;;  %425 = vst [vmem:[#allocation2 + $0x178] sm:$0xff] %v3915_v44  ;;  %v4105_v52 = vpack.c.bf16 %v393_v49, %v392_v47 }
  0x13   : > { %3343 = vmatprep.mubr.msk.f32.mxu0 %vm475_vm0, %v459_v9  ;;  %3358 = vmatprep.mubr.msk.f32.mxu1 %vm475_vm0, %v469_v10  ;;  %v470_v14 = vld [vmem:[%s4005_s30 + $0xd8] sm:$0xff]  ;;  %v461_v15 = vld [vmem:[%s4005_s30 + $0x90] sm:$0xff]  ;;  %v471_v16 = vld [vmem:[%s4005_s30 + $0xe0] sm:$0xff]  ;;  %427 = vst [vmem:[#allocation2 + $0x40] sm:$0xff] %v3915_v44 }
  0x14   : > { %v462_v18 = vld [vmem:[%s4005_s30 + $0x98] sm:$0xff]  ;;  %v472_v19 = vld [vmem:[%s4005_s30 + $0xe8] sm:$0xff]  ;;  %v463_v20 = vld [vmem:[%s4005_s30 + $0xa0] sm:$0xff]  ;;  %428 = vst [vmem:[#allocation2 + $0x60] sm:$0xff] %v3915_v44 }
  0x15   : > { %3610 = vmatpush3.bf16.msra.mxu0 %v3607_v5  ;;  %3766 = vmatpush3.bf16.msra.mxu1 %v3607_v5  ;;  %v473_v21 = vld [vmem:[%s4005_s30 + $0xf0] sm:$0xff]  ;;  %v464_v22 = vld [vmem:[%s4005_s30 + $0xa8] sm:$0xff]  ;;  %v474_v23 = vld [vmem:[%s4005_s30 + $0xf8] sm:$0xff]  ;;  %429 = vst [vmem:[#allocation2 + $0x80] sm:$0xff] %v3915_v44 }
  0x16   : > { %3612 = vmatprep.subr.bf16.mxu0 %v3611_v8  ;;  %3620 = vmatprep.subr.bf16.mxu1 %v3603_v3  ;;  %v465_v24 = vld [vmem:[%s4005_s30 + $0xb0] sm:$0xff]  ;;  %v1044_v25 = vld [vmem:[%s4005_s30 + $0x60] sm:$0xff]  ;;  %v466_v26 = vld [vmem:[%s4005_s30 + $0xb8] sm:$0xff]  ;;  %430 = vst [vmem:[#allocation2 + $0xa0] sm:$0xff] %v3915_v44 }
  0x17   : > { %v1045_v27 = vld [vmem:[%s4005_s30 + $0x68] sm:$0xff]  ;;  %v467_v28 = vld [vmem:[%s4005_s30 + $0xc0] sm:$0xff]  ;;  %v1046_v29 = vld [vmem:[%s4005_s30 + $0x70] sm:$0xff]  ;;  %431 = vst [vmem:[#allocation2 + $0xc0] sm:$0xff] %v3915_v44 }
  0x18   : > { %3344 = vmatmul.mubr.msk.f32.vlgmr.msra.gmra.mrb[0].mxu0 %vm475_vm0, %v460_v13  ;;  %3359 = vmatmul.mubr.msk.f32.vlgmr.msra.gmra.mrb[0].mxu1 %vm475_vm0, %v470_v14  ;;  %v468_v30 = vld [vmem:[%s4005_s30 + $0xc8] sm:$0xff]  ;;  %v1047_v31 = vld [vmem:[%s4005_s30 + $0x78] sm:$0xff]  ;;  %v443_v32 = vld [vmem:[%s4005_s30] sm:$0xff]  ;;  %432 = vst [vmem:[#allocation2 + $0xe0] sm:$0xff] %v3915_v44 }
  0x19   : > { %3614 = vmatpush3.bf16.msra.mxu0 %v3611_v8  ;;  %3346 = vmatprep.mubr.msk.f32.mxu0 %vm475_vm0, %v461_v15  ;;  %v444_v33 = vld [vmem:[%s4005_s30 + $0x8] sm:$0xff]  ;;  %v445_v34 = vld [vmem:[%s4005_s30 + $0x10] sm:$0xff]  ;;  %v446_v35 = vld [vmem:[%s4005_s30 + $0x18] sm:$0xff]  ;;  %433 = vst [vmem:[#allocation2 + $0x100] sm:$0xff] %v3915_v44 }
  0x1a   : > { %3361 = vmatprep.mubr.msk.f32.mxu1 %vm475_vm0, %v471_v16  ;;  %3622 = vmatpush3.bf16.msra.mxu1 %v3603_v3  ;;  %v447_v36 = vld [vmem:[%s4005_s30 + $0x20] sm:$0xff]  ;;  %v448_v37 = vld [vmem:[%s4005_s30 + $0x28] sm:$0xff]  ;;  %v449_v38 = vld [vmem:[%s4005_s30 + $0x30] sm:$0xff]  ;;  %434 = vst [vmem:[#allocation2 + $0x120] sm:$0xff] %v3915_v44 }
  0x1b   : > { %3624 = vmatprep.subr.bf16.mxu1 %v3607_v5  ;;  %3616 = vmatprep.subr.bf16.mxu0 %v3615_v17  ;;  %v450_v39 = vld [vmem:[%s4005_s30 + $0x38] sm:$0xff]  ;;  %v451_v40 = vld [vmem:[%s4005_s30 + $0x40] sm:$0xff]  ;;  %v452_v41 = vld [vmem:[%s4005_s30 + $0x48] sm:$0xff]  ;;  %435 = vst [vmem:[#allocation2 + $0x58] sm:$0xff] %v3915_v44 }
  0x1c   : > { %3347 = vmatmul.mubr.msk.f32.gmra.mrb[2].mxu0 %vm475_vm0, %v462_v18  ;;  %3362 = vmatmul.mubr.msk.f32.gmra.mrb[2].mxu1 %vm475_vm0, %v472_v19  ;;  %v453_v42 = vld [vmem:[%s4005_s30 + $0x50] sm:$0xff]  ;;  %v454_v43 = vld [vmem:[%s4005_s30 + $0x58] sm:$0xff]  ;;  %436 = vst [vmem:[#allocation2 + $0x78] sm:$0xff] %v3915_v44  ;;  %437 = vst [vmem:[#allocation2 + $0x98] sm:$0xff] %v3915_v44 }
  0x1d   : > { %3349 = vmatprep.mubr.msk.f32.mxu0 %vm475_vm0, %v463_v20  ;;  %3364 = vmatprep.mubr.msk.f32.mxu1 %vm475_vm0, %v473_v21  ;;  %438 = vst [vmem:[#allocation2 + $0xb8] sm:$0xff] %v3915_v44  ;;  %439 = vst [vmem:[#allocation2 + $0xd8] sm:$0xff] %v3915_v44  ;;  %v378_v50 = vld [vmem:[%s6011_s7 + $0x10] sm:$0xff]  ;;  %v379_v51 = vld [vmem:[%s6011_s7 + $0x18] sm:$0xff] }
  0x1e   : > { %3626 = vmatpush3.bf16.msra.mxu1 %v3607_v5  ;;  %3618 = vmatpush3.bf16.msra.mxu0 %v3615_v17  ;;  %440 = vst [vmem:[#allocation2 + $0xf8] sm:$0xff] %v3915_v44  ;;  %441 = vst [vmem:[#allocation2 + $0x118] sm:$0xff] %v3915_v44  ;;  %v4107_v53 = vpack.c.bf16 %v379_v51, %v378_v50  ;;  %v394_v54 = vld [vmem:[%s6012_s8 + $0x10] sm:$0xff]  ;;  %v395_v55 = vld [vmem:[%s6012_s8 + $0x18] sm:$0xff] }
  0x1f   : > { %3628 = vmatprep.subr.bf16.mxu1 %v3611_v8  ;;  %442 = vst [vmem:[#allocation2 + $0x138] sm:$0xff] %v3915_v44  ;;  %6208 = vst [vmem:[#allocation3_spill] sm:$0xff] %v4094_v48  ;;  %v380_v56 = vld [vmem:[%s6011_s7 + $0x20] sm:$0xff]  ;;  %v4119_v57 = vpack.c.bf16 %v395_v55, %v394_v54  ;;  %v381_v58 = vld [vmem:[%s6011_s7 + $0x28] sm:$0xff]  ;;  %3668 = vmatprep.subr.bf16.mxu0 %v4105_v52 }
  0x20   : > { %3350 = vmatmul.mubr.msk.f32.gmra.mrb[4].mxu0 %vm475_vm0, %v464_v22  ;;  %3365 = vmatmul.mubr.msk.f32.gmra.mrb[4].mxu1 %vm475_vm0, %v474_v23  ;;  %6209 = vst [vmem:[#allocation4_spill] sm:$0xff] %v4105_v52  ;;  %6210 = vst [vmem:[#allocation5_spill] sm:$0xff] %v4107_v53  ;;  %v396_v59 = vld [vmem:[%s6012_s8 + $0x20] sm:$0xff]  ;;  %v397_v60 = vld [vmem:[%s6012_s8 + $0x28] sm:$0xff]  ;;  %v4134_v61 = vpack.c.bf16 %v381_v58, %v380_v56 }
  0x21   : > { %3352 = vmatprep.mubr.msk.f32.mxu0 %vm475_vm0, %v465_v24  ;;  %3407 = vmatprep.mubr.msk.f32.mxu1 %vm475_vm0, %v1044_v25  ;;  %6211 = vst [vmem:[#allocation6_spill] sm:$0xff] %v4119_v57  ;;  %v4137_v62 = vpack.c.bf16 %v397_v60, %v396_v59  ;;  %v382_v63 = vld [vmem:[%s6011_s7 + $0x30] sm:$0xff]  ;;  %v383_v0 = vld [vmem:[%s6011_s7 + $0x38] sm:$0xff]  ;;  %v384_v5 = vld [vmem:[%s6011_s7 + $0x40] sm:$0xff] }
  0x22   : > { %6212 = vst [vmem:[#allocation7_spill] sm:$0xff] %v4134_v61  ;;  %v398_v1 = vld [vmem:[%s6012_s8 + $0x30] sm:$0xff]  ;;  %v399_v2 = vld [vmem:[%s6012_s8 + $0x38] sm:$0xff]  ;;  %v4154_v3 = vpack.c.bf16 %v383_v0, %v382_v63  ;;  %v385_v6 = vld [vmem:[%s6011_s7 + $0x48] sm:$0xff] }
  0x23   : > { %6213 = vst [vmem:[#allocation8_spill] sm:$0xff] %v4137_v62  ;;  %v4157_v4 = vpack.c.bf16 %v399_v2, %v398_v1  ;;  %v400_v7 = vld [vmem:[%s6012_s8 + $0x40] sm:$0xff]  ;;  %v4174_v10 = vpack.c.bf16 %v385_v6, %v384_v5  ;;  %v386_v12 = vld [vmem:[%s6011_s7 + $0x50] sm:$0xff]  ;;  %v389_v22 = vld [vmem:[%s6011_s7 + $0x68] sm:$0xff] }
  0x24   : > { %3353 = vmatmul.mubr.msk.f32.gmra.mrb[6].mxu0 %vm475_vm0, %v466_v26  ;;  %3408 = vmatmul.mubr.msk.f32.vlgmr.msra.gmra.mrb[6].mxu1 %vm475_vm0, %v1045_v27  ;;  %6214 = vst [vmem:[#allocation9_spill] sm:$0xff] %v4154_v3  ;;  %v402_v14 = vld [vmem:[%s6012_s8 + $0x50] sm:$0xff]  ;;  %v388_v21 = vld [vmem:[%s6011_s7 + $0x60] sm:$0xff]  ;;  %v405_v24 = vld [vmem:[%s6012_s8 + $0x68] sm:$0xff] }
  0x25   : > { %3355 = vmatprep.mubr.msk.f32.mxu0 %vm475_vm0, %v467_v28  ;;  %3410 = vmatprep.mubr.msk.f32.mxu1 %vm475_vm0, %v1046_v29  ;;  %6215 = vst [vmem:[#allocation10_spill] sm:$0xff] %v4157_v4  ;;  %6216 = vst [vmem:[#allocation11_spill] sm:$0xff] %v4174_v10  ;;  %v404_v23 = vld [vmem:[%s6012_s8 + $0x60] sm:$0xff]  ;;  %v4224_v28 = vpack.c.bf16 %v389_v22, %v388_v21  ;;  %v4278_v47 = vld [vmem:[%s6009_s5 + $0x8] sm:$0xff] }
  0x26   : > { %3630 = vmatpush3.bf16.msra.mxu1 %v3611_v8  ;;  %v401_v8 = vld [vmem:[%s6012_s8 + $0x48] sm:$0xff] }
  0x27   : > { %3632 = vmatprep.subr.bf16.mxu1 %v3615_v17  ;;  %v4177_v11 = vpack.c.bf16 %v401_v8, %v400_v7  ;;  %6220 = vst [vmem:[#allocation15_spill] sm:$0xff] %v4224_v28 }
  0x28   : > { %3356 = vmatmul.mubr.msk.f32.gmra.mrb[8].mxu0 %vm475_vm0, %v468_v30  ;;  %3411 = vmatmul.mubr.msk.f32.gmra.mrb[8].mxu1 %vm475_vm0, %v1047_v31  ;;  %v4230_v30 = vpack.c.bf16 %v405_v24, %v404_v23 }
  0x29   : > { %3375 = vmatprep.mubr.msk.f32.mxu0 %vm475_vm0, %v443_v32  ;;  %3421 = vmatprep.mubr.msk.f32.mxu1 %vm475_vm0, %v459_v9  ;;  %v863_v9 = vlaneseq  ;;  %6217 = vst [vmem:[#allocation12_spill] sm:$0xff] %v4177_v11  ;;  %v391_v32 = vld [vmem:[%s6011_s7 + $0x78] sm:$0xff] }
  0x2a   : > { %3634 = vmatpush3.bf16.msra.mxu1 %v3615_v17  ;;  %6221 = vst [vmem:[#allocation16_spill] sm:$0xff] %v4230_v30 }
  0x2b   : > { %3636 = vmatprep.subr.bf16.mxu1 %v4094_v48 }
  0x2c   : > { %3376 = vmatmul.mubr.msk.f32.vlgmr.msra.gmra.mrb[0].mxu0 %vm475_vm0, %v444_v33  ;;  %v4241_v33 = vld [vmem:[%s6007_s3] sm:$0x1] }
  0x2d   : > { %3378 = vmatprep.mubr.msk.f32.mxu0 %vm475_vm0, %v445_v34  ;;  %3422 = vmatmul.mubr.msk.f32.vlgmr.msra.gmra.mrb[10].mxu1 %vm475_vm0, %v460_v13  ;;  %v387_v13 = vld [vmem:[%s6011_s7 + $0x58] sm:$0xff]  ;;  %v406_v34 = vld [vmem:[%s6012_s8 + $0x70] sm:$0xff] }
  0x2e   : > { %3424 = vmatprep.mubr.msk.f32.mxu1 %vm475_vm0, %v461_v15  ;;  %3638 = vmatpush3.bf16.msra.mxu1 %v4094_v48  ;;  %v403_v15 = vld [vmem:[%s6012_s8 + $0x58] sm:$0xff]  ;;  %v4198_v19 = vpack.c.bf16 %v387_v13, %v386_v12 }
  0x2f   : > { %3670 = vmatpush3.bf16.msra.mxu0 %v4105_v52  ;;  %3640 = vmatprep.subr.bf16.mxu1 %v4107_v53  ;;  %v4201_v20 = vpack.c.bf16 %v403_v15, %v402_v14 }
  0x30   : > { %3379 = vmatmul.mubr.msk.f32.gmra.mrb[2].mxu0 %vm475_vm0, %v446_v35  ;;  %3672 = vmatprep.subr.bf16.mxu0 %v4119_v57  ;;  %6218 = vst [vmem:[#allocation13_spill] sm:$0xff] %v4198_v19  ;;  %v407_v35 = vld [vmem:[%s6012_s8 + $0x78] sm:$0xff] }
  0x31   : > { %3381 = vmatprep.mubr.msk.f32.mxu0 %vm475_vm0, %v447_v36  ;;  %3425 = vmatmul.mubr.msk.f32.gmra.mrb[12].mxu1 %vm475_vm0, %v462_v18  ;;  %v864_v18 = vshrl.u32 %v863_v9, 7  ;;  %6219 = vst [vmem:[#allocation14_spill] sm:$0xff] %v4201_v20  ;;  %v4321_v9 = vld [vmem:[%s6009_s5 + $0x10] sm:$0xff] }
  0x32   : > { %3642 = vmatpush3.bf16.msra.mxu1 %v4107_v53 }
  0x33   : > { %3674 = vmatpush3.bf16.msra.mxu0 %v4119_v57  ;;  %3644 = vmatprep.subr.bf16.mxu1 %v4134_v61  ;;  %v4280_v49 = vsub.s32 5, %v864_v18  ;;  %v4301_v59 = vsub.s32 7, %v864_v18  ;;  %v4303_v60 = vsub.s32 4, %v864_v18  ;;  %v4305_v63 = vsub.s32 1, %v864_v18 }
  0x34   : > { %3382 = vmatmul.mubr.msk.f32.gmra.mrb[4].mxu0 %vm475_vm0, %v448_v37  ;;  %3676 = vmatprep.subr.bf16.mxu0 %v4137_v62  ;;  %v4310_v5 = vsub.s32 6, %v864_v18  ;;  %v4312_v6 = vsub.s32 3, %v864_v18 }
  0x35   : > { %3384 = vmatprep.mubr.msk.f32.mxu0 %vm475_vm0, %v449_v38  ;;  %v4329_v13 = vrot.slane %v4278_v47, %v4301_v59  ;;  %v4342_v22 = vrot.slane %v4321_v9, %v4280_v49  ;;  %v4347_v24 = vrot.slane %v4321_v9, %v4303_v60 }
  0x36   : > { %3646 = vmatpush3.bf16.msra.mxu1 %v4134_v61 }
  0x37   : > { %3678 = vmatpush3.bf16.msra.mxu0 %v4137_v62  ;;  %3648 = vmatprep.subr.bf16.mxu1 %v4154_v3  ;;  %6229 = vst [vmem:[#allocation24_spill] sm:$0xff] %v4347_v24 }
  0x38   : > { %3385 = vmatmul.mubr.msk.f32.gmra.mrb[6].mxu0 %vm475_vm0, %v450_v39  ;;  %3680 = vmatprep.subr.bf16.mxu0 %v4157_v4 }
  0x39   : > { %3387 = vmatprep.mubr.msk.f32.mxu0 %vm475_vm0, %v451_v40 }
  0x3a   : > { %3650 = vmatpush3.bf16.msra.mxu1 %v4154_v3 }
  0x3b   : > { %3682 = vmatpush3.bf16.msra.mxu0 %v4157_v4  ;;  %3652 = vmatprep.subr.bf16.mxu1 %v4174_v10 }
  0x3c   : > { %3388 = vmatmul.mubr.msk.f32.gmra.mrb[8].mxu0 %vm475_vm0, %v452_v41  ;;  %3684 = vmatprep.subr.bf16.mxu0 %v4177_v11  ;;  %v4261_v41 = vpack.c.bf16 %v407_v35, %v406_v34 }
  0x3d   : > { %3390 = vmatprep.mubr.msk.f32.mxu0 %vm475_vm0, %v453_v42  ;;  %v4263_v42 = vsub.s32 2, %v864_v18 }
  0x3e   : > { %3654 = vmatpush3.bf16.msra.mxu1 %v4174_v10  ;;  %6223 = vst [vmem:[#allocation18_spill] sm:$0xff] %v4261_v41 }
  0x3f   : > { %3686 = vmatpush3.bf16.msra.mxu0 %v4177_v11  ;;  %3656 = vmatprep.subr.bf16.mxu1 %v4198_v19  ;;  %v4295_v56 = vrot.slane %v4278_v47, %v4263_v42 }
  0x40   : > { %3391 = vmatmul.mubr.msk.f32.gmra.mrb[10].mxu0 %vm475_vm0, %v454_v43  ;;  %3688 = vmatprep.subr.bf16.mxu0 %v4201_v20  ;;  %v4268_v43 = vld [vmem:[%s6009_s5] sm:$0xff] }
  0x41   : > { %3393 = vmatprep.mubr.msk.f32.mxu0 %vm475_vm0, %v1044_v25  ;;  %6225 = vst [vmem:[#allocation20_spill] sm:$0xff] %v4295_v56  ;;  %v4299_v58 = vrot.slane %v4268_v43, %v4263_v42  ;;  %v4325_v12 = vrot.slane %v4268_v43, %v4280_v49 }
  0x42   : > { %3658 = vmatpush3.bf16.msra.mxu1 %v4198_v19 }
  0x43   : > { %3690 = vmatpush3.bf16.msra.mxu0 %v4201_v20  ;;  %3660 = vmatprep.subr.bf16.mxu1 %v4224_v28  ;;  %6226 = vst [vmem:[#allocation21_spill] sm:$0xff] %v4299_v58  ;;  %6227 = vst [vmem:[#allocation22_spill] sm:$0xff] %v4325_v12 }
  0x44   : > { %3394 = vmatmul.mubr.msk.f32.gmra.mrb[12].mxu0 %vm475_vm0, %v1045_v27  ;;  %v4220_v27 = vsub.s32 0, %v864_v18  ;;  %3692 = vmatprep.subr.bf16.mxu0 %v4230_v30 }
  0x45   : > { %3396 = vmatprep.mubr.msk.f32.mxu0 %vm475_vm0, %v1046_v29  ;;  %v369_v29 = vld [vmem:[%s6008_s4] sm:$0x1] }
  0x46   : > { %v1052_v38 = vrot.slane %v369_v29, %v4220_v27  ;;  %v370_v40 = vadd.f32 %v369_v29, %v4241_v33  ;;  %3662 = vmatpush3.bf16.msra.mxu1 %v4224_v28  ;;  %v4291_v55 = vrot.slane %v4268_v43, %v4220_v27  ;;  %v4338_v21 = vrot.slane %v4321_v9, %v4220_v27 }
  0x47   : > { %3694 = vmatpush3.bf16.msra.mxu0 %v4230_v30  ;;  %v4351_v29 = vrot.slane %v4268_v43, %v4305_v63 }
  0x48   : > { %3397 = vmatmul.mubr.msk.f32.gmra.mrb[14].mxu0 %vm475_vm0, %v1047_v31  ;;  %v390_v31 = vld [vmem:[%s6011_s7 + $0x70] sm:$0xff]  ;;  %v4285_v51 = vrot.slane %v370_v40, %v4220_v27  ;;  %3696 = vmatprep.subr.bf16.mxu0 %v4261_v41  ;;  %6224 = vst [vmem:[#allocation19_spill] sm:$0xff] %v4291_v55  ;;  %6228 = vst [vmem:[#allocation23_spill] sm:$0xff] %v4338_v21 }
  0x49   : > { %v4257_v39 = vpack.c.bf16 %v391_v32, %v390_v31  ;;  %6230 = vst [vmem:[#allocation25_spill] sm:$0xff] %v4351_v29 }
  0x4b   : > { %6222 = vst [vmem:[#allocation17_spill] sm:$0xff] %v4257_v39  ;;  %3664 = vmatprep.subr.bf16.mxu1 %v4257_v39  ;;  %3698 = vmatpush3.bf16.msra.mxu0 %v4261_v41 }
  0x4c   : > { %3666 = vmatpush3.bf16.msra.mxu1 %v4257_v39  ;;  %3732 = vmatprep.subr.bf16.mxu0 %v4105_v52  ;;  %v4385_v39 = vrot.slane %v4278_v47, %v4303_v60 }
  0x4d   : > { %3700 = vmatprep.subr.bf16.mxu1 %v4094_v48 }
  0x4e   : > { %6233 = vst [vmem:[#allocation28_spill] sm:$0xff] %v4385_v39 }
  0xeb   : > { %v4191_v16 = vpop.f32.mrb[0].mxu1 }
  0xec   : > { %v4194_v17 = vpop.f32.mrb[1].mxu1 }
  0xef   : > { %v4215_v25 = vpop.f32.mrb[2].mxu1 }
  0xf0   : > { %v4218_v26 = vpop.f32.mrb[3].mxu1 }
  0xf3   : > { %v4249_v36 = vpop.f32.mrb[4].mxu1 }
  0xf4   : > { %v4252_v37 = vpop.f32.mrb[5].mxu1 }
  0xf7   : > { %v3409_v44 = vpop.f32.mrb[6].mxu1 }
  0xf8   : > { %v4271_v45 = vadd.f32 %v3409_v44, %v1052_v38  ;;  %v1132_v46 = vpop.f32.mrb[7].mxu1 }
  0xf9   : > { %v4282_v50 = vadd.f32 %v1132_v46, %v1052_v38 }
  0xfa   : > { %v1152_v54 = vmul.f32 0.044715, %v4271_v45 }
  0xfb   : > { %v1151_v0 = vmul.f32 0.044715, %v4282_v50  ;;  %v3412_v1 = vpop.f32.mrb[8].mxu1 }
  0xfc   : > { %v1156_v2 = vmul.f32 %v1152_v54, %v4271_v45  ;;  %v4314_v7 = vadd.f32 %v3412_v1, %v1052_v38  ;;  %v1142_v8 = vpop.f32.mrb[9].mxu1 }
  0xfd   : > { %v1155_v14 = vmul.f32 %v1151_v0, %v4282_v50  ;;  %v4332_v15 = vadd.f32 %v1142_v8, %v1052_v38  ;;  %v4358_v38 = vrot.slane %v4268_v43, %v4310_v5  ;;  %v4368_v0 = vrot.slane %v4278_v47, %v4312_v6 }
  0xfe   : > { %v1160_v18 = vmul.f32 %v1156_v2, %v4271_v45  ;;  %v1154_v23 = vmul.f32 0.044715, %v4314_v7  ;;  %v1174_v48 = vmul.f32 0.5, %v4314_v7 }
  0xff   : > { %v1159_v31 = vmul.f32 %v1155_v14, %v4282_v50  ;;  %v1153_v32 = vmul.f32 0.044715, %v4332_v15  ;;  %v3377_v34 = vpop.f32.mrb[0].mxu0  ;;  %6231 = vst [vmem:[#allocation26_spill] sm:$0xff] %v4358_v38 }
 0x100   : > { %v1164_v35 = vadd.f32 %v1160_v18, %v4271_v45  ;;  %v1158_v40 = vmul.f32 %v1154_v23, %v4314_v7  ;;  %v4362_v44 = vadd.f32 %v3377_v34, %v4285_v51  ;;  %v783_v46 = vpop.f32.mrb[1].mxu0  ;;  %v4364_v54 = vpop.f32.mrb[10].mxu1  ;;  %v4379_v23 = vrot.slane %v4268_v43, %v4301_v59 }
 0x101   : > { %v1163_v1 = vadd.f32 %v1159_v31, %v4282_v50  ;;  %v1157_v2 = vmul.f32 %v1153_v32, %v4332_v15  ;;  %v4373_v8 = vadd.f32 %v4285_v51, %v783_v46  ;;  %v4375_v14 = vpop.f32.mrb[11].mxu1 }
 0x102   : > { %v1168_v18 = vmul.f32 0.7978846, %v1164_v35  ;;  %6232 = vst [vmem:[#allocation27_spill] sm:$0xff] %v4379_v23  ;;  %v1162_v34 = vmul.f32 %v1158_v40, %v4314_v7  ;;  %v885_v41 = vmul.f32 0.044715, %v4362_v44 }
 0x103   : > { %v1167_v31 = vmul.f32 0.7978846, %v1163_v1  ;;  %v1161_v32 = vmul.f32 %v1157_v2, %v4332_v15  ;;  %v884_v46 = vmul.f32 0.044715, %v4373_v8  ;;  %v3380_v30 = vpop.f32.mrb[2].mxu0 }
 0x104   : > { %3792 = vtanh.f32 %v1168_v18  ;;  %v1166_v35 = vadd.f32 %v1162_v34, %v4314_v7  ;;  %v901_v28 = vmul.f32 %v885_v41, %v4362_v44  ;;  %v4392_v20 = vadd.f32 %v3380_v30, %v4285_v51  ;;  %v793_v40 = vpop.f32.mrb[3].mxu0  ;;  %v4394_v19 = vpop.f32.mrb[12].mxu1 }
 0x105   : > { %3794 = vtanh.f32 %v1167_v31  ;;  %v1165_v11 = vadd.f32 %v1161_v32, %v4332_v15  ;;  %v900_v1 = vmul.f32 %v884_v46, %v4373_v8  ;;  %v4399_v2 = vadd.f32 %v4285_v51, %v793_v40  ;;  %v4401_v10 = vpop.f32.mrb[13].mxu1 }
 0x106   : > { %v4405_v18 = vrot.slane %v4321_v9, %v4305_v63  ;;  %v1170_v41 = vmul.f32 0.7978846, %v1166_v35  ;;  %v917_v30 = vmul.f32 %v901_v28, %v4362_v44  ;;  %v887_v34 = vmul.f32 0.044715, %v4392_v20 }
 0x107   : > { %v4411_v31 = vrot.slane %v4321_v9, %v4310_v5  ;;  %v1169_v32 = vmul.f32 0.7978846, %v1165_v11  ;;  %v916_v46 = vmul.f32 %v900_v1, %v4373_v8  ;;  %v886_v40 = vmul.f32 0.044715, %v4399_v2  ;;  %v3383_v4 = vpop.f32.mrb[4].mxu0 }
 0x108   : > { %6234 = vst [vmem:[#allocation29_spill] sm:$0xff] %v4405_v18  ;;  %3796 = vtanh.f32 %v1170_v41  ;;  %v933_v3 = vadd.f32 %v917_v30, %v4362_v44  ;;  %v903_v62 = vmul.f32 %v887_v34, %v4392_v20  ;;  %v4418_v35 = vadd.f32 %v3383_v4, %v4285_v51  ;;  %v803_v28 = vpop.f32.mrb[5].mxu0 }
 0x109   : > { %6235 = vst [vmem:[#allocation30_spill] sm:$0xff] %v4411_v31  ;;  %3798 = vtanh.f32 %v1169_v32  ;;  %v932_v61 = vadd.f32 %v916_v46, %v4373_v8  ;;  %v902_v57 = vmul.f32 %v886_v40, %v4399_v2  ;;  %v4423_v11 = vadd.f32 %v4285_v51, %v803_v28 }
 0x10a   : > { %v1172_v1 = vmul.f32 0.5, %v4271_v45  ;;  %v949_v53 = vmul.f32 0.7978846, %v933_v3  ;;  %v919_v41 = vmul.f32 %v903_v62, %v4392_v20  ;;  %v889_v30 = vmul.f32 0.044715, %v4418_v35 }
 0x10b   : > { %v1171_v34 = vmul.f32 0.5, %v4282_v50  ;;  %v948_v4 = vmul.f32 0.7978846, %v932_v61  ;;  %v918_v52 = vmul.f32 %v902_v57, %v4399_v2  ;;  %v888_v32 = vmul.f32 0.044715, %v4423_v11  ;;  %v3386_v46 = vpop.f32.mrb[6].mxu0 }
 0x10c   : > { %3800 = vtanh.f32 %v949_v53  ;;  %v935_v40 = vadd.f32 %v919_v41, %v4392_v20  ;;  %v905_v28 = vmul.f32 %v889_v30, %v4418_v35  ;;  %v4434_v45 = vadd.f32 %v3386_v46, %v4285_v51  ;;  %v813_v3 = vpop.f32.mrb[7].mxu0 }
 0x10d   : > { %3802 = vtanh.f32 %v948_v4  ;;  %v934_v62 = vadd.f32 %v918_v52, %v4399_v2  ;;  %v904_v50 = vmul.f32 %v888_v32, %v4423_v11  ;;  %v4439_v61 = vadd.f32 %v4285_v51, %v813_v3 }
 0x10e   : > { %v3793_v57 = vpop.eup %3792  ;;  %v951_v53 = vmul.f32 0.7978846, %v935_v40  ;;  %v921_v41 = vmul.f32 %v905_v28, %v4418_v35  ;;  %v891_v30 = vmul.f32 0.044715, %v4434_v45 }
 0x10f   : > { %v3795_v31 = vpop.eup %3794  ;;  %v1180_v46 = vadd.f32 1.0, %v3793_v57  ;;  %v950_v39 = vmul.f32 0.7978846, %v934_v62  ;;  %v920_v4 = vmul.f32 %v904_v50, %v4423_v11  ;;  %v890_v52 = vmul.f32 0.044715, %v4439_v61  ;;  %v3389_v18 = vpop.f32.mrb[8].mxu0 }
 0x110   : > { %v1179_v32 = vadd.f32 1.0, %v3795_v31  ;;  %3804 = vtanh.f32 %v951_v53  ;;  %v937_v3 = vadd.f32 %v921_v41, %v4418_v35  ;;  %v907_v23 = vmul.f32 %v891_v30, %v4434_v45  ;;  %v823_v7 = vpop.f32.mrb[9].mxu0 }
 0x111   : > { %v4448_v40 = vmul.f32 %v1180_v46, %v1172_v1  ;;  %3806 = vtanh.f32 %v950_v39  ;;  %v936_v28 = vadd.f32 %v920_v4, %v4423_v11  ;;  %v906_v57 = vmul.f32 %v890_v52, %v4439_v61 }
 0x112   : > { %v3797_v62 = vpop.eup %3796  ;;  %v4452_v21 = vmul.f32 %v1179_v32, %v1171_v34  ;;  %v1173_v50 = vmul.f32 0.5, %v4332_v15  ;;  %v953_v38 = vmul.f32 0.7978846, %v937_v3  ;;  %v923_v31 = vmul.f32 %v907_v23, %v4434_v45 }
 0x113   : > { %v3799_v53 = vpop.eup %3798  ;;  %1188 = vst [vmem:[#allocation2 + $0x10] sm:$0xff] %v4448_v40  ;;  %v1182_v41 = vadd.f32 1.0, %v3797_v62  ;;  %v965_v1 = vmul.f32 0.5, %v4362_v44  ;;  %v952_v30 = vmul.f32 0.7978846, %v936_v28  ;;  %v922_v39 = vmul.f32 %v906_v57, %v4439_v61  ;;  %v3392_v46 = vpop.f32.mrb[10].mxu0 }
 0x114   : > { %1187 = vst [vmem:[#allocation2 + $0x8] sm:$0xff] %v4452_v21  ;;  %v1181_v4 = vadd.f32 1.0, %v3799_v53  ;;  %3808 = vtanh.f32 %v953_v38  ;;  %v939_v34 = vadd.f32 %v923_v31, %v4434_v45  ;;  %v4462_v15 = vadd.f32 %v3389_v18, %v4285_v51  ;;  %v833_v23 = vpop.f32.mrb[11].mxu0 }
 0x115   : > { %v1186_v52 = vmul.f32 %v1182_v41, %v1174_v48  ;;  %3810 = vtanh.f32 %v952_v30  ;;  %v938_v32 = vadd.f32 %v922_v39, %v4439_v61  ;;  %v4466_v44 = vadd.f32 %v4285_v51, %v823_v7 }
 0x116   : > { %v3801_v3 = vpop.eup %3800  ;;  %v4468_v28 = vmul.f32 %v1181_v4, %v1173_v50  ;;  %v964_v57 = vmul.f32 0.5, %v4373_v8  ;;  %v955_v62 = vmul.f32 0.7978846, %v939_v34  ;;  %v893_v38 = vmul.f32 0.044715, %v4462_v15 }
 0x117   : > { %v3803_v31 = vpop.eup %3802  ;;  %1190 = vst [vmem:[#allocation2 + $0x30] sm:$0xff] %v1186_v52  ;;  %v997_v18 = vadd.f32 1.0, %v3801_v3  ;;  %v967_v53 = vmul.f32 0.5, %v4392_v20  ;;  %v954_v48 = vmul.f32 0.7978846, %v938_v32  ;;  %v839_v30 = vadd.f32 %v3392_v46, %v4191_v16  ;;  %v3395_v8 = vpop.f32.mrb[12].mxu0 }
 0x118   : > { %v892_v41 = vmul.f32 0.044715, %v4466_v44  ;;  %1189 = vst [vmem:[#allocation2 + $0x28] sm:$0xff] %v4468_v28  ;;  %v996_v7 = vadd.f32 1.0, %v3803_v31  ;;  %3812 = vtanh.f32 %v955_v62  ;;  %v909_v50 = vmul.f32 %v893_v38, %v4462_v15  ;;  %v843_v20 = vpop.f32.mrb[13].mxu0 }
 0x119   : > { %v4477_v39 = vmul.f32 %v997_v18, %v965_v1  ;;  %3814 = vtanh.f32 %v954_v48  ;;  %v834_v34 = vadd.f32 %v833_v23, %v4194_v17  ;;  %v4485_v62 = vadd.f32 %v4285_v51, %v839_v30 }
 0x11a   : > { %v908_v4 = vmul.f32 %v892_v41, %v4466_v44  ;;  %v3805_v52 = vpop.eup %3804  ;;  %v4481_v32 = vmul.f32 %v996_v7, %v964_v57  ;;  %v925_v3 = vmul.f32 %v909_v50, %v4462_v15  ;;  %v849_v38 = vadd.f32 %v3395_v8, %v4215_v25 }
 0x11b   : > { %v3807_v16 = vpop.eup %3806  ;;  %1029 = vst [vmem:[#allocation2 + $0x50] sm:$0xff] %v4477_v39  ;;  %v999_v1 = vadd.f32 1.0, %v3805_v52  ;;  %v4491_v31 = vadd.f32 %v4285_v51, %v834_v34  ;;  %v844_v17 = vadd.f32 %v843_v20, %v4218_v26  ;;  %v4494_v23 = vpop.f32.mrb[14].mxu0  ;;  %v966_v57 = vmul.f32 0.5, %v4399_v2 }
 0x11c   : > { %6236 = vst [vmem:[#allocation31_spill] sm:$0xff] %v4481_v32  ;;  %v924_v46 = vmul.f32 %v908_v4, %v4466_v44  ;;  %1028 = vst [vmem:[#allocation2 + $0x48] sm:$0xff] %v4481_v32  ;;  %v998_v18 = vadd.f32 1.0, %v3807_v16  ;;  %v941_v25 = vadd.f32 %v925_v3, %v4462_v15  ;;  %v4501_v48 = vrot.slane %v4241_v33, %v4220_v27  ;;  %v4503_v41 = vpop.f32.mrb[15].mxu0 }
 0x11d   : > { %v4507_v7 = vrot.slane %v4268_v43, %v4312_v6  ;;  %v4509_v26 = vmul.f32 %v999_v1, %v967_v53  ;;  %v895_v30 = vmul.f32 0.044715, %v4485_v62  ;;  %v4515_v8 = vrot.slane %v4278_v47, %v4220_v27 }
 0x11e   : > { %v940_v50 = vadd.f32 %v924_v46, %v4466_v44  ;;  %v3809_v2 = vpop.eup %3808  ;;  %v4517_v4 = vmul.f32 %v998_v18, %v966_v57  ;;  %v957_v33 = vmul.f32 0.7978846, %v941_v25  ;;  %v894_v34 = vmul.f32 0.044715, %v4491_v31 }
 0x11f   : > { %6237 = vst [vmem:[#allocation32_spill] sm:$0xff] %v4507_v7  ;;  %6238 = vst [vmem:[#allocation33_spill] sm:$0xff] %v4509_v26  ;;  %v3811_v20 = vpop.eup %3810  ;;  %v969_v53 = vmul.f32 0.5, %v4418_v35  ;;  %v1001_v52 = vadd.f32 1.0, %v3809_v2  ;;  %v911_v16 = vmul.f32 %v895_v30, %v4485_v62  ;;  %v968_v1 = vmul.f32 0.5, %v4423_v11 }
 0x120   : > { %6239 = vst [vmem:[#allocation34_spill] sm:$0xff] %v4517_v4  ;;  %1031 = vst [vmem:[#allocation2 + $0x70] sm:$0xff] %v4509_v26  ;;  %v956_v3 = vmul.f32 0.7978846, %v940_v50  ;;  %v1000_v27 = vadd.f32 1.0, %v3811_v20  ;;  %3816 = vtanh.f32 %v957_v33  ;;  %v4527_v46 = vadd.f32 %v4364_v54, %v4501_v48  ;;  %v4753_v26 = vld [vmem:[#allocation2 + $0x27] sm:$0xff] }
 0x121   : > { %1030 = vst [vmem:[#allocation2 + $0x68] sm:$0xff] %v4517_v4  ;;  %v4529_v57 = vmul.f32 %v1001_v52, %v969_v53  ;;  %v927_v18 = vmul.f32 %v911_v16, %v4485_v62  ;;  %v910_v35 = vmul.f32 %v894_v34, %v4491_v31  ;;  %v4535_v50 = vrot.slane %v4278_v47, %v4280_v49 }
 0x122   : > { %3818 = vtanh.f32 %v956_v3  ;;  %v3813_v25 = vpop.eup %3812  ;;  %v4537_v30 = vmul.f32 %v1000_v27, %v968_v1  ;;  %v971_v11 = vmul.f32 0.5, %v4434_v45  ;;  %v4541_v2 = vadd.f32 %v4285_v51, %v849_v38 }
 0x123   : > { %6240 = vst [vmem:[#allocation35_spill] sm:$0xff] %v4529_v57  ;;  %v3815_v54 = vpop.eup %3814  ;;  %1033 = vst [vmem:[#allocation2 + $0x90] sm:$0xff] %v4529_v57  ;;  %v1003_v33 = vadd.f32 1.0, %v3813_v25  ;;  %v943_v20 = vadd.f32 %v927_v18, %v4485_v62  ;;  %v926_v34 = vmul.f32 %v910_v35, %v4491_v31  ;;  %v4547_v53 = vadd.f32 %v4285_v51, %v844_v17  ;;  %v1338_v25 = vld [vmem:[#allocation2 + $0x6] sm:$0xff] }
 0x124   : > { %6241 = vst [vmem:[#allocation36_spill] sm:$0xff] %v4537_v30  ;;  %v4551_v49 = vrot.slane %v4321_v9, %v4263_v42  ;;  %v4555_v45 = vrot.slane %v4321_v9, %v4301_v59  ;;  %v4559_v38 = vrot.slane %v4268_v43, %v4303_v60  ;;  %1032 = vst [vmem:[#allocation2 + $0x88] sm:$0xff] %v4537_v30  ;;  %v970_v52 = vmul.f32 0.5, %v4439_v61 }
 0x125   : > { %v1019_v3 = vmul.f32 %v1003_v33, %v971_v11  ;;  %v1002_v16 = vadd.f32 1.0, %v3815_v54  ;;  %v959_v17 = vmul.f32 0.7978846, %v943_v20  ;;  %v1299_v1 = vmul.f32 0.044715, %v4527_v46  ;;  %v1339_v11 = vld [vmem:[#allocation2 + $0xe] sm:$0xff] }
 0x126   : > { %v4566_v42 = vrot.slane %v4278_v47, %v4305_v63  ;;  %v4570_v59 = vrot.slane %v4278_v47, %v4310_v5  ;;  %v942_v43 = vadd.f32 %v926_v34, %v4491_v31  ;;  %v897_v60 = vmul.f32 0.044715, %v4541_v2  ;;  %v1455_v54 = vld [vmem:[#allocation2 + $0xf] sm:$0xff] }
 0x127   : > { %v4576_v61 = vrot.slane %v4321_v9, %v4312_v6  ;;  %1035 = vst [vmem:[#allocation2 + $0xb0] sm:$0xff] %v1019_v3  ;;  %v4578_v27 = vmul.f32 %v1002_v16, %v970_v52  ;;  %3820 = vtanh.f32 %v959_v17  ;;  %v896_v18 = vmul.f32 0.044715, %v4547_v53  ;;  %v4595_v34 = vld [vmem:[#allocation2 + $0x4e] sm:$0xff] }
 0x128   : > { %6242 = vst [vmem:[#allocation37_spill] sm:$0xff] %v4570_v59  ;;  %v4583_v63 = vmul.f32 %v4299_v58, %v4448_v40  ;;  %v973_v47 = vmul.f32 0.5, %v4462_v15  ;;  %v958_v5 = vmul.f32 0.7978846, %v942_v43  ;;  %v913_v35 = vmul.f32 %v897_v60, %v4541_v2  ;;  %v1341_v15 = vld [vmem:[#allocation2 + $0x2e] sm:$0xff]  ;;  %6245 = vst [vmem:[#allocation40_spill] sm:$0xff] %v4595_v34 }
 0x129   : > { %6243 = vst [vmem:[#allocation38_spill] sm:$0xff] %v4576_v61  ;;  %6244 = vst [vmem:[#allocation39_spill] sm:$0xff] %v4578_v27  ;;  %v972_v6 = vmul.f32 0.5, %v4466_v44  ;;  %v912_v9 = vmul.f32 %v896_v18, %v4547_v53  ;;  %v1303_v33 = vmul.f32 %v1299_v1, %v4527_v46  ;;  %v4593_v40 = vadd.f32 %v4375_v14, %v4501_v48 }
 0x12a   : > { %1034 = vst [vmem:[#allocation2 + $0xa8] sm:$0xff] %v4578_v27  ;;  %v3817_v20 = vpop.eup %3816  ;;  %3822 = vtanh.f32 %v958_v5  ;;  %v929_v52 = vmul.f32 %v913_v35, %v4541_v2  ;;  %v859_v3 = vadd.f32 %v4494_v23, %v4249_v36  ;;  %v854_v44 = vadd.f32 %v4503_v41, %v4252_v37  ;;  %v4616_v23 = vld [vmem:[#allocation2 + $0x46] sm:$0xff] }
 0x12b   : > { %v1005_v17 = vadd.f32 1.0, %v3817_v20  ;;  %v928_v1 = vmul.f32 %v912_v9, %v4547_v53  ;;  %v1307_v14 = vmul.f32 %v1303_v33, %v4527_v46  ;;  %v1298_v43 = vmul.f32 0.044715, %v4593_v40  ;;  %6247 = vst [vmem:[#allocation42_spill] sm:$0xff] %v4616_v23  ;;  %v1454_v27 = vld [vmem:[#allocation2 + $0x7] sm:$0xff] }
 0x12c   : > { %v3819_v16 = vpop.eup %3818  ;;  %v4606_v60 = vmul.f32 %v4291_v55, %v1338_v25  ;;  %v1359_v18 = vmul.f32 %v4291_v55, %v1339_v11  ;;  %v4610_v5 = vmul.f32 %v4351_v29, %v1455_v54  ;;  %v975_v36 = vmul.f32 0.5, %v4485_v62  ;;  %v4624_v11 = vld [vmem:[#allocation2 + $0x4f] sm:$0xff] }
 0x12d   : > { %v4614_v37 = vmul.f32 %v4291_v55, %v1341_v15  ;;  %v1399_v41 = vmul.f32 %v4295_v56, %v4595_v34  ;;  %v1021_v35 = vmul.f32 %v1005_v17, %v973_v47  ;;  %v974_v9 = vmul.f32 0.5, %v4491_v31  ;;  %6248 = vst [vmem:[#allocation43_spill] sm:$0xff] %v4624_v11 }
 0x12e   : > { %v4622_v25 = vmul.f32 %v4325_v12, %v1341_v15  ;;  %v1004_v54 = vadd.f32 1.0, %v3819_v16  ;;  %v945_v33 = vadd.f32 %v929_v52, %v4541_v2  ;;  %v944_v62 = vadd.f32 %v928_v1, %v4547_v53 }
 0x12f   : > { %6246 = vst [vmem:[#allocation41_spill] sm:$0xff] %v4614_v37  ;;  %v4630_v20 = vmul.f32 %v4299_v58, %v4529_v57  ;;  %1037 = vst [vmem:[#allocation2 + $0xd0] sm:$0xff] %v1021_v35  ;;  %v1311_v37 = vadd.f32 %v1307_v14, %v4527_v46  ;;  %v1302_v47 = vmul.f32 %v1298_v43, %v4593_v40 }
 0x130   : > { %v4635_v31 = vadd.f32 %v4285_v51, %v859_v3  ;;  %v4639_v15 = vmul.f32 %v4291_v55, %v4616_v23  ;;  %v1020_v16 = vmul.f32 %v1004_v54, %v972_v6  ;;  %v961_v52 = vmul.f32 0.7978846, %v945_v33 }
 0x131   : > { %6249 = vst [vmem:[#allocation44_spill] sm:$0xff] %v4630_v20  ;;  %v4642_v17 = vadd.f32 %v4285_v51, %v854_v44  ;;  %v3821_v1 = vpop.eup %3820  ;;  %v4646_v35 = vmul.f32 %v4291_v55, %v4595_v34  ;;  %v4650_v14 = vmul.f32 %v4295_v56, %v4616_v23  ;;  %v1407_v3 = vadd.f32 %v1399_v41, %v1359_v18  ;;  %v4660_v44 = vld [vmem:[#allocation2 + $0x6e] sm:$0xff] }
 0x132   : > { %6250 = vst [vmem:[#allocation45_spill] sm:$0xff] %v4639_v15  ;;  %v4654_v43 = vmul.f32 %v4368_v0, %v4624_v11  ;;  %1036 = vst [vmem:[#allocation2 + $0xc8] sm:$0xff] %v1020_v16  ;;  %v1007_v6 = vadd.f32 1.0, %v3821_v1  ;;  %3824 = vtanh.f32 %v961_v52  ;;  %v960_v54 = vmul.f32 0.7978846, %v944_v62  ;;  %v4665_v15 = vld [vmem:[#allocation2 + $0x8e] sm:$0xff] }
 0x133   : > { %6251 = vst [vmem:[#allocation46_spill] sm:$0xff] %v4646_v35  ;;  %v4658_v51 = vadd.f32 %v4394_v19, %v4501_v48  ;;  %6252 = vst [vmem:[#allocation47_spill] sm:$0xff] %v4660_v44  ;;  %v977_v33 = vmul.f32 0.5, %v4541_v2  ;;  %v1315_v20 = vmul.f32 0.7978846, %v1311_v37  ;;  %v1306_v35 = vmul.f32 %v1302_v47, %v4593_v40  ;;  %v4677_v47 = vld [vmem:[#allocation2 + $0x86] sm:$0xff] }
 0x134   : > { %v899_v18 = vmul.f32 0.044715, %v4635_v31  ;;  %v3823_v41 = vpop.eup %3822  ;;  %6253 = vst [vmem:[#allocation48_spill] sm:$0xff] %v4665_v15  ;;  %v1023_v16 = vmul.f32 %v1007_v6, %v975_v36  ;;  %v4668_v52 = vmul.f32 0.5, %v4547_v53  ;;  %3826 = vtanh.f32 %v960_v54  ;;  %6255 = vst [vmem:[#allocation50_spill] sm:$0xff] %v4677_v47  ;;  %v4701_v11 = vld [vmem:[#allocation2 + $0xa6] sm:$0xff] }
 0x135   : > { %v898_v19 = vmul.f32 0.044715, %v4642_v17  ;;  %v1006_v62 = vadd.f32 1.0, %v3823_v41  ;;  %3828 = vtanh.f32 %v1315_v20  ;;  %v1310_v1 = vadd.f32 %v1306_v35, %v4593_v40  ;;  %v4687_v35 = vld [vmem:[#allocation2 + $0x8f] sm:$0xff]  ;;  %6259 = vst [vmem:[#allocation54_spill] sm:$0xff] %v4701_v11 }
 0x136   : > { %v915_v2 = vmul.f32 %v899_v18, %v4635_v31  ;;  %v4675_v37 = vmul.f32 %v4291_v55, %v4660_v44  ;;  %1039 = vst [vmem:[#allocation2 + $0xf0] sm:$0xff] %v1023_v16  ;;  %v1301_v53 = vmul.f32 0.044715, %v4658_v51  ;;  %v4683_v6 = vadd.f32 %v4401_v10, %v4501_v48  ;;  %6256 = vst [vmem:[#allocation51_spill] sm:$0xff] %v4687_v35 }
 0x137   : > { %v914_v36 = vmul.f32 %v898_v19, %v4642_v17  ;;  %v1439_v20 = vmul.f32 %v4347_v24, %v4665_v15  ;;  %v1022_v54 = vmul.f32 %v1006_v62, %v974_v9  ;;  %v1314_v18 = vmul.f32 0.7978846, %v1310_v1 }
 0x138   : > { %6254 = vst [vmem:[#allocation49_spill] sm:$0xff] %v4675_v37  ;;  %v931_v41 = vmul.f32 %v915_v2, %v4635_v31  ;;  %v4692_v16 = vmul.f32 %v4295_v56, %v4660_v44  ;;  %v1305_v37 = vmul.f32 %v1301_v53, %v4658_v51  ;;  %v1300_v10 = vmul.f32 0.044715, %v4683_v6 }
 0x139   : > { %v930_v19 = vmul.f32 %v914_v36, %v4642_v17  ;;  %v4699_v48 = vmul.f32 %v4295_v56, %v4677_v47  ;;  %1038 = vst [vmem:[#allocation2 + $0xe8] sm:$0xff] %v1022_v54  ;;  %v1319_v9 = vmul.f32 0.5, %v4527_v46  ;;  %3830 = vtanh.f32 %v1314_v18  ;;  %v4721_v46 = vld [vmem:[#allocation2 + $0xae] sm:$0xff]  ;;  %v1340_v54 = vld [vmem:[#allocation2 + $0x26] sm:$0xff] }
 0x13a   : > { %6257 = vst [vmem:[#allocation52_spill] sm:$0xff] %v4692_v16  ;;  %v947_v62 = vadd.f32 %v931_v41, %v4635_v31  ;;  %v4707_v1 = vmul.f32 %v4295_v56, %v4665_v15  ;;  %v4711_v2 = vmul.f32 %v4342_v22, %v4687_v35  ;;  %v4715_v36 = vmul.f32 %v4291_v55, %v4677_v47 }
 0x13b   : > { %6258 = vst [vmem:[#allocation53_spill] sm:$0xff] %v4699_v48  ;;  %v4719_v53 = vmul.f32 %v4291_v55, %v4665_v15  ;;  %6263 = vst [vmem:[#allocation58_spill] sm:$0xff] %v4721_v46  ;;  %v4723_v18 = vadd.f32 %v1439_v20, %v1407_v3  ;;  %v4727_v41 = vmul.f32 %v4351_v29, %v4687_v35  ;;  %v4737_v3 = vld [vmem:[#allocation2 + $0x66] sm:$0xff] }
 0x13c   : > { %6260 = vst [vmem:[#allocation55_spill] sm:$0xff] %v4707_v1  ;;  %6261 = vst [vmem:[#allocation56_spill] sm:$0xff] %v4715_v36  ;;  %v1318_v1 = vmul.f32 0.5, %v4593_v40  ;;  %v963_v48 = vmul.f32 0.7978846, %v947_v62  ;;  %v3825_v34 = vpop.eup %3824  ;;  %v4732_v36 = vmul.f32 %v4295_v56, %v4701_v11  ;;  %v946_v15 = vadd.f32 %v930_v19, %v4642_v17 }
 0x13d   : > { %6262 = vst [vmem:[#allocation57_spill] sm:$0xff] %v4719_v53  ;;  %6264 = vst [vmem:[#allocation59_spill] sm:$0xff] %v4727_v41  ;;  %v1309_v53 = vmul.f32 %v1305_v37, %v4658_v51  ;;  %v1304_v16 = vmul.f32 %v1300_v10, %v4683_v6  ;;  %v4741_v20 = vmul.f32 %v4295_v56, %v4721_v46  ;;  %v1009_v41 = vadd.f32 1.0, %v3825_v34 }
 0x13e   : > { %6265 = vst [vmem:[#allocation60_spill] sm:$0xff] %v4732_v36  ;;  %6266 = vst [vmem:[#allocation61_spill] sm:$0xff] %v4737_v3  ;;  %3832 = vtanh.f32 %v963_v48  ;;  %v1378_v40 = vmul.f32 %v4325_v12, %v1340_v54  ;;  %v3827_v62 = vpop.eup %3826  ;;  %v962_v35 = vmul.f32 0.7978846, %v946_v15  ;;  %v1406_v37 = vadd.f32 %v4650_v14, %v4606_v60 }
 0x13f   : > { %6267 = vst [vmem:[#allocation62_spill] sm:$0xff] %v4741_v20  ;;  %v1313_v36 = vadd.f32 %v1309_v53, %v4658_v51  ;;  %v1308_v19 = vmul.f32 %v1304_v16, %v4683_v6  ;;  %v3829_v10 = vpop.eup %3828  ;;  %v1025_v23 = vmul.f32 %v1009_v41, %v977_v33  ;;  %v1008_v57 = vadd.f32 1.0, %v3827_v62  ;;  %v4755_v16 = vld [vmem:[#allocation2 + $0x47] sm:$0xff] }
 0x140   : > { %v1418_v20 = vmul.f32 %v4329_v13, %v4737_v3  ;;  %v1438_v34 = vmul.f32 %v4347_v24, %v4677_v47  ;;  %v1327_v48 = vadd.f32 1.0, %v3829_v10  ;;  %3834 = vtanh.f32 %v962_v35  ;;  %v4762_v35 = vld [vmem:[#allocation2 + $0x67] sm:$0xff] }
 0x141   : > { %v1317_v15 = vmul.f32 0.7978846, %v1313_v36  ;;  %v1312_v53 = vadd.f32 %v1308_v19, %v4683_v6  ;;  %v4759_v60 = vmul.f32 %v4347_v24, %v4721_v46  ;;  %1041 = vst [vmem:[#allocation2 + $0x110] sm:$0xff] %v1025_v23  ;;  %v1024_v14 = vmul.f32 %v1008_v57, %v4668_v52  ;;  %6269 = vst [vmem:[#allocation64_spill] sm:$0xff] %v4762_v35  ;;  %v4765_v47 = vld [vmem:[#allocation2 + $0x87] sm:$0xff]  ;;  %v6273_v52 = vld [vmem:[#allocation26_spill] sm:$0xff] }
 0x142   : > { %v1426_v33 = vadd.f32 %v1418_v20, %v1378_v40  ;;  %v1446_v41 = vadd.f32 %v1438_v34, %v1406_v37  ;;  %v1331_v62 = vmul.f32 %v1327_v48, %v1319_v9  ;;  %v1474_v36 = vmul.f32 %v4351_v29, %v1454_v27  ;;  %6270 = vst [vmem:[#allocation65_spill] sm:$0xff] %v4765_v47 }
 0x143   : > { %6268 = vst [vmem:[#allocation63_spill] sm:$0xff] %v4759_v60  ;;  %3836 = vtanh.f32 %v1317_v15  ;;  %v1316_v10 = vmul.f32 0.7978846, %v1312_v53  ;;  %v3831_v19 = vpop.eup %3830  ;;  %v4769_v59 = vmul.f32 %v4291_v55, %v4721_v46  ;;  %v4773_v23 = vmul.f32 %v4325_v12, %v4721_v46  ;;  %1040 = vst [vmem:[#allocation2 + $0x108] sm:$0xff] %v1024_v14  ;;  %v6274_v15 = vld [vmem:[#allocation23_spill] sm:$0xff]  ;;  %v4820_v46 = vld [vmem:[#allocation2 + $0x69] sm:$0xff] }
 0x144   : > { %v979_v57 = vmul.f32 0.5, %v4635_v31  ;;  %v1494_v9 = vmul.f32 %v6273_v52, %v4753_v26  ;;  %1335 = vst [vmem:[#allocation2 + $0x150] sm:$0xff] %v1331_v62  ;;  %v1326_v20 = vadd.f32 1.0, %v3831_v19  ;;  %v1482_v27 = vadd.f32 %v1474_v36, %v1446_v41  ;;  %v4784_v14 = vld [vmem:[#allocation2 + $0xc6] sm:$0xff]  ;;  %v4786_v31 = vld [vmem:[#allocation2 + $0xce] sm:$0xff] }
 0x145   : > { %6271 = vst [vmem:[#allocation66_spill] sm:$0xff] %v4769_v59  ;;  %6272 = vst [vmem:[#allocation67_spill] sm:$0xff] %v4773_v23  ;;  %3838 = vtanh.f32 %v1316_v10  ;;  %v1514_v40 = vmul.f32 %v4368_v0, %v4755_v16  ;;  %v978_v37 = vmul.f32 0.5, %v4642_v17  ;;  %v1321_v34 = vmul.f32 0.5, %v4658_v51  ;;  %v6278_v19 = vld [vmem:[#allocation27_spill] sm:$0xff] }
 0x146   : > { %v1502_v48 = vadd.f32 %v1494_v9, %v1426_v33  ;;  %v1534_v53 = vmul.f32 %v6274_v15, %v4762_v35  ;;  %6275 = vst [vmem:[#allocation26_spill] sm:$0xff] %v4784_v14  ;;  %6276 = vst [vmem:[#allocation23_spill] sm:$0xff] %v4786_v31  ;;  %v1330_v59 = vmul.f32 %v1326_v20, %v1318_v1  ;;  %v1320_v17 = vmul.f32 0.5, %v4683_v6 }
 0x147   : > { %v1360_v62 = vmul.f32 %v4291_v55, %v1340_v54  ;;  %v1522_v10 = vadd.f32 %v1514_v40, %v1482_v27  ;;  %v1554_v41 = vmul.f32 %v4342_v22, %v4765_v47  ;;  %v4794_v51 = vmul.f32 %v4291_v55, %v4737_v3  ;;  %v4802_v27 = vld [vmem:[#allocation2 + $0x29] sm:$0xff] }
 0x148   : > { %v3833_v36 = vpop.eup %3832  ;;  %v1542_v33 = vadd.f32 %v1534_v53, %v1502_v48  ;;  %v1610_v9 = vmul.f32 %v6278_v19, %v4468_v28  ;;  %1334 = vst [vmem:[#allocation2 + $0x148] sm:$0xff] %v1330_v59  ;;  %v1400_v1 = vmul.f32 %v4295_v56, %v4737_v3  ;;  %v1590_v20 = vmul.f32 %v4299_v58, %v4452_v21  ;;  %v6281_v59 = vld [vmem:[#allocation29_spill] sm:$0xff] }
 0x149   : > { %6277 = vst [vmem:[#allocation68_spill] sm:$0xff] %v4794_v51  ;;  %v1011_v23 = vadd.f32 1.0, %v3833_v36  ;;  %v1562_v54 = vadd.f32 %v1554_v41, %v1522_v10  ;;  %v4806_v6 = vmul.f32 %v4347_v24, %v4784_v14  ;;  %v4810_v40 = vmul.f32 %v4347_v24, %v4786_v31  ;;  %v6283_v51 = vld [vmem:[#allocation28_spill] sm:$0xff] }
 0x14a   : > { %v1618_v48 = vadd.f32 %v1610_v9, %v1542_v33  ;;  %v1650_v53 = vmul.f32 %v6281_v59, %v4517_v4  ;;  %v3835_v36 = vpop.eup %3834  ;;  %v4816_v10 = vmul.f32 %v4291_v55, %v4784_v14  ;;  %v1630_v56 = vmul.f32 %v6283_v51, %v4481_v32  ;;  %v1686_v9 = vld [vmem:[#allocation2 + $0x9] sm:$0xff] }
 0x14b   : > { %6279 = vst [vmem:[#allocation27_spill] sm:$0xff] %v4806_v6  ;;  %6280 = vst [vmem:[#allocation69_spill] sm:$0xff] %v4810_v40  ;;  %v1027_v21 = vmul.f32 %v1011_v23, %v979_v57  ;;  %v1598_v41 = vadd.f32 %v1590_v20, %v1562_v54  ;;  %v1010_v6 = vadd.f32 1.0, %v3835_v36  ;;  %v1440_v40 = vmul.f32 %v4347_v24, %v4701_v11  ;;  %v6285_v54 = vld [vmem:[#allocation30_spill] sm:$0xff]  ;;  %v4832_v36 = vld [vmem:[#allocation2 + $0x2f] sm:$0xff] }
 0x14c   : > { %6282 = vst [vmem:[#allocation29_spill] sm:$0xff] %v4816_v10  ;;  %v1658_v33 = vadd.f32 %v1650_v53, %v1618_v48  ;;  %v1726_v3 = vmul.f32 %v4515_v8, %v4802_v27  ;;  %v4828_v10 = vmul.f32 %v4291_v55, %v4786_v31  ;;  %v1408_v23 = vadd.f32 %v1400_v1, %v1360_v62  ;;  %v4834_v48 = vld [vmem:[#allocation2 + $0x49] sm:$0xff]  ;;  %v4905_v55 = vld [vmem:[#allocation2 + $0x71] sm:$0xff] }
 0x14d   : > { %v3837_v60 = vpop.eup %3836  ;;  %1043 = vst [vmem:[#allocation2 + $0x130] sm:$0xff] %v1027_v21  ;;  %v1638_v57 = vadd.f32 %v1630_v56, %v1598_v41  ;;  %v1670_v20 = vmul.f32 %v6285_v54, %v4537_v30  ;;  %v1026_v14 = vmul.f32 %v1010_v6, %v978_v37  ;;  %6286 = vst [vmem:[#allocation30_spill] sm:$0xff] %v4834_v48  ;;  %v4839_v21 = vld [vmem:[#allocation2 + $0x2a] sm:$0xff] }
 0x14e   : > { %6284 = vst [vmem:[#allocation28_spill] sm:$0xff] %v4828_v10  ;;  %v1329_v24 = vadd.f32 1.0, %v3837_v60  ;;  %v1734_v53 = vadd.f32 %v1726_v3, %v1658_v33  ;;  %v1766_v11 = vmul.f32 %v4551_v49, %v4820_v46  ;;  %v1706_v10 = vmul.f32 %v4507_v7, %v1686_v9  ;;  %v4845_v37 = vld [vmem:[#allocation2 + $0x6f] sm:$0xff]  ;;  %6296 = vst [vmem:[#allocation75_spill] sm:$0xff] %v4905_v55 }
 0x14f   : > { %v3839_v4 = vpop.eup %3838  ;;  %v1678_v32 = vadd.f32 %v1670_v20, %v1638_v57  ;;  %v1419_v56 = vmul.f32 %v4329_v13, %v4660_v44  ;;  %v1483_v62 = vadd.f32 %v4610_v5, %v4723_v18  ;;  %6287 = vst [vmem:[#allocation70_spill] sm:$0xff] %v4845_v37  ;;  %1042 = vst [vmem:[#allocation2 + $0x128] sm:$0xff] %v1026_v14  ;;  %v4847_v6 = vld [vmem:[#allocation2 + $0x89] sm:$0xff]  ;;  %v4907_v31 = vld [vmem:[#allocation2 + $0x91] sm:$0xff] }
 0x150   : > { %v1333_v60 = vmul.f32 %v1329_v24, %v1321_v34  ;;  %v1328_v3 = vadd.f32 1.0, %v3839_v4  ;;  %v1448_v1 = vadd.f32 %v1440_v40, %v1408_v23  ;;  %6288 = vst [vmem:[#allocation71_spill] sm:$0xff] %v4847_v6  ;;  %v1774_v41 = vadd.f32 %v1766_v11, %v1734_v53  ;;  %v1802_v24 = vld [vmem:[#allocation2 + $0xa] sm:$0xff]  ;;  %6297 = vst [vmem:[#allocation76_spill] sm:$0xff] %v4907_v31 }
 0x151   : > { %v1714_v33 = vadd.f32 %v1706_v10, %v1678_v32  ;;  %v1746_v9 = vmul.f32 %v4535_v50, %v4834_v48  ;;  %v1427_v57 = vadd.f32 %v1419_v56, %v4622_v25  ;;  %v1495_v20 = vmul.f32 %v6273_v52, %v4832_v36  ;;  %v4859_v32 = vld [vmem:[#allocation2 + $0x30] sm:$0xff]  ;;  %v4877_v56 = vld [vmem:[%s6009_s5 + $0x18] ss:$0 sm:$0xff] }
 0x152   : > { %1337 = vst [vmem:[#allocation2 + $0x170] sm:$0xff] %v1333_v60  ;;  %v1332_v5 = vmul.f32 %v1328_v3, %v1320_v17  ;;  %v1476_v18 = vmul.f32 %v4351_v29, %v4753_v26  ;;  %v1842_v4 = vmul.f32 %v4566_v42, %v4839_v21  ;;  %v1523_v11 = vadd.f32 %v4654_v43, %v1483_v62  ;;  %v4863_v14 = vld [vmem:[#allocation2 + $0x6a] sm:$0xff] }
 0x153   : > { %v1754_v34 = vadd.f32 %v1746_v9, %v1714_v33  ;;  %v1786_v25 = vmul.f32 %v4555_v45, %v4847_v6  ;;  %6289 = vst [vmem:[#allocation72_spill] sm:$0xff] %v4863_v14  ;;  %v1503_v40 = vadd.f32 %v1495_v20, %v1427_v57  ;;  %v1535_v17 = vmul.f32 %v6274_v15, %v4845_v37  ;;  %v4871_v23 = vld [vmem:[#allocation2 + $0x4a] sm:$0xff] }
 0x154   : > { %1336 = vst [vmem:[#allocation2 + $0x168] sm:$0xff] %v1332_v5  ;;  %v1484_v26 = vadd.f32 %v1476_v18, %v1448_v1  ;;  %v4869_v10 = vmul.f32 %v4299_v58, %v4468_v28  ;;  %v1850_v43 = vadd.f32 %v1842_v4, %v1774_v41  ;;  %v1563_v53 = vadd.f32 %v4711_v2, %v1523_v11  ;;  %v4879_v60 = vld [vmem:[#allocation2 + $0x8a] sm:$0xff] }
 0x155   : > { %v1794_v62 = vadd.f32 %v1786_v25, %v1754_v34  ;;  %6290 = vst [vmem:[#allocation73_spill] sm:$0xff] %v4879_v60  ;;  %v1822_v3 = vmul.f32 %v4559_v38, %v1802_v24  ;;  %v1543_v1 = vadd.f32 %v1535_v17, %v1503_v40  ;;  %v1611_v28 = vmul.f32 %v6278_v19, %v4859_v32  ;;  %v1687_v57 = vld [vmem:[#allocation2 + $0x11] sm:$0xff]  ;;  %v6295_v17 = vld [vmem:[#allocation35_spill] sm:$0xff] }
 0x156   : > { %v4886_v33 = vmul.f32 %v4507_v7, %v4802_v27  ;;  %v1882_v2 = vmul.f32 %v4576_v61, %v4863_v14  ;;  %v1599_v41 = vadd.f32 %v4583_v63, %v1563_v53  ;;  %v1631_v9 = vmul.f32 %v6283_v51, %v4477_v39  ;;  %v4893_v20 = vld [vmem:[#allocation2 + $0x31] sm:$0xff] }
 0x157   : > { %6291 = vst [vmem:[#allocation74_spill] sm:$0xff] %v4893_v20  ;;  %v1830_v5 = vadd.f32 %v1822_v3, %v1794_v62  ;;  %v6292_v18 = vld [vmem:[#allocation37_spill] sm:$0xff]  ;;  %v1619_v4 = vadd.f32 %v1611_v28, %v1543_v1  ;;  %v1902_v63 = vmul.f32 %v4877_v56, %v4879_v60  ;;  %v1671_v53 = vmul.f32 %v6285_v54, %v6295_v17  ;;  %v4918_v17 = vld [vmem:[#allocation2 + $0xa7] sm:$0xff] }
 0x158   : > { %v1862_v24 = vmul.f32 %v6292_v18, %v4871_v23  ;;  %v6293_v11 = vld [vmem:[#allocation33_spill] sm:$0xff]  ;;  %v1890_v25 = vadd.f32 %v1882_v2, %v1850_v43  ;;  %v1639_v40 = vadd.f32 %v1631_v9, %v1599_v41  ;;  %v1707_v1 = vmul.f32 %v4507_v7, %v1687_v57  ;;  %v6298_v2 = vld [vmem:[#allocation42_spill] sm:$0xff] }
 0x159   : > { %v1651_v27 = vmul.f32 %v6281_v59, %v6293_v11  ;;  %v4899_v34 = vld [vmem:[#allocation2 + $0x51] sm:$0xff]  ;;  %v1727_v28 = vmul.f32 %v4515_v8, %v4893_v20  ;;  %v1380_v41 = vmul.f32 %v4325_v12, %v6298_v2  ;;  %6300 = vst [vmem:[#allocation42_spill] sm:$0xff] %v4918_v17  ;;  %v1767_v57 = vmul.f32 %v4551_v49, %v4905_v55 }
 0x15a   : > { %6294 = vst [vmem:[#allocation37_spill] sm:$0xff] %v4899_v34  ;;  %v1870_v62 = vadd.f32 %v1862_v24, %v1830_v5  ;;  %v1679_v44 = vadd.f32 %v1671_v53, %v1639_v40  ;;  %v1747_v43 = vmul.f32 %v4535_v50, %v4899_v34  ;;  %v6299_v9 = vld [vmem:[#allocation50_spill] sm:$0xff]  ;;  %v4929_v40 = vld [vmem:[%s6010_s6] ss:$0 sm:$0xff]  ;;  %v1787_v2 = vmul.f32 %v4555_v45, %v4907_v31 }
 0x15b   : > { %v1659_v3 = vadd.f32 %v1651_v27, %v1619_v4  ;;  %v1420_v11 = vmul.f32 %v4329_v13, %v6299_v9  ;;  %v4922_v4 = vld [vmem:[#allocation2 + $0x32] sm:$0xff]  ;;  %v1516_v27 = vmul.f32 %v4368_v0, %v4762_v35  ;;  %v1556_v35 = vmul.f32 %v4342_v22, %v4918_v17 }
 0x15c   : > { %v1910_v5 = vadd.f32 %v1902_v63, %v1870_v62  ;;  %v1715_v53 = vadd.f32 %v1707_v1, %v1679_v44  ;;  %v1803_v9 = vld [vmem:[#allocation2 + $0x12] sm:$0xff]  ;;  %v1843_v44 = vmul.f32 %v4566_v42, %v4922_v4  ;;  %v1536_v31 = vmul.f32 %v6274_v15, %v4765_v47 }
 0x15d   : > { %v1735_v24 = vadd.f32 %v1727_v28, %v1659_v3  ;;  %v4933_v63 = vld [vmem:[#allocation2 + $0x52] sm:$0xff]  ;;  %v1428_v62 = vadd.f32 %v1420_v11, %v1380_v41  ;;  %v1496_v3 = vmul.f32 %v6273_v52, %v4755_v16  ;;  %v1524_v7 = vadd.f32 %v1516_v27, %v1484_v26  ;;  %v6304_v27 = vld [vmem:[#allocation31_spill] sm:$0xff] }
 0x15e   : > { %6301 = vst [vmem:[#allocation77_spill] sm:$0xff] %v4933_v63  ;;  %v1918_v28 = vadd.f32 %v1910_v5, %v1890_v25  ;;  %v1755_v20 = vadd.f32 %v1747_v43, %v1715_v53  ;;  %v4939_v34 = vld [vmem:[#allocation2 + $0x72] sm:$0xff]  ;;  %v1823_v26 = vmul.f32 %v4559_v38, %v1803_v9  ;;  %v1863_v25 = vmul.f32 %v6292_v18, %v4933_v63 }
 0x15f   : > { %v1775_v55 = vadd.f32 %v1767_v57, %v1735_v24  ;;  %6302 = vst [vmem:[#allocation78_spill] sm:$0xff] %v4939_v34  ;;  %v1504_v1 = vadd.f32 %v1496_v3, %v1428_v62  ;;  %v4948_v41 = vld [vmem:[#allocation2 + $0x92] sm:$0xff]  ;;  %v1564_v43 = vadd.f32 %v1556_v35, %v1524_v7  ;;  %v1612_v53 = vmul.f32 %v6278_v19, %v6304_v27 }
 0x160   : > { %v4946_v11 = vadd.f32 %v4929_v40, %v1918_v28  ;;  %6303 = vst [vmem:[#allocation79_spill] sm:$0xff] %v4948_v41  ;;  %v1795_v5 = vadd.f32 %v1787_v2, %v1755_v20  ;;  %v1883_v3 = vmul.f32 %v4576_v61, %v4939_v34  ;;  %v6305_v17 = vld [vmem:[#allocation34_spill] sm:$0xff]  ;;  %v1903_v7 = vmul.f32 %v4877_v56, %v4948_v41 }
 0x161   : > { %v1851_v24 = vadd.f32 %v1843_v44, %v1775_v55  ;;  %v1544_v57 = vadd.f32 %v1536_v31, %v1504_v1  ;;  %v1600_v28 = vadd.f32 %v4869_v10, %v1564_v43  ;;  %v1632_v9 = vmul.f32 %v6283_v51, %v6305_v17  ;;  %v4965_v31 = vld [vmem:[#allocation2 + $0xa9] sm:$0xff]  ;;  %v6307_v44 = vld [vmem:[#allocation39_spill] sm:$0xff] }
 0x162   : > { %v1940_v62 = vmul.f32 0.044715, %v4946_v11  ;;  %v1831_v47 = vadd.f32 %v1823_v26, %v1795_v5  ;;  %v1652_v55 = vmul.f32 %v6281_v59, %v4537_v30  ;;  %6306 = vst [vmem:[#allocation31_spill] sm:$0xff] %v4965_v31  ;;  %v1672_v1 = vmul.f32 %v6285_v54, %v6307_v44 }
 0x163   : > { %v1620_v35 = vadd.f32 %v1612_v53, %v1544_v57  ;;  %v1640_v2 = vadd.f32 %v1632_v9, %v1600_v28  ;;  %v1728_v10 = vmul.f32 %v4515_v8, %v4834_v48  ;;  %v1891_v26 = vadd.f32 %v1883_v3, %v1851_v24 }
 0x164   : > { %v1948_v20 = vmul.f32 %v1940_v62, %v4946_v11  ;;  %v1871_v43 = vadd.f32 %v1863_v25, %v1831_v47  ;;  %v1748_v57 = vmul.f32 %v4535_v50, %v4820_v46  ;;  %v1768_v41 = vmul.f32 %v4551_v49, %v4847_v6  ;;  %v6308_v47 = vld [vmem:[#allocation41_spill] sm:$0xff]  ;;  %v6309_v25 = vld [vmem:[#allocation52_spill] sm:$0xff] }
 0x165   : > { %v1660_v5 = vadd.f32 %v1652_v55, %v1620_v35  ;;  %v1680_v30 = vadd.f32 %v1672_v1, %v1640_v2  ;;  %v1788_v62 = vmul.f32 %v4555_v45, %v4965_v31  ;;  %v1824_v48 = vmul.f32 %v4559_v38, %v4839_v21  ;;  %v6310_v55 = vld [vmem:[#allocation40_spill] sm:$0xff] }
 0x166   : > { %v1956_v53 = vmul.f32 %v1948_v20, %v4946_v11  ;;  %v1911_v28 = vadd.f32 %v1903_v7, %v1871_v43  ;;  %v1409_v24 = vadd.f32 %v6309_v25, %v6308_v47  ;;  %v1381_v20 = vmul.f32 %v4325_v12, %v6310_v55  ;;  %v6311_v2 = vld [vmem:[#allocation48_spill] sm:$0xff]  ;;  %v6312_v7 = vld [vmem:[#allocation63_spill] sm:$0xff] }
 0x167   : > { %v1736_v9 = vadd.f32 %v1728_v10, %v1660_v5  ;;  %v1716_v35 = vadd.f32 %v4886_v33, %v1680_v30  ;;  %v1421_v1 = vmul.f32 %v4329_v13, %v6311_v2  ;;  %v1477_v21 = vmul.f32 %v4351_v29, %v4832_v36  ;;  %v4992_v43 = vld [vmem:[#allocation2 + $0xaf] sm:$0xff]  ;;  %v6314_v25 = vld [vmem:[#allocation43_spill] sm:$0xff] }
 0x168   : > { %v1964_v3 = vadd.f32 %v1956_v53, %v4946_v11  ;;  %v1919_v6 = vadd.f32 %v1911_v28, %v1891_v26  ;;  %v1449_v10 = vadd.f32 %v6312_v7, %v1409_v24  ;;  %6313 = vst [vmem:[#allocation34_spill] sm:$0xff] %v4992_v43  ;;  %v1497_v30 = vmul.f32 %v6273_v52, %v6314_v25  ;;  %v6315_v24 = vld [vmem:[#allocation51_spill] sm:$0xff] }
 0x169   : > { %v1776_v31 = vadd.f32 %v1768_v41, %v1736_v9  ;;  %v1756_v47 = vadd.f32 %v1748_v57, %v1716_v35  ;;  %v1429_v53 = vadd.f32 %v1421_v1, %v1381_v20  ;;  %v1844_v26 = vmul.f32 %v4566_v42, %v4871_v23  ;;  %v5006_v35 = vld [vmem:[#allocation2 + $0xaa] sm:$0xff] }
 0x16a   : > { %v1972_v5 = vmul.f32 0.7978846, %v1964_v3  ;;  %v4997_v33 = vadd.f32 %v4929_v40, %v1919_v6  ;;  %v1485_v41 = vadd.f32 %v1477_v21, %v1449_v10  ;;  %v1517_v28 = vmul.f32 %v4368_v0, %v4845_v37  ;;  %6316 = vst [vmem:[#allocation39_spill] sm:$0xff] %v5006_v35 }
 0x16b   : > { %v1796_v36 = vadd.f32 %v1788_v62, %v1756_v47  ;;  %v1505_v9 = vadd.f32 %v1497_v30, %v1429_v53  ;;  %v1537_v57 = vmul.f32 %v6274_v15, %v6315_v24  ;;  %v1864_v6 = vmul.f32 %v6292_v18, %v4863_v14  ;;  %v5061_v24 = vld [vmem:[#allocation2 + $0xc7] sm:$0xff] }
 0x16c   : > { %3840 = vtanh.f32 %v1972_v5  ;;  %v1941_v3 = vmul.f32 0.044715, %v4997_v33  ;;  %v1525_v55 = vadd.f32 %v1517_v28, %v1485_v41  ;;  %v1557_v20 = vmul.f32 %v4992_v43, %v4342_v22  ;;  %v5021_v41 = vld [vmem:[#allocation2 + $0xb0] sm:$0xff]  ;;  %v6330_v43 = vld [vmem:[#allocation27_spill] sm:$0xff] }
 0x16d   : > { %v1832_v2 = vadd.f32 %v1824_v48, %v1796_v36  ;;  %v1852_v1 = vadd.f32 %v1844_v26, %v1776_v31  ;;  %v1545_v7 = vadd.f32 %v1537_v57, %v1505_v9  ;;  %v1613_v62 = vmul.f32 %v6278_v19, %v4477_v39  ;;  %6317 = vst [vmem:[#allocation41_spill] sm:$0xff] %v5021_v41  ;;  %v6318_v31 = vld [vmem:[#allocation35_spill] sm:$0xff]  ;;  %v6319_v9 = vld [vmem:[#allocation33_spill] sm:$0xff] }
 0x16e   : > { %v1949_v10 = vmul.f32 %v1941_v3, %v4997_v33  ;;  %v1884_v21 = vmul.f32 %v4576_v61, %v4879_v60  ;;  %v1565_v5 = vadd.f32 %v1557_v20, %v1525_v55  ;;  %v1593_v47 = vmul.f32 %v4299_v58, %v4859_v32  ;;  %v5029_v55 = vld [vmem:[#allocation2 + $0xb1] sm:$0xff] }
 0x16f   : > { %v1872_v53 = vadd.f32 %v1864_v6, %v1832_v2  ;;  %v1904_v30 = vmul.f32 %v4877_v56, %v5006_v35  ;;  %v1621_v48 = vadd.f32 %v1613_v62, %v1545_v7  ;;  %v1653_v26 = vmul.f32 %v6281_v59, %v6318_v31  ;;  %6320 = vst [vmem:[#allocation52_spill] sm:$0xff] %v5029_v55  ;;  %v6321_v20 = vld [vmem:[#allocation37_spill] sm:$0xff]  ;;  %v6322_v31 = vld [vmem:[#allocation74_spill] sm:$0xff] }
 0x170   : > { %v1980_v39 = vmul.f32 0.5, %v4946_v11  ;;  %v1957_v28 = vmul.f32 %v1949_v10, %v4997_v33  ;;  %v1601_v36 = vadd.f32 %v1593_v47, %v1565_v5  ;;  %v1633_v57 = vmul.f32 %v6283_v51, %v6319_v9  ;;  %v6323_v10 = vld [vmem:[#allocation32_spill] sm:$0xff]  ;;  %v6324_v9 = vld [vmem:[#allocation75_spill] sm:$0xff] }
 0x171   : > { %v1892_v3 = vadd.f32 %v1884_v21, %v1852_v1  ;;  %v1912_v32 = vadd.f32 %v1904_v30, %v1872_v53  ;;  %v1661_v6 = vadd.f32 %v1653_v26, %v1621_v48  ;;  %v1729_v2 = vmul.f32 %v4515_v8, %v6321_v20  ;;  %v6325_v21 = vld [vmem:[#allocation76_spill] sm:$0xff] }
 0x172   : > { %v1965_v7 = vadd.f32 %v1957_v28, %v4997_v33  ;;  %v1641_v62 = vadd.f32 %v1633_v57, %v1601_v36  ;;  %v1673_v11 = vmul.f32 %v6285_v54, %v5021_v41  ;;  %v1709_v5 = vmul.f32 %v6323_v10, %v6322_v31  ;;  %v6328_v31 = vld [vmem:[#allocation45_spill] sm:$0xff] }
 0x173   : > { %v1920_v47 = vadd.f32 %v1912_v32, %v1892_v3  ;;  %v1737_v35 = vadd.f32 %v1729_v2, %v1661_v6  ;;  %v1749_v1 = vmul.f32 %v4535_v50, %v6324_v9  ;;  %v1769_v53 = vmul.f32 %v4551_v49, %v6325_v21  ;;  %v6326_v32 = vld [vmem:[#allocation61_spill] sm:$0xff]  ;;  %v6327_v2 = vld [vmem:[#allocation54_spill] sm:$0xff] }
 0x174   : > { %v1973_v30 = vmul.f32 0.7978846, %v1965_v7  ;;  %v1681_v48 = vadd.f32 %v1673_v11, %v1641_v62  ;;  %v1789_v26 = vmul.f32 %v4555_v45, %v5029_v55  ;;  %v1825_v28 = vmul.f32 %v4559_v38, %v4922_v4  ;;  %v6329_v55 = vld [vmem:[#allocation53_spill] sm:$0xff] }
 0x175   : > { %v5047_v57 = vadd.f32 %v4929_v40, %v1920_v47  ;;  %v1845_v3 = vmul.f32 %v4566_v42, %v4933_v63  ;;  %v1382_v6 = vmul.f32 %v4325_v12, %v6326_v32  ;;  %v1422_v7 = vmul.f32 %v4329_v13, %v6327_v2  ;;  %v6331_v2 = vld [vmem:[#allocation64_spill] sm:$0xff] }
 0x176   : > { %v3841_v36 = vpop.eup %3840  ;;  %3842 = vtanh.f32 %v1973_v30  ;;  %v1717_v11 = vadd.f32 %v1709_v5, %v1681_v48  ;;  %v1410_v21 = vadd.f32 %v6329_v55, %v6328_v31  ;;  %v1777_v20 = vadd.f32 %v1769_v53, %v1737_v35  ;;  %v6332_v48 = vld [vmem:[#allocation65_spill] sm:$0xff]  ;;  %v6333_v53 = vld [vmem:[#allocation42_spill] sm:$0xff] }
 0x177   : > { %v1996_v62 = vadd.f32 1.0, %v3841_v36  ;;  %v1942_v4 = vmul.f32 0.044715, %v5047_v57  ;;  %v1430_v47 = vadd.f32 %v1422_v7, %v1382_v6  ;;  %v1478_v9 = vmul.f32 %v4351_v29, %v4755_v16 }
 0x178   : > { %v1757_v41 = vadd.f32 %v1749_v1, %v1717_v11  ;;  %v1450_v32 = vadd.f32 %v6330_v43, %v1410_v21  ;;  %v1498_v30 = vmul.f32 %v6273_v52, %v6331_v2  ;;  %v1865_v55 = vmul.f32 %v6292_v18, %v4939_v34  ;;  %v5073_v43 = vld [vmem:[#allocation2 + $0xb2] sm:$0xff] }
 0x179   : > { %v2004_v63 = vmul.f32 %v1996_v62, %v1980_v39  ;;  %v1950_v5 = vmul.f32 %v1942_v4, %v5047_v57  ;;  %v1518_v35 = vmul.f32 %v4368_v0, %v6332_v48  ;;  %v1538_v16 = vmul.f32 %v6274_v15, %v6333_v53  ;;  %6334 = vst [vmem:[#allocation40_spill] sm:$0xff] %v5073_v43 }
 0x17a   : > { %v1797_v1 = vadd.f32 %v1789_v26, %v1757_v41  ;;  %v1486_v21 = vadd.f32 %v1478_v9, %v1450_v32  ;;  %v1506_v36 = vadd.f32 %v1498_v30, %v1430_v47  ;;  %v1853_v7 = vadd.f32 %v1845_v3, %v1777_v20  ;;  %v6335_v41 = vld [vmem:[#allocation79_spill] sm:$0xff]  ;;  %v5087_v32 = vld [vmem:[#allocation2 + $0xc8] sm:$0xff] }
 0x17b   : > { %v2020_v39 = vadd.f32 %v2004_v63, %v6304_v27  ;;  %v1958_v6 = vmul.f32 %v1950_v5, %v5047_v57  ;;  %v1558_v62 = vmul.f32 %v4342_v22, %v5061_v24  ;;  %v1614_v11 = vmul.f32 %v6278_v19, %v6305_v17  ;;  %6336 = vst [vmem:[#allocation48_spill] sm:$0xff] %v5087_v32 }
 0x17c   : > { %v1833_v31 = vadd.f32 %v1825_v28, %v1797_v1  ;;  %v1526_v4 = vadd.f32 %v1518_v35, %v1486_v21  ;;  %v1546_v53 = vadd.f32 %v1538_v16, %v1506_v36  ;;  %v1885_v9 = vmul.f32 %v4576_v61, %v6335_v41  ;;  %v6337_v16 = vld [vmem:[#allocation36_spill] sm:$0xff] }
 0x17d   : > { %3459 = vmatprep.mubr.f32.mxu1 %v2020_v39  ;;  %3503 = vmatprep.mubr.f32.mxu0 %v2020_v39  ;;  %v1966_v63 = vadd.f32 %v1958_v6, %v5047_v57  ;;  %v1905_v26 = vmul.f32 %v4877_v56, %v5073_v43  ;;  %v1594_v20 = vmul.f32 %v4299_v58, %v6304_v27  ;;  %v1981_v30 = vmul.f32 0.5, %v4997_v33  ;;  %v5094_v27 = vld [vmem:[#allocation2 + $0xc9] sm:$0xff]  ;;  %v6339_v33 = vld [vmem:[#allocation30_spill] sm:$0xff] }
 0x17e   : > { %v1873_v3 = vadd.f32 %v1865_v55, %v1833_v31  ;;  %v1566_v47 = vadd.f32 %v1558_v62, %v1526_v4  ;;  %v1622_v17 = vadd.f32 %v1614_v11, %v1546_v53  ;;  %v1654_v28 = vmul.f32 %v6281_v59, %v6307_v44  ;;  %6338 = vst [vmem:[#allocation63_spill] sm:$0xff] %v5094_v27  ;;  %v6340_v4 = vld [vmem:[#allocation71_spill] sm:$0xff] }
 0x17f   : > { %v1974_v5 = vmul.f32 0.7978846, %v1966_v63  ;;  %v1893_v35 = vadd.f32 %v1885_v9, %v1853_v7  ;;  %v1634_v39 = vmul.f32 %v6283_v51, %v6337_v16  ;;  %v1730_v55 = vmul.f32 %v4515_v8, %v4820_v46 }
 0x180   : > { %v3843_v1 = vpop.eup %3842  ;;  %v1913_v21 = vadd.f32 %v1905_v26, %v1873_v3  ;;  %v1602_v36 = vadd.f32 %v1594_v20, %v1566_v47  ;;  %v1662_v6 = vadd.f32 %v1654_v28, %v1622_v17  ;;  %v1674_v44 = vmul.f32 %v6285_v54, %v5087_v32  ;;  %v6341_v26 = vld [vmem:[#allocation31_spill] sm:$0xff]  ;;  %v2013_v17 = vld [vmem:[#allocation2 + $0x50] sm:$0xff] }
 0x181   : > { %v1997_v53 = vadd.f32 1.0, %v3843_v1  ;;  %3844 = vtanh.f32 %v1974_v5  ;;  %v1710_v7 = vmul.f32 %v6323_v10, %v6339_v33  ;;  %v1750_v63 = vmul.f32 %v4535_v50, %v6340_v4 }
 0x182   : > { %v1921_v62 = vadd.f32 %v1913_v21, %v1893_v35  ;;  %v1642_v11 = vadd.f32 %v1634_v39, %v1602_v36  ;;  %v1738_v31 = vadd.f32 %v1730_v55, %v1662_v6  ;;  %v1770_v20 = vmul.f32 %v4551_v49, %v6341_v26  ;;  %v6342_v39 = vld [vmem:[#allocation47_spill] sm:$0xff]  ;;  %v6343_v21 = vld [vmem:[#allocation46_spill] sm:$0xff] }
 0x183   : > { %v2005_v9 = vmul.f32 %v1997_v53, %v1981_v30  ;;  %v1790_v3 = vmul.f32 %v4555_v45, %v5094_v27  ;;  %v1826_v47 = vmul.f32 %v4559_v38, %v4871_v23  ;;  %v1846_v35 = vmul.f32 %v4566_v42, %v4863_v14  ;;  %v6344_v36 = vld [vmem:[#allocation55_spill] sm:$0xff]  ;;  %v6345_v55 = vld [vmem:[#allocation58_spill] sm:$0xff] }
 0x184   : > { %v5111_v28 = vadd.f32 %v4929_v40, %v1921_v62  ;;  %v1682_v5 = vadd.f32 %v1674_v44, %v1642_v11  ;;  %v1866_v30 = vmul.f32 %v6292_v18, %v4879_v60  ;;  %v1383_v1 = vmul.f32 %v4325_v12, %v6342_v39  ;;  %v6347_v60 = vld [vmem:[#allocation3_spill] sm:$0xff] }
 0x185   : > { %v2021_v16 = vadd.f32 %v2013_v17, %v2005_v9  ;;  %v1411_v6 = vadd.f32 %v6344_v36, %v6343_v21  ;;  %v1423_v23 = vmul.f32 %v4329_v13, %v6345_v55  ;;  %v1778_v44 = vadd.f32 %v1770_v20, %v1738_v31  ;;  %v6346_v9 = vld [vmem:[#allocation69_spill] sm:$0xff]  ;;  %v6348_v21 = vld [vmem:[#allocation4_spill] sm:$0xff]  ;;  %v6349_v31 = vld [vmem:[#allocation51_spill] sm:$0xff] }
 0x186   : > { %v1943_v53 = vmul.f32 0.044715, %v5111_v28  ;;  %v1718_v33 = vadd.f32 %v1710_v7, %v1682_v5  ;;  %v1479_v62 = vmul.f32 %v4351_v29, %v6314_v25  ;;  %v1499_v39 = vmul.f32 %v6273_v52, %v4845_v37  ;;  %v5132_v7 = vld [vmem:[#allocation2 + $0xcf] sm:$0xff] }
 0x187   : > { %3460 = vmatmul.mubr.f32.vlgmr.msra.gmra.mrb[14].mxu1 %v2021_v16  ;;  %3504 = vmatmul.mubr.f32.vlgmr.msra.gmra.mrb[16].mxu0 %v2021_v16  ;;  %v1431_v11 = vadd.f32 %v1423_v23, %v1383_v1  ;;  %v1451_v17 = vadd.f32 %v6346_v9, %v1411_v6  ;;  %v1519_v25 = vmul.f32 %v4368_v0, %v6349_v31  ;;  %v1982_v20 = vmul.f32 0.5, %v5047_v57  ;;  %v6350_v5 = vld [vmem:[#allocation5_spill] sm:$0xff]  ;;  %v6351_v16 = vld [vmem:[#allocation6_spill] sm:$0xff] }
 0x188   : > { %3702 = vmatpush3.bf16.msra.mxu1 %v6347_v60  ;;  %3734 = vmatpush3.bf16.msra.mxu0 %v6348_v21  ;;  %v1951_v36 = vmul.f32 %v1943_v53, %v5111_v28  ;;  %v1758_v55 = vadd.f32 %v1750_v63, %v1718_v33  ;;  %v6352_v60 = vld [vmem:[#allocation34_spill] sm:$0xff]  ;;  %v1854_v63 = vadd.f32 %v1846_v35, %v1778_v44  ;;  %v6353_v33 = vld [vmem:[#allocation39_spill] sm:$0xff]  ;;  %v5144_v31 = vld [vmem:[#allocation2 + $0xca] sm:$0xff] }
 0x189   : > { %3704 = vmatprep.subr.bf16.mxu1 %v6350_v5  ;;  %3736 = vmatprep.subr.bf16.mxu0 %v6351_v16  ;;  %v1487_v1 = vadd.f32 %v1479_v62, %v1451_v17  ;;  %v1507_v6 = vadd.f32 %v1499_v39, %v1431_v11  ;;  %v1539_v23 = vmul.f32 %v6352_v60, %v6274_v15  ;;  %v5148_v62 = vld [vmem:[#allocation2 + $0x70] sm:$0xff] }
 0x18a   : > { %v1959_v9 = vmul.f32 %v1951_v36, %v5111_v28  ;;  %v1798_v53 = vadd.f32 %v1790_v3, %v1758_v55  ;;  %v1886_v21 = vmul.f32 %v4576_v61, %v6353_v33  ;;  %6354 = vst [vmem:[#allocation43_spill] sm:$0xff] %v5144_v31  ;;  %v1559_v27 = vmul.f32 %v4342_v22, %v5132_v7  ;;  %v3873_v44 = vld [vmem:[#allocation2 + $0x50] sm:$0xff]  ;;  %v6356_v36 = vld [vmem:[#allocation7_spill] sm:$0xff]  ;;  %v6357_v55 = vld [vmem:[#allocation8_spill] sm:$0xff] }
 0x18b   : > { %v3845_v37 = vpop.eup %3844  ;;  %v1527_v57 = vadd.f32 %v1519_v25, %v1487_v1  ;;  %v1547_v14 = vadd.f32 %v1539_v23, %v1507_v6  ;;  %6355 = vst [vmem:[#allocation35_spill] sm:$0xff] %v5148_v62  ;;  %v1615_v11 = vmul.f32 %v5148_v62, %v6278_v19  ;;  %v1595_v39 = vmul.f32 %v3873_v44, %v4299_v58  ;;  %v6358_v6 = vld [vmem:[#allocation41_spill] sm:$0xff] }
 0x18c   : > { %v1998_v17 = vadd.f32 1.0, %v3845_v37  ;;  %v1967_v3 = vadd.f32 %v1959_v9, %v5111_v28  ;;  %3706 = vmatpush3.bf16.msra.mxu1 %v6350_v5  ;;  %3738 = vmatpush3.bf16.msra.mxu0 %v6351_v16  ;;  %v1834_v35 = vadd.f32 %v1826_v47, %v1798_v53  ;;  %v1655_v23 = vmul.f32 %v6281_v59, %v6358_v6  ;;  %v5162_v16 = vld [vmem:[#allocation2 + $0xd0] sm:$0xff]  ;;  %v2014_v47 = vld [vmem:[#allocation2 + $0x68] sm:$0xff] }
 0x18d   : > { %3708 = vmatprep.subr.bf16.mxu1 %v6356_v36  ;;  %3740 = vmatprep.subr.bf16.mxu0 %v6357_v55  ;;  %v1567_v25 = vadd.f32 %v1559_v27, %v1527_v57  ;;  %v1623_v1 = vadd.f32 %v1615_v11, %v1547_v14  ;;  %v1906_v5 = vmul.f32 %v4877_v56, %v5144_v31  ;;  %v5164_v33 = vld [vmem:[#allocation2 + $0x90] sm:$0xff]  ;;  %v1983_v6 = vmul.f32 0.5, %v5111_v28 }
 0x18e   : > { %v2006_v37 = vmul.f32 %v1998_v17, %v1982_v20  ;;  %v1975_v62 = vmul.f32 0.7978846, %v1967_v3  ;;  %v1874_v9 = vadd.f32 %v1866_v30, %v1834_v35  ;;  %6359 = vst [vmem:[#allocation33_spill] sm:$0xff] %v5162_v16  ;;  %v1894_v53 = vadd.f32 %v1886_v21, %v1854_v63  ;;  %v6360_v20 = vld [vmem:[#allocation75_spill] sm:$0xff]  ;;  %v6361_v17 = vld [vmem:[#allocation26_spill] sm:$0xff]  ;;  %v6362_v3 = vld [vmem:[#allocation20_spill] sm:$0xff] }
 0x18f   : > { %v1603_v44 = vadd.f32 %v1595_v39, %v1567_v25  ;;  %v1635_v27 = vmul.f32 %v5164_v33, %v6283_v51  ;;  %v1663_v14 = vadd.f32 %v1655_v23, %v1623_v1  ;;  %v1731_v30 = vmul.f32 %v4515_v8, %v6360_v20  ;;  %v6364_v21 = vld [vmem:[#allocation23_spill] sm:$0xff]  ;;  %v5182_v25 = vld [vmem:[#allocation2 + $0xd1] sm:$0xff] }
 0x190   : > { %v2022_v57 = vadd.f32 %v2014_v47, %v2006_v37  ;;  %3846 = vtanh.f32 %v1975_v62  ;;  %v1914_v11 = vadd.f32 %v1906_v5, %v1874_v9  ;;  %3710 = vmatpush3.bf16.msra.mxu1 %v6356_v36  ;;  %3742 = vmatpush3.bf16.msra.mxu0 %v6357_v55  ;;  %v5174_v63 = vmul.f32 %v6362_v3, %v6361_v17  ;;  %v6366_v1 = vld [vmem:[#allocation9_spill] sm:$0xff]  ;;  %v1352_v23 = vld [vmem:[#allocation2 + $0xe6] sm:$0xff]  ;;  %v6370_v20 = vld [vmem:[#allocation10_spill] sm:$0xff] }
 0x191   : > { %v5178_v35 = vmul.f32 %v6362_v3, %v6364_v21  ;;  %v1643_v39 = vadd.f32 %v1635_v27, %v1603_v44  ;;  %v1675_v62 = vmul.f32 %v6285_v54, %v5162_v16  ;;  %6365 = vst [vmem:[#allocation32_spill] sm:$0xff] %v5182_v25  ;;  %3712 = vmatprep.subr.bf16.mxu1 %v6366_v1  ;;  %v6367_v5 = vld [vmem:[#allocation37_spill] sm:$0xff]  ;;  %v6368_v44 = vld [vmem:[#allocation76_spill] sm:$0xff] }
 0x192   : > { %6363 = vst [vmem:[#allocation74_spill] sm:$0xff] %v5174_v63  ;;  %v1480_v36 = vmul.f32 %v4351_v29, %v6331_v2  ;;  %3462 = vmatprep.mubr.f32.mxu1 %v2022_v57  ;;  %3506 = vmatprep.mubr.f32.mxu0 %v2022_v57  ;;  %v1922_v55 = vadd.f32 %v1914_v11, %v1894_v53  ;;  %v6369_v3 = vld [vmem:[#allocation52_spill] sm:$0xff] }
 0x193   : > { %v1739_v37 = vadd.f32 %v1731_v30, %v1663_v14  ;;  %v1683_v9 = vadd.f32 %v1675_v62, %v1643_v39  ;;  %v1711_v47 = vmul.f32 %v6323_v10, %v6367_v5  ;;  %v1751_v27 = vmul.f32 %v4535_v50, %v6368_v44  ;;  %3744 = vmatprep.subr.bf16.mxu0 %v6370_v20  ;;  %v6371_v14 = vld [vmem:[#allocation50_spill] sm:$0xff]  ;;  %v6372_v30 = vld [vmem:[#allocation68_spill] sm:$0xff] }
 0x194   : > { %v1771_v63 = vmul.f32 %v4551_v49, %v6369_v3  ;;  %v5196_v2 = vadd.f32 %v4929_v40, %v1922_v55  ;;  %v1791_v53 = vmul.f32 %v4555_v45, %v5182_v25  ;;  %3714 = vmatpush3.bf16.msra.mxu1 %v6366_v1  ;;  %3746 = vmatpush3.bf16.msra.mxu0 %v6370_v20  ;;  %v6373_v39 = vld [vmem:[#allocation60_spill] sm:$0xff]  ;;  %v6375_v3 = vld [vmem:[#allocation11_spill] sm:$0xff]  ;;  %v6376_v1 = vld [vmem:[#allocation77_spill] sm:$0xff] }
 0x195   : > { %v1384_v57 = vmul.f32 %v4325_v12, %v6371_v14  ;;  %v1719_v11 = vadd.f32 %v1711_v47, %v1683_v9  ;;  %v1412_v62 = vadd.f32 %v6373_v39, %v6372_v30  ;;  %v1424_v28 = vmul.f32 %v4329_v13, %v6361_v17  ;;  %v6374_v5 = vld [vmem:[#allocation24_spill] sm:$0xff]  ;;  %3716 = vmatprep.subr.bf16.mxu1 %v6375_v3 }
 0x196   : > { %v1444_v55 = vmul.f32 %v6374_v5, %v1352_v23  ;;  %v1944_v25 = vmul.f32 0.044715, %v5196_v2  ;;  %v1779_v44 = vadd.f32 %v1771_v63, %v1739_v37  ;;  %v1827_v20 = vmul.f32 %v4559_v38, %v6376_v1  ;;  %v6377_v9 = vld [vmem:[#allocation12_spill] sm:$0xff]  ;;  %v6379_v1 = vld [vmem:[#allocation42_spill] sm:$0xff] }
 0x197   : > { %v1847_v14 = vmul.f32 %v4566_v42, %v4939_v34  ;;  %3748 = vmatprep.subr.bf16.mxu0 %v6377_v9  ;;  %v1759_v47 = vadd.f32 %v1751_v27, %v1719_v11  ;;  %v1432_v30 = vadd.f32 %v1424_v28, %v1384_v57  ;;  %v5216_v16 = vld [vmem:[#allocation2 + $0xe7] sm:$0xff]  ;;  %v1500_v17 = vmul.f32 %v6273_v52, %v6332_v48  ;;  %v5228_v57 = vld [vmem:[#allocation2 + $0xd2] sm:$0xff] }
 0x198   : > { %v1452_v39 = vadd.f32 %v1444_v55, %v1412_v62  ;;  %6378 = vst [vmem:[#allocation61_spill] sm:$0xff] %v5216_v16  ;;  %v1952_v23 = vmul.f32 %v1944_v25, %v5196_v2  ;;  %v1867_v63 = vmul.f32 %v6292_v18, %v6335_v41  ;;  %v1887_v37 = vmul.f32 %v4576_v61, %v5073_v43 }
 0x199   : > { %v1520_v34 = vmul.f32 %v4368_v0, %v6379_v1  ;;  %3718 = vmatpush3.bf16.msra.mxu1 %v6375_v3  ;;  %v1799_v27 = vadd.f32 %v1791_v53, %v1759_v47  ;;  %6380 = vst [vmem:[#allocation54_spill] sm:$0xff] %v5228_v57  ;;  %v1508_v62 = vadd.f32 %v1500_v17, %v1432_v30  ;;  %v3875_v1 = vld [vmem:[#allocation2 + $0x88] sm:$0xff]  ;;  %v6381_v53 = vld [vmem:[#allocation13_spill] sm:$0xff]  ;;  %v6383_v17 = vld [vmem:[#allocation14_spill] sm:$0xff] }
 0x19a   : > { %v1488_v11 = vadd.f32 %v1480_v36, %v1452_v39  ;;  %v1540_v48 = vmul.f32 %v6274_v15, %v5061_v24  ;;  %3750 = vmatpush3.bf16.msra.mxu0 %v6377_v9  ;;  %v3847_v25 = vpop.eup %3846  ;;  %v1960_v28 = vmul.f32 %v1952_v23, %v5196_v2  ;;  %v1855_v55 = vadd.f32 %v1847_v14, %v1779_v44  ;;  %v5238_v47 = vld [vmem:[#allocation2 + $0xcf] sm:$0xff] }
 0x19b   : > { %v1560_v43 = vmul.f32 %v4342_v22, %v5216_v16  ;;  %v1616_v3 = vmul.f32 %v3875_v1, %v6278_v19  ;;  %3720 = vmatprep.subr.bf16.mxu1 %v6381_v53  ;;  %6382 = vst [vmem:[#allocation45_spill] sm:$0xff] %v5238_v47  ;;  %v1999_v36 = vadd.f32 1.0, %v3847_v25  ;;  %v1835_v30 = vadd.f32 %v1827_v20, %v1799_v27  ;;  %v3876_v14 = vld [vmem:[#allocation2 + $0x68] sm:$0xff]  ;;  %v2015_v25 = vld [vmem:[#allocation2 + $0x70] sm:$0xff] }
 0x19c   : > { %v1528_v39 = vadd.f32 %v1520_v34, %v1488_v11  ;;  %v1548_v24 = vadd.f32 %v1540_v48, %v1508_v62  ;;  %3752 = vmatprep.subr.bf16.mxu0 %v6383_v17  ;;  %v1968_v9 = vadd.f32 %v1960_v28, %v5196_v2  ;;  %v1907_v44 = vmul.f32 %v4877_v56, %v5228_v57  ;;  %v5248_v16 = vld [vmem:[#allocation2 + $0x10e] sm:$0xff]  ;;  %v6386_v57 = vld [vmem:[#allocation15_spill] sm:$0xff] }
 0x19d   : > { %v1596_v23 = vmul.f32 %v3876_v14, %v4299_v58  ;;  %v1656_v1 = vmul.f32 %v6281_v59, %v5087_v32  ;;  %3722 = vmatpush3.bf16.msra.mxu1 %v6381_v53  ;;  %6384 = vst [vmem:[#allocation53_spill] sm:$0xff] %v5248_v16  ;;  %v2007_v20 = vmul.f32 %v1999_v36, %v1983_v6  ;;  %v5250_v11 = vld [vmem:[#allocation2 + $0xe8] sm:$0xff] }
 0x19e   : > { %v1875_v34 = vadd.f32 %v1867_v63, %v1835_v30  ;;  %v1568_v27 = vadd.f32 %v1560_v43, %v1528_v39  ;;  %v1624_v62 = vadd.f32 %v1616_v3, %v1548_v24  ;;  %3754 = vmatpush3.bf16.msra.mxu0 %v6383_v17  ;;  %v5255_v48 = vmul.f32 %v5238_v47, %v4368_v0  ;;  %v3877_v32 = vld [vmem:[#allocation2 + $0xa8] sm:$0xff]  ;;  %v6388_v30 = vld [vmem:[#allocation57_spill] sm:$0xff] }
 0x19f   : > { %v1976_v28 = vmul.f32 0.7978846, %v1968_v9  ;;  %v1895_v14 = vadd.f32 %v1887_v37, %v1855_v55  ;;  %v1636_v53 = vmul.f32 %v3877_v32, %v6283_v51  ;;  %3724 = vmatprep.subr.bf16.mxu1 %v6386_v57  ;;  %v6387_v6 = vld [vmem:[#allocation16_spill] sm:$0xff]  ;;  %v2023_v43 = vadd.f32 %v2015_v25, %v2007_v20  ;;  %v6392_v25 = vld [vmem:[#allocation63_spill] sm:$0xff] }
 0x1a0   : > { %6385 = vst [vmem:[#allocation27_spill] sm:$0xff] %v5255_v48  ;;  %3756 = vmatprep.subr.bf16.mxu0 %v6387_v6  ;;  %v1915_v63 = vadd.f32 %v1907_v44, %v1875_v34  ;;  %v1604_v36 = vadd.f32 %v1596_v23, %v1568_v27  ;;  %v1664_v3 = vadd.f32 %v1656_v1, %v1624_v62  ;;  %v5264_v24 = vld [vmem:[#allocation2 + $0xee] sm:$0xff]  ;;  %v1984_v55 = vmul.f32 0.5, %v5196_v2 }
 0x1a1   : > { %v5262_v39 = vadd.f32 %v5178_v35, %v6388_v30  ;;  %6389 = vst [vmem:[#allocation64_spill] sm:$0xff] %v5264_v24  ;;  %v5268_v37 = vmul.f32 %v5248_v16, %v6374_v5  ;;  %3848 = vtanh.f32 %v1976_v28  ;;  %v1676_v32 = vmul.f32 %v6285_v54, %v5250_v11  ;;  %3726 = vmatpush3.bf16.msra.mxu1 %v6386_v57  ;;  %v5276_v44 = vld [vmem:[#allocation2 + $0xe9] sm:$0xff] }
 0x1a2   : > { %3463 = vmatmul.mubr.f32.gmra.mrb[16].mxu1 %v2023_v43  ;;  %3507 = vmatmul.mubr.f32.gmra.mrb[18].mxu0 %v2023_v43  ;;  %v1923_v17 = vadd.f32 %v1915_v63, %v1895_v14  ;;  %v1644_v9 = vadd.f32 %v1636_v53, %v1604_v36  ;;  %v1732_v35 = vmul.f32 %v4515_v8, %v6340_v4  ;;  %v3878_v20 = vld [vmem:[#allocation2 + $0x8e] sm:$0xff]  ;;  %v6394_v53 = vld [vmem:[#allocation62_spill] sm:$0xff] }
 0x1a3   : > { %6390 = vst [vmem:[#allocation65_spill] sm:$0xff] %v5276_v44  ;;  %v1712_v23 = vmul.f32 %v6323_v10, %v4820_v46  ;;  %v1752_v1 = vmul.f32 %v4535_v50, %v6341_v26  ;;  %v1385_v57 = vmul.f32 %v3878_v20, %v4325_v12  ;;  %v1425_v34 = vmul.f32 %v4329_v13, %v6364_v21  ;;  %v6391_v46 = vld [vmem:[#allocation17_spill] sm:$0xff]  ;;  %v6395_v36 = vld [vmem:[#allocation18_spill] sm:$0xff]  ;;  %v6403_v48 = vld [vmem:[#allocation76_spill] sm:$0xff] }
 0x1a4   : > { %3758 = vmatpush3.bf16.msra.mxu0 %v6387_v6  ;;  %v5287_v2 = vadd.f32 %v4929_v40, %v1923_v17  ;;  %v1684_v4 = vadd.f32 %v1676_v32, %v1644_v9  ;;  %v1740_v27 = vadd.f32 %v1732_v35, %v1664_v3  ;;  %v1445_v62 = vmul.f32 %v6374_v5, %v5264_v24  ;;  %v6393_v14 = vld [vmem:[#allocation49_spill] sm:$0xff]  ;;  %v6396_v17 = vld [vmem:[#allocation72_spill] sm:$0xff]  ;;  %v6397_v20 = vld [vmem:[#allocation70_spill] sm:$0xff] }
 0x1a5   : > { %3728 = vmatprep.subr.bf16.mxu1 %v6391_v46  ;;  %v1772_v28 = vmul.f32 %v4551_v49, %v6392_v25  ;;  %v1413_v43 = vadd.f32 %v6394_v53, %v6393_v14  ;;  %v1433_v63 = vadd.f32 %v1425_v34, %v1385_v57  ;;  %v3879_v21 = vld [vmem:[#allocation2 + $0x8f] sm:$0xff]  ;;  %3760 = vmatprep.subr.bf16.mxu0 %v6395_v36 }
 0x1a6   : > { %v1501_v6 = vmul.f32 %v3879_v21, %v6273_v52  ;;  %v1945_v30 = vmul.f32 0.044715, %v5287_v2  ;;  %v1720_v3 = vadd.f32 %v1712_v23, %v1684_v4  ;;  %v1792_v32 = vmul.f32 %v4555_v45, %v5276_v44  ;;  %3730 = vmatpush3.bf16.msra.mxu1 %v6391_v46  ;;  %v6398_v21 = vld [vmem:[#allocation73_spill] sm:$0xff] }
 0x1a7   : > { %v1828_v9 = vmul.f32 %v4559_v38, %v6396_v17  ;;  %v1453_v35 = vadd.f32 %v1445_v62, %v1413_v43  ;;  %v1481_v57 = vmul.f32 %v4351_v29, %v6397_v20  ;;  %v1541_v14 = vmul.f32 %v6274_v15, %v5132_v7  ;;  %v1469_v17 = vld [vmem:[#allocation2 + $0xef] sm:$0xff] }
 0x1a8   : > { %v1509_v34 = vadd.f32 %v1501_v6, %v1433_v63  ;;  %3762 = vmatpush3.bf16.msra.mxu0 %v6395_v36  ;;  %v1953_v23 = vmul.f32 %v1945_v30, %v5287_v2  ;;  %v1760_v4 = vadd.f32 %v1752_v1, %v1720_v3  ;;  %v1780_v53 = vadd.f32 %v1772_v28, %v1740_v27  ;;  %v6399_v6 = vld [vmem:[#allocation39_spill] sm:$0xff]  ;;  %v5321_v28 = vld [vmem:[#allocation2 + $0xea] sm:$0xff] }
 0x1a9   : > { %v1848_v47 = vmul.f32 %v4566_v42, %v6398_v21  ;;  %v1489_v16 = vadd.f32 %v1481_v57, %v1453_v35  ;;  %v1521_v62 = vmul.f32 %v6352_v60, %v4368_v0  ;;  %v1617_v43 = vmul.f32 %v5164_v33, %v6278_v19  ;;  %6400 = vst [vmem:[#allocation79_spill] sm:$0xff] %v5321_v28  ;;  %v6401_v20 = vld [vmem:[#allocation33_spill] sm:$0xff] }
 0x1aa   : > { %v1549_v46 = vadd.f32 %v1541_v14, %v1509_v34  ;;  %v1961_v7 = vmul.f32 %v1953_v23, %v5287_v2  ;;  %v1800_v63 = vadd.f32 %v1792_v32, %v1760_v4  ;;  %v1868_v36 = vmul.f32 %v6292_v18, %v6399_v6  ;;  %v6402_v4 = vld [vmem:[#allocation35_spill] sm:$0xff] }
 0x1ab   : > { %v1888_v1 = vmul.f32 %v4576_v61, %v5144_v31  ;;  %v3849_v27 = vpop.eup %3848  ;;  %v1529_v30 = vadd.f32 %v1521_v62, %v1489_v16  ;;  %v1561_v3 = vmul.f32 %v4342_v22, %v1469_v17  ;;  %v1657_v57 = vmul.f32 %v6281_v59, %v6401_v20 }
 0x1ac   : > { %v1625_v35 = vadd.f32 %v1617_v43, %v1549_v46  ;;  %v2000_v33 = vadd.f32 1.0, %v3849_v27  ;;  %v1969_v34 = vadd.f32 %v1961_v7, %v5287_v2  ;;  %v1836_v32 = vadd.f32 %v1828_v9, %v1800_v63  ;;  %v5333_v43 = vld [vmem:[#allocation2 + $0xf0] sm:$0xff] }
 0x1ad   : > { %v1856_v14 = vadd.f32 %v1848_v47, %v1780_v53  ;;  %v1569_v23 = vadd.f32 %v1561_v3, %v1529_v30  ;;  %v1597_v21 = vmul.f32 %v6402_v4, %v4299_v58  ;;  %v1733_v60 = vmul.f32 %v4515_v8, %v6403_v48  ;;  %6404 = vst [vmem:[#allocation36_spill] sm:$0xff] %v5333_v43  ;;  %v5339_v47 = vld [vmem:[#allocation2 + $0x88] sm:$0xff]  ;;  %v6405_v7 = vld [vmem:[#allocation41_spill] sm:$0xff] }
 0x1ae   : > { %v1665_v31 = vadd.f32 %v1657_v57, %v1625_v35  ;;  %v2008_v16 = vmul.f32 %v2000_v33, %v1984_v55  ;;  %v1977_v62 = vmul.f32 0.7978846, %v1969_v34  ;;  %v1876_v17 = vadd.f32 %v1868_v36, %v1836_v32  ;;  %v5343_v27 = vld [vmem:[#allocation2 + $0xf1] sm:$0xff]  ;;  %v2263_v3 = vld [vmem:[#allocation2 + $0xa6] sm:$0xff] }
 0x1af   : > { %v1908_v46 = vmul.f32 %v4877_v56, %v5321_v28  ;;  %v5337_v9 = vadd.f32 %v5268_v37, %v5262_v39  ;;  %v1605_v53 = vadd.f32 %v1597_v21, %v1569_v23  ;;  %v1637_v63 = vmul.f32 %v6283_v51, %v6405_v7  ;;  %6406 = vst [vmem:[#allocation30_spill] sm:$0xff] %v5343_v27  ;;  %v5346_v35 = vld [vmem:[#allocation2 + $0x106] sm:$0xff] }
 0x1b0   : > { %v1741_v48 = vadd.f32 %v1733_v60, %v1665_v31  ;;  %v2024_v55 = vadd.f32 %v5339_v47, %v2008_v16  ;;  %3850 = vtanh.f32 %v1977_v62  ;;  %v1896_v36 = vadd.f32 %v1888_v1, %v1856_v14  ;;  %6407 = vst [vmem:[#allocation71_spill] sm:$0xff] %v5346_v35  ;;  %v6408_v37 = vld [vmem:[#allocation75_spill] sm:$0xff]  ;;  %v6409_v33 = vld [vmem:[#allocation32_spill] sm:$0xff]  ;;  %v6412_v16 = vld [vmem:[#allocation78_spill] sm:$0xff] }
 0x1b1   : > { %v1916_v30 = vadd.f32 %v1908_v46, %v1876_v17  ;;  %v1645_v20 = vadd.f32 %v1637_v63, %v1605_v53  ;;  %v1677_v39 = vmul.f32 %v6285_v54, %v5333_v43  ;;  %v1713_v57 = vmul.f32 %v6323_v10, %v6408_v37  ;;  %v5354_v32 = vld [vmem:[#allocation2 + $0xe6] sm:$0xff]  ;;  %v5367_v53 = vld [vmem:[#allocation2 + $0xf2] sm:$0xff] }
 0x1b2   : > { %v1773_v34 = vmul.f32 %v4551_v49, %v6409_v33  ;;  %6410 = vst [vmem:[#allocation31_spill] sm:$0xff] %v5354_v32  ;;  %3465 = vmatprep.mubr.f32.mxu1 %v2024_v55  ;;  %3509 = vmatprep.mubr.f32.mxu0 %v2024_v55  ;;  %v1985_v60 = vmul.f32 0.5, %v5287_v2  ;;  %v6411_v1 = vld [vmem:[#allocation52_spill] sm:$0xff]  ;;  %v1793_v23 = vmul.f32 %v4555_v45, %v5343_v27  ;;  %6413 = vst [vmem:[#allocation47_spill] sm:$0xff] %v5367_v53  ;;  %v6415_v63 = vld [vmem:[#allocation74_spill] sm:$0xff] }
 0x1b3   : > { %v1924_v31 = vadd.f32 %v1916_v30, %v1896_v36  ;;  %v1753_v14 = vmul.f32 %v4535_v50, %v6411_v1  ;;  %v1685_v4 = vadd.f32 %v1677_v39, %v1645_v20  ;;  %v1829_v62 = vmul.f32 %v4559_v38, %v6412_v16  ;;  %v6414_v2 = vld [vmem:[#allocation56_spill] sm:$0xff] }
 0x1b4   : > { %v1781_v21 = vadd.f32 %v1773_v34, %v1741_v48  ;;  %v2293_v17 = vmul.f32 %v2263_v3, %v4325_v12  ;;  %v2317_v55 = vadd.f32 %v6415_v63, %v6414_v2  ;;  %v2325_v36 = vmul.f32 %v5354_v32, %v4329_v13  ;;  %v5375_v48 = vld [vmem:[#allocation2 + $0xc7] sm:$0xff] }
 0x1b5   : > { %v5365_v46 = vadd.f32 %v4929_v40, %v1924_v31  ;;  %v2341_v30 = vmul.f32 %v5346_v35, %v6374_v5  ;;  %6416 = vst [vmem:[#allocation46_spill] sm:$0xff] %v5375_v48  ;;  %v1721_v20 = vadd.f32 %v1713_v57, %v1685_v4  ;;  %v1849_v39 = vmul.f32 %v4566_v42, %v6335_v41  ;;  %v6417_v37 = vld [vmem:[#allocation40_spill] sm:$0xff]  ;;  %v6418_v31 = vld [vmem:[#allocation54_spill] sm:$0xff]  ;;  %v6420_v4 = vld [vmem:[#allocation19_spill] sm:$0xff] }
 0x1b6   : > { %v1869_v34 = vmul.f32 %v6292_v18, %v6417_v37  ;;  %v1889_v16 = vmul.f32 %v4576_v61, %v6418_v31  ;;  %v5383_v12 = vld [vmem:[#allocation2 + $0x126] sm:$0xff]  ;;  %v2333_v63 = vadd.f32 %v2325_v36, %v2293_v17  ;;  %v1909_v41 = vmul.f32 %v4877_v56, %v5367_v53  ;;  %v6421_v61 = vld [vmem:[#allocation42_spill] sm:$0xff] }
 0x1b7   : > { %6419 = vst [vmem:[#allocation55_spill] sm:$0xff] %v5383_v12  ;;  %v1946_v2 = vmul.f32 0.044715, %v5365_v46  ;;  %v2349_v27 = vadd.f32 %v2341_v30, %v2317_v55  ;;  %v3880_v33 = vld [vmem:[#allocation2 + $0x87] sm:$0xff]  ;;  %v1761_v1 = vadd.f32 %v1753_v14, %v1721_v20  ;;  %v1857_v57 = vadd.f32 %v1849_v39, %v1781_v21 }
 0x1b8   : > { %v2373_v35 = vmul.f32 %v3880_v33, %v4351_v29  ;;  %v2279_v43 = vmul.f32 %v2263_v3, %v6420_v4  ;;  %v5390_v37 = vld [vmem:[#allocation2 + $0x107] sm:$0xff]  ;;  %v2389_v28 = vmul.f32 %v6273_v52, %v6421_v61  ;;  %v2405_v17 = vmul.f32 %v5375_v48, %v4368_v0  ;;  %v6423_v3 = vld [vmem:[#allocation61_spill] sm:$0xff] }
 0x1b9   : > { %v1954_v31 = vmul.f32 %v1946_v2, %v5365_v46  ;;  %v5397_v55 = vld [vmem:[#allocation2 + $0xa8] sm:$0xff]  ;;  %v1801_v33 = vadd.f32 %v1793_v23, %v1761_v1  ;;  %v2343_v56 = vmul.f32 %v5383_v12, %v6374_v5  ;;  %v2421_v36 = vmul.f32 %v6274_v15, %v6423_v3 }
 0x1ba   : > { %v2381_v7 = vadd.f32 %v2373_v35, %v2349_v27  ;;  %v6422_v14 = vld [vmem:[#allocation20_spill] sm:$0xff]  ;;  %v3851_v30 = vpop.eup %3850  ;;  %v2397_v35 = vadd.f32 %v2389_v28, %v2333_v63  ;;  %v2437_v39 = vmul.f32 %v5390_v37, %v4342_v22  ;;  %v1897_v1 = vadd.f32 %v1889_v16, %v1857_v57  ;;  %v2017_v16 = vld [vmem:[#allocation2 + $0x90] sm:$0xff] }
 0x1bb   : > { %v2311_v21 = vmul.f32 %v5354_v32, %v6422_v14  ;;  %v1962_v27 = vmul.f32 %v1954_v31, %v5365_v46  ;;  %v2001_v2 = vadd.f32 1.0, %v3851_v30  ;;  %v1837_v4 = vadd.f32 %v1829_v62, %v1801_v33  ;;  %v5411_v53 = vld [vmem:[#allocation2 + $0x108] sm:$0xff] }
 0x1bc   : > { %v2413_v20 = vadd.f32 %v2405_v17, %v2381_v7  ;;  %v2469_v23 = vmul.f32 %v5339_v47, %v4299_v58  ;;  %v2429_v12 = vadd.f32 %v2421_v36, %v2397_v35  ;;  %6424 = vst [vmem:[#allocation58_spill] sm:$0xff] %v5411_v53  ;;  %v2485_v31 = vmul.f32 %v5397_v55, %v6278_v19  ;;  %v6425_v17 = vld [vmem:[#allocation48_spill] sm:$0xff] }
 0x1bd   : > { %v1970_v32 = vadd.f32 %v1962_v27, %v5365_v46  ;;  %v2009_v28 = vmul.f32 %v2001_v2, %v1985_v60  ;;  %v1877_v7 = vadd.f32 %v1869_v34, %v1837_v4  ;;  %v2319_v63 = vadd.f32 %v2311_v21, %v2279_v43  ;;  %v5417_v62 = vld [vmem:[#allocation2 + $0x146] sm:$0xff] }
 0x1be   : > { %v2445_v14 = vadd.f32 %v2437_v39, %v2413_v20  ;;  %v2501_v30 = vmul.f32 %v6283_v51, %v6425_v17  ;;  %6426 = vst [vmem:[#allocation69_spill] sm:$0xff] %v5417_v62  ;;  %v2493_v33 = vadd.f32 %v2485_v31, %v2429_v12  ;;  %v2517_v36 = vmul.f32 %v6281_v59, %v5250_v11  ;;  %v2549_v34 = vld [vmem:[#allocation2 + $0x89] sm:$0xff] }
 0x1bf   : > { %v1978_v57 = vmul.f32 0.7978846, %v1970_v32  ;;  %v2025_v27 = vadd.f32 %v2017_v16, %v2009_v28  ;;  %v1917_v35 = vadd.f32 %v1909_v41, %v1877_v7  ;;  %v2351_v20 = vadd.f32 %v2343_v56, %v2319_v63  ;;  %v5432_v39 = vld [vmem:[#allocation2 + $0x109] sm:$0xff] }
 0x1c0   : > { %v2477_v47 = vadd.f32 %v2469_v23, %v2445_v14  ;;  %v2533_v60 = vmul.f32 %v5411_v53, %v6285_v54  ;;  %v2525_v4 = vadd.f32 %v2517_v36, %v2493_v33  ;;  %v2581_v21 = vmul.f32 %v4515_v8, %v6341_v26  ;;  %6428 = vst [vmem:[#allocation4_spill] sm:$0xff] %v5432_v39  ;;  %v2645_v16 = vld [vmem:[#allocation2 + $0x8a] sm:$0xff] }
 0x1c1   : > { %3852 = vtanh.f32 %v1978_v57  ;;  %v5427_v32 = vmul.f32 %v5417_v62, %v6374_v5  ;;  %3466 = vmatmul.mubr.f32.gmra.mrb[18].mxu1 %v2025_v27  ;;  %3510 = vmatmul.mubr.f32.gmra.mrb[20].mxu0 %v2025_v27  ;;  %v1986_v12 = vmul.f32 0.5, %v5365_v46  ;;  %v1925_v41 = vadd.f32 %v1917_v35, %v1897_v1  ;;  %v5448_v1 = vld [vmem:[#allocation2 + $0x10f] sm:$0xff] }
 0x1c2   : > { %v2509_v43 = vadd.f32 %v2501_v30, %v2477_v47  ;;  %v2375_v14 = vmul.f32 %v4351_v29, %v6421_v61  ;;  %v2565_v2 = vmul.f32 %v2549_v34, %v6323_v10  ;;  %v2589_v23 = vadd.f32 %v2581_v21, %v2525_v4  ;;  %6429 = vst [vmem:[#allocation51_spill] sm:$0xff] %v5448_v1  ;;  %v5454_v33 = vld [vmem:[#allocation2 + $0xef] sm:$0xff] }
 0x1c3   : > { %6427 = vst [vmem:[#allocation3_spill] sm:$0xff] %v5427_v32  ;;  %v2613_v31 = vmul.f32 %v4551_v49, %v5276_v44  ;;  %v5438_v28 = vadd.f32 %v4929_v40, %v1925_v41  ;;  %v5444_v46 = vmul.f32 %v5397_v55, %v4299_v58  ;;  %v2597_v61 = vmul.f32 %v4535_v50, %v6392_v25  ;;  %v6430_v40 = vld [vmem:[#allocation59_spill] sm:$0xff]  ;;  %v5465_v34 = vld [vmem:[#allocation2 + $0x10a] sm:$0xff] }
 0x1c4   : > { %v2541_v56 = vadd.f32 %v2533_v60, %v2509_v43  ;;  %v5440_v7 = vadd.f32 %v2375_v14, %v2351_v20  ;;  %v2326_v57 = vmul.f32 %v4329_v13, %v5264_v24  ;;  %v2382_v47 = vadd.f32 %v6430_v40, %v5337_v9  ;;  %6431 = vst [vmem:[#allocation5_spill] sm:$0xff] %v5454_v33  ;;  %v6433_v43 = vld [vmem:[#allocation67_spill] sm:$0xff]  ;;  %v6434_v9 = vld [vmem:[#allocation34_spill] sm:$0xff] }
 0x1c5   : > { %v2621_v30 = vadd.f32 %v2613_v31, %v2589_v23  ;;  %v1947_v36 = vmul.f32 0.044715, %v5438_v28  ;;  %v5459_v27 = vmul.f32 %v6323_v10, %v6341_v26  ;;  %v2629_v35 = vmul.f32 %v5432_v39, %v4555_v45  ;;  %6432 = vst [vmem:[#allocation6_spill] sm:$0xff] %v5465_v34  ;;  %v6435_v41 = vld [vmem:[#allocation27_spill] sm:$0xff]  ;;  %v2550_v62 = vld [vmem:[#allocation2 + $0x91] sm:$0xff] }
 0x1c6   : > { %v2573_v63 = vadd.f32 %v2565_v2, %v2541_v56  ;;  %v2677_v20 = vmul.f32 %v4566_v42, %v6399_v6  ;;  %v2334_v4 = vadd.f32 %v2326_v57, %v6433_v43  ;;  %v2390_v21 = vmul.f32 %v6434_v9, %v6273_v52  ;;  %v6436_v6 = vld [vmem:[#allocation43_spill] sm:$0xff] }
 0x1c7   : > { %v2414_v14 = vadd.f32 %v6435_v41, %v2382_v47  ;;  %v1955_v56 = vmul.f32 %v1947_v36, %v5438_v28  ;;  %v2661_v26 = vmul.f32 %v2645_v16, %v4559_v38  ;;  %v2438_v23 = vmul.f32 %v5448_v1, %v4342_v22  ;;  %v6437_v43 = vld [vmem:[#allocation79_spill] sm:$0xff]  ;;  %v6438_v47 = vld [vmem:[#allocation38_spill] sm:$0xff]  ;;  %v5491_v41 = vld [vmem:[#allocation2 + $0xd0] sm:$0xff] }
 0x1c8   : > { %v2605_v60 = vadd.f32 %v2597_v61, %v2573_v63  ;;  %v2685_v2 = vadd.f32 %v2677_v20, %v2621_v30  ;;  %v2693_v61 = vmul.f32 %v6292_v18, %v6436_v6  ;;  %v2398_v63 = vadd.f32 %v2390_v21, %v2334_v4  ;;  %v5485_v30 = vld [vmem:[%s6009_s5 + $0x18] ss:$0 sm:$0xff]  ;;  %v6439_v4 = vld [vmem:[#allocation41_spill] sm:$0xff]  ;;  %6440 = vst [vmem:[#allocation7_spill] sm:$0xff] %v5491_v41  ;;  %v6441_v1 = vld [vmem:[#allocation44_spill] sm:$0xff] }
 0x1c9   : > { %v2422_v57 = vmul.f32 %v5454_v33, %v6274_v15  ;;  %v1963_v40 = vmul.f32 %v1955_v56, %v5438_v28  ;;  %v2709_v9 = vmul.f32 %v6438_v47, %v6437_v43  ;;  %v2725_v16 = vmul.f32 %v5485_v30, %v5465_v34 }
 0x1ca   : > { %v2637_v31 = vadd.f32 %v2629_v35, %v2605_v60  ;;  %v2446_v36 = vadd.f32 %v2438_v23, %v2414_v14  ;;  %v2486_v21 = vmul.f32 %v6278_v19, %v6439_v4  ;;  %v2502_v56 = vmul.f32 %v5491_v41, %v6283_v51  ;;  %v6442_v23 = vld [vmem:[#allocation36_spill] sm:$0xff] }
 0x1cb   : > { %v3853_v35 = vpop.eup %3852  ;;  %v2430_v60 = vadd.f32 %v2422_v57, %v2398_v63  ;;  %v1971_v58 = vadd.f32 %v1963_v40, %v5438_v28  ;;  %v2717_v33 = vadd.f32 %v2709_v9, %v2685_v2  ;;  %v6443_v2 = vld [vmem:[#allocation52_spill] sm:$0xff] }
 0x1cc   : > { %v2669_v20 = vadd.f32 %v2661_v26, %v2637_v31  ;;  %v2002_v32 = vadd.f32 1.0, %v3853_v35  ;;  %v2478_v43 = vadd.f32 %v6441_v1, %v2446_v36  ;;  %v2518_v26 = vmul.f32 %v6281_v59, %v6442_v23  ;;  %v5499_v31 = vld [vmem:[#allocation2 + $0x110] sm:$0xff] }
 0x1cd   : > { %v2494_v14 = vadd.f32 %v2486_v21, %v2430_v60  ;;  %v2534_v63 = vmul.f32 %v5499_v31, %v6285_v54  ;;  %v1979_v4 = vmul.f32 0.7978846, %v1971_v58  ;;  %v2566_v35 = vmul.f32 %v2550_v62, %v6323_v10  ;;  %v6445_v60 = vld [vmem:[#allocation30_spill] sm:$0xff]  ;;  %v3884_v62 = vld [vmem:[#allocation2 + $0xc6] sm:$0xff] }
 0x1ce   : > { %v2701_v34 = vadd.f32 %v2693_v61, %v2669_v20  ;;  %v2010_v57 = vmul.f32 %v2002_v32, %v1986_v12  ;;  %v2510_v41 = vadd.f32 %v2502_v56, %v2478_v43  ;;  %v2582_v1 = vmul.f32 %v4515_v8, %v6443_v2  ;;  %v6444_v61 = vld [vmem:[#allocation32_spill] sm:$0xff]  ;;  %v5511_v58 = vld [vmem:[#allocation2 + $0x111] sm:$0xff] }
 0x1cf   : > { %v2526_v40 = vadd.f32 %v2518_v26, %v2494_v14  ;;  %v2598_v9 = vmul.f32 %v4535_v50, %v6444_v61  ;;  %3854 = vtanh.f32 %v1979_v4  ;;  %v2614_v21 = vmul.f32 %v4551_v49, %v6445_v60  ;;  %6446 = vst [vmem:[#allocation8_spill] sm:$0xff] %v5511_v58  ;;  %v5516_v14 = vld [vmem:[#allocation2 + $0x127] sm:$0xff] }
 0x1d0   : > { %v2733_v29 = vadd.f32 %v2725_v16, %v2701_v34  ;;  %v2026_v36 = vadd.f32 %v5397_v55, %v2010_v57  ;;  %v2542_v20 = vadd.f32 %v2534_v63, %v2510_v41  ;;  %v6447_v34 = vld [vmem:[#allocation22_spill] sm:$0xff]  ;;  %v6448_v16 = vld [vmem:[#allocation71_spill] sm:$0xff]  ;;  %6449 = vst [vmem:[#allocation26_spill] sm:$0xff] %v5516_v14  ;;  %v1987_v55 = vmul.f32 0.5, %v5438_v28  ;;  %v6450_v26 = vld [vmem:[#allocation40_spill] sm:$0xff] }
 0x1d1   : > { %v2590_v12 = vadd.f32 %v2582_v1, %v2526_v40  ;;  %v2295_v43 = vmul.f32 %v3884_v62, %v6447_v34  ;;  %v2327_v56 = vmul.f32 %v6448_v16, %v4329_v13  ;;  %v2678_v63 = vmul.f32 %v4566_v42, %v6450_v26  ;;  %v2646_v40 = vld [vmem:[#allocation2 + $0x92] sm:$0xff] }
 0x1d2   : > { %v2741_v32 = vadd.f32 %v2733_v29, %v2717_v33  ;;  %3468 = vmatprep.mubr.f32.mxu1 %v2026_v36  ;;  %3512 = vmatprep.mubr.f32.mxu0 %v2026_v36  ;;  %v2574_v41 = vadd.f32 %v2566_v35, %v2542_v20  ;;  %v2407_v29 = vmul.f32 %v4368_v0, %v6423_v3  ;;  %v5526_v33 = vld [vmem:[%s6010_s6] ss:$0 sm:$0xff]  ;;  %v5539_v26 = vld [vmem:[#allocation2 + $0x112] sm:$0xff] }
 0x1d3   : > { %v2622_v4 = vadd.f32 %v2614_v21, %v2590_v12  ;;  %v2335_v2 = vadd.f32 %v2327_v56, %v2295_v43  ;;  %v2391_v28 = vmul.f32 %v5375_v48, %v6273_v52  ;;  %v2630_v1 = vmul.f32 %v5511_v58, %v4555_v45  ;;  %6451 = vst [vmem:[#allocation23_spill] sm:$0xff] %v5539_v26  ;;  %v6452_v56 = vld [vmem:[#allocation54_spill] sm:$0xff]  ;;  %v5549_v58 = vld [vmem:[#allocation2 + $0x128] sm:$0xff] }
 0x1d4   : > { %v5529_v57 = vadd.f32 %v5526_v33, %v2741_v32  ;;  %v2606_v35 = vadd.f32 %v2598_v9, %v2574_v41  ;;  %v2415_v36 = vadd.f32 %v2407_v29, %v5440_v7  ;;  %v2439_v20 = vmul.f32 %v5516_v14, %v4342_v22  ;;  %v6453_v29 = vld [vmem:[#allocation47_spill] sm:$0xff]  ;;  %6454 = vst [vmem:[#allocation9_spill] sm:$0xff] %v5549_v58 }
 0x1d5   : > { %v2686_v32 = vadd.f32 %v2678_v63, %v2622_v4  ;;  %v2399_v21 = vadd.f32 %v2391_v28, %v2335_v2  ;;  %v2423_v12 = vmul.f32 %v5390_v37, %v6274_v15  ;;  %v2662_v9 = vmul.f32 %v2646_v40, %v4559_v38 }
 0x1d6   : > { %v2757_v62 = vmul.f32 0.044715, %v5529_v57  ;;  %v2638_v43 = vadd.f32 %v2630_v1, %v2606_v35  ;;  %v2694_v41 = vmul.f32 %v6292_v18, %v6452_v56  ;;  %v2447_v3 = vadd.f32 %v2439_v20, %v2415_v36 }
 0x1d7   : > { %v2710_v14 = vmul.f32 %v6438_v47, %v6453_v29  ;;  %v2431_v48 = vadd.f32 %v2423_v12, %v2399_v21  ;;  %v2487_v63 = vmul.f32 %v6278_v19, %v6425_v17  ;;  %v2726_v2 = vmul.f32 %v5485_v30, %v5539_v26 }
 0x1d8   : > { %v2765_v7 = vmul.f32 %v2757_v62, %v5529_v57  ;;  %v2670_v4 = vadd.f32 %v2662_v9, %v2638_v43  ;;  %v2479_v40 = vadd.f32 %v5444_v46, %v2447_v3  ;;  %v2503_v28 = vmul.f32 %v6283_v51, %v5250_v11  ;;  %v5561_v62 = vld [vmem:[#allocation2 + $0x129] sm:$0xff] }
 0x1d9   : > { %v2718_v1 = vadd.f32 %v2710_v14, %v2686_v32  ;;  %v2495_v36 = vadd.f32 %v2487_v63, %v2431_v48  ;;  %v2519_v20 = vmul.f32 %v5411_v53, %v6281_v59  ;;  %6455 = vst [vmem:[#allocation37_spill] sm:$0xff] %v5561_v62  ;;  %v3855_v21 = vpop.eup %3854  ;;  %v2535_v43 = vmul.f32 %v5549_v58, %v6285_v54  ;;  %v5570_v14 = vld [vmem:[#allocation2 + $0x12e] sm:$0xff] }
 0x1da   : > { %v2773_v35 = vmul.f32 %v2765_v7, %v5529_v57  ;;  %v2702_v17 = vadd.f32 %v2694_v41, %v2670_v4  ;;  %v2511_v12 = vadd.f32 %v2503_v28, %v2479_v40  ;;  %v2583_v3 = vmul.f32 %v4515_v8, %v6392_v25 }
 0x1db   : > { %v2003_v46 = vadd.f32 1.0, %v3855_v21  ;;  %v2527_v7 = vadd.f32 %v2519_v20, %v2495_v36  ;;  %v2599_v48 = vmul.f32 %v4535_v50, %v5276_v44  ;;  %v2615_v41 = vmul.f32 %v5432_v39, %v4551_v49  ;;  %v3886_v21 = vld [vmem:[#allocation2 + $0xce] sm:$0xff] }
 0x1dc   : > { %v2781_v9 = vadd.f32 %v2773_v35, %v5529_v57  ;;  %v2734_v32 = vadd.f32 %v2726_v2, %v2702_v17  ;;  %v2543_v63 = vadd.f32 %v2535_v43, %v2511_v12  ;;  %v2631_v4 = vmul.f32 %v5561_v62, %v4555_v45  ;;  %v6456_v44 = vld [vmem:[#allocation20_spill] sm:$0xff]  ;;  %v6457_v2 = vld [vmem:[#allocation53_spill] sm:$0xff] }
 0x1dd   : > { %v2011_v40 = vmul.f32 %v2003_v46, %v1987_v55  ;;  %v2591_v25 = vadd.f32 %v2583_v3, %v2527_v7  ;;  %v2296_v35 = vmul.f32 %v3886_v21, %v6447_v34  ;;  %v2312_v53 = vmul.f32 %v6456_v44, %v5264_v24  ;;  %v3887_v12 = vld [vmem:[#allocation2 + $0xb0] sm:$0xff] }
 0x1de   : > { %v2789_v28 = vmul.f32 0.7978846, %v2781_v9  ;;  %v2742_v36 = vadd.f32 %v2734_v32, %v2718_v1  ;;  %v2575_v20 = vadd.f32 %v5459_v27, %v2543_v63  ;;  %v2328_v17 = vmul.f32 %v6457_v2, %v4329_v13  ;;  %v6458_v1 = vld [vmem:[#allocation66_spill] sm:$0xff]  ;;  %v3888_v7 = vld [vmem:[#allocation2 + $0xaa] sm:$0xff] }
 0x1df   : > { %v2027_v43 = vadd.f32 %v3887_v12, %v2011_v40  ;;  %v2623_v39 = vadd.f32 %v2615_v41, %v2591_v25  ;;  %v2344_v55 = vmul.f32 %v5570_v14, %v6374_v5  ;;  %v2320_v9 = vadd.f32 %v2312_v53, %v6458_v1  ;;  %v6459_v41 = vld [vmem:[#allocation45_spill] sm:$0xff] }
 0x1e0   : > { %3856 = vtanh.f32 %v2789_v28  ;;  %v5585_v3 = vadd.f32 %v5526_v33, %v2742_v36  ;;  %v2607_v46 = vadd.f32 %v2599_v48, %v2575_v20  ;;  %v2336_v27 = vadd.f32 %v2328_v17, %v2296_v35  ;;  %v5594_v21 = vld [vmem:[#allocation2 + $0x12a] sm:$0xff]  ;;  %v6462_v17 = vld [vmem:[#allocation79_spill] sm:$0xff] }
 0x1e1   : > { %3469 = vmatmul.mubr.f32.gmra.mrb[20].mxu1 %v2027_v43  ;;  %3513 = vmatmul.mubr.f32.gmra.mrb[22].mxu0 %v2027_v43  ;;  %v2663_v32 = vmul.f32 %v3888_v7, %v4559_v38  ;;  %v2679_v63 = vmul.f32 %v4566_v42, %v6436_v6  ;;  %v2392_v40 = vmul.f32 %v6459_v41, %v6273_v52  ;;  %v3889_v36 = vld [vmem:[#allocation2 + $0xaf] sm:$0xff]  ;;  %v6464_v6 = vld [vmem:[#allocation51_spill] sm:$0xff] }
 0x1e2   : > { %v2758_v28 = vmul.f32 0.044715, %v5585_v3  ;;  %v2639_v25 = vadd.f32 %v2631_v4, %v2607_v46  ;;  %6460 = vst [vmem:[#allocation10_spill] sm:$0xff] %v5594_v21  ;;  %v2352_v48 = vadd.f32 %v2344_v55, %v2320_v9  ;;  %v6461_v53 = vld [vmem:[#allocation25_spill] sm:$0xff]  ;;  %v2695_v43 = vmul.f32 %v6292_v18, %v6462_v17 }
 0x1e3   : > { %v2376_v35 = vmul.f32 %v3889_v36, %v6461_v53  ;;  %v2687_v20 = vadd.f32 %v2679_v63, %v2623_v39  ;;  %v5599_v1 = vld [vmem:[#allocation2 + $0x12f] sm:$0xff]  ;;  %v2400_v7 = vadd.f32 %v2392_v40, %v2336_v27  ;;  %v2424_v62 = vmul.f32 %v6464_v6, %v6274_v15  ;;  %v6467_v39 = vld [vmem:[#allocation6_spill] sm:$0xff]  ;;  %v6468_v27 = vld [vmem:[#allocation7_spill] sm:$0xff] }
 0x1e4   : > { %6463 = vst [vmem:[#allocation50_spill] sm:$0xff] %v5599_v1  ;;  %v5603_v41 = vld [vmem:[#allocation2 + $0x14e] sm:$0xff]  ;;  %v2766_v4 = vmul.f32 %v2758_v28, %v5585_v3  ;;  %v2671_v46 = vadd.f32 %v2663_v32, %v2639_v25  ;;  %v2711_v63 = vmul.f32 %v6467_v39, %v6438_v47  ;;  %v2727_v36 = vmul.f32 %v5485_v30, %v5594_v21 }
 0x1e5   : > { %6465 = vst [vmem:[#allocation68_spill] sm:$0xff] %v5603_v41  ;;  %v2384_v2 = vadd.f32 %v2376_v35, %v2352_v48  ;;  %v6466_v55 = vld [vmem:[#allocation5_spill] sm:$0xff]  ;;  %v2432_v17 = vadd.f32 %v2424_v62, %v2400_v7  ;;  %v2488_v40 = vmul.f32 %v6468_v27, %v6278_v19  ;;  %v2440_v32 = vmul.f32 %v5599_v1, %v4342_v22  ;;  %v2275_v62 = vld [vmem:[#allocation2 + $0x166] sm:$0xff] }
 0x1e6   : > { %v2408_v9 = vmul.f32 %v6466_v55, %v4368_v0  ;;  %v2774_v6 = vmul.f32 %v2766_v4, %v5585_v3  ;;  %v2703_v24 = vadd.f32 %v2695_v43, %v2671_v46  ;;  %v5619_v28 = vmul.f32 %v5603_v41, %v6374_v5  ;;  %v5624_v4 = vld [vmem:[#allocation2 + $0x130] sm:$0xff] }
 0x1e7   : > { %v2719_v25 = vadd.f32 %v2711_v63, %v2687_v20  ;;  %v2496_v48 = vadd.f32 %v2488_v40, %v2432_v17  ;;  %v2520_v35 = vmul.f32 %v5499_v31, %v6281_v59  ;;  %v2797_v20 = vmul.f32 0.5, %v5529_v57  ;;  %v2276_v40 = vld [vmem:[#allocation2 + $0x16e] sm:$0xff] }
 0x1e8   : > { %v2416_v26 = vadd.f32 %v2408_v9, %v2384_v2  ;;  %v2782_v7 = vadd.f32 %v2774_v6, %v5585_v3  ;;  %v2735_v21 = vadd.f32 %v2727_v36, %v2703_v24  ;;  %v6469_v2 = vld [vmem:[#allocation21_spill] sm:$0xff]  ;;  %v6470_v9 = vld [vmem:[#allocation55_spill] sm:$0xff]  ;;  %v2504_v17 = vmul.f32 %v6283_v51, %v6442_v23 }
 0x1e9   : > { %v2472_v43 = vmul.f32 %v3887_v12, %v6469_v2  ;;  %v5629_v39 = vmul.f32 %v6470_v9, %v6456_v44  ;;  %v2528_v63 = vadd.f32 %v2520_v35, %v2496_v48  ;;  %v5636_v36 = vmul.f32 %v5570_v14, %v6456_v44  ;;  %v3890_v35 = vld [vmem:[#allocation2 + $0xb1] sm:$0xff] }
 0x1ea   : > { %v2448_v27 = vadd.f32 %v2440_v32, %v2416_v26  ;;  %v3857_v46 = vpop.eup %3856  ;;  %v2790_v6 = vmul.f32 0.7978846, %v2782_v7  ;;  %v2743_v24 = vadd.f32 %v2735_v21, %v2719_v25  ;;  %v5639_v12 = vmul.f32 %v2275_v62, %v6374_v5  ;;  %v5651_v25 = vld [vmem:[#allocation2 + $0x131] sm:$0xff] }
 0x1eb   : > { %6471 = vst [vmem:[#allocation60_spill] sm:$0xff] %v5629_v39  ;;  %v2813_v41 = vadd.f32 1.0, %v3857_v46  ;;  %6472 = vst [vmem:[#allocation24_spill] sm:$0xff] %v5636_v36  ;;  %v2536_v32 = vmul.f32 %v5624_v4, %v6285_v54  ;;  %v2584_v57 = vmul.f32 %v4515_v8, %v6444_v61  ;;  %v2568_v62 = vmul.f32 %v3890_v35, %v6323_v10 }
 0x1ec   : > { %v2480_v26 = vadd.f32 %v2472_v43, %v2448_v27  ;;  %6473 = vst [vmem:[#allocation11_spill] sm:$0xff] %v5639_v12  ;;  %3858 = vtanh.f32 %v2790_v6  ;;  %v5646_v48 = vadd.f32 %v5526_v33, %v2743_v24  ;;  %v5649_v27 = vmul.f32 %v2276_v40, %v6374_v5  ;;  %6475 = vst [vmem:[#allocation12_spill] sm:$0xff] %v5651_v25  ;;  %v6476_v5 = vld [vmem:[#allocation8_spill] sm:$0xff]  ;;  %v6477_v6 = vld [vmem:[#allocation31_spill] sm:$0xff] }
 0x1ed   : > { %v2821_v39 = vmul.f32 %v2813_v41, %v2797_v20  ;;  %v2600_v7 = vmul.f32 %v4535_v50, %v6445_v60  ;;  %v2313_v61 = vmul.f32 %v6448_v16, %v6456_v44  ;;  %v3891_v41 = vld [vmem:[#allocation2 + $0xc8] sm:$0xff]  ;;  %v2616_v40 = vmul.f32 %v6476_v5, %v4551_v49  ;;  %v6480_v5 = vld [vmem:[#allocation46_spill] sm:$0xff] }
 0x1ee   : > { %v2512_v21 = vadd.f32 %v2504_v17, %v2480_v26  ;;  %6474 = vst [vmem:[#allocation77_spill] sm:$0xff] %v5649_v27  ;;  %v2759_v46 = vmul.f32 0.044715, %v5646_v48  ;;  %v2592_v17 = vadd.f32 %v2584_v57, %v2528_v63  ;;  %v2297_v24 = vmul.f32 %v6477_v6, %v6447_v34  ;;  %v6478_v26 = vld [vmem:[#allocation29_spill] sm:$0xff]  ;;  %v6479_v57 = vld [vmem:[#allocation3_spill] sm:$0xff] }
 0x1ef   : > { %v2838_v43 = vadd.f32 %v3891_v41, %v2821_v39  ;;  %v2321_v35 = vadd.f32 %v2313_v61, %v6478_v26  ;;  %v2329_v27 = vmul.f32 %v6470_v9, %v4329_v13  ;;  %v2798_v36 = vmul.f32 0.5, %v5585_v3  ;;  %v6481_v61 = vld [vmem:[#allocation61_spill] sm:$0xff] }
 0x1f0   : > { %v2544_v20 = vadd.f32 %v2536_v32, %v2512_v21  ;;  %v2767_v39 = vmul.f32 %v2759_v46, %v5646_v48  ;;  %v2632_v63 = vmul.f32 %v5651_v25, %v4555_v45  ;;  %v2377_v16 = vmul.f32 %v6480_v5, %v6461_v53  ;;  %v3892_v3 = vld [vmem:[#allocation2 + $0xb2] sm:$0xff] }
 0x1f1   : > { %3547 = vmatprep.mubr.f32.mxu1 %v2838_v43  ;;  %3591 = vmatprep.mubr.f32.mxu0 %v2838_v43  ;;  %v2337_v32 = vadd.f32 %v2329_v27, %v2297_v24  ;;  %v2353_v21 = vadd.f32 %v6479_v57, %v2321_v35  ;;  %v2393_v26 = vmul.f32 %v6273_v52, %v6481_v61  ;;  %v6482_v24 = vld [vmem:[#allocation26_spill] sm:$0xff] }
 0x1f2   : > { %v2576_v12 = vadd.f32 %v2568_v62, %v2544_v20  ;;  %v2775_v9 = vmul.f32 %v2767_v39, %v5646_v48  ;;  %v2624_v60 = vadd.f32 %v2616_v40, %v2592_v17  ;;  %v2664_v46 = vmul.f32 %v3892_v3, %v4559_v38  ;;  %v5677_v62 = vld [vmem:[#allocation2 + $0x147] sm:$0xff]  ;;  %v5688_v17 = vld [vmem:[#allocation2 + $0x132] sm:$0xff] }
 0x1f3   : > { %v2385_v20 = vadd.f32 %v2377_v16, %v2353_v21  ;;  %v2401_v25 = vadd.f32 %v2393_v26, %v2337_v32  ;;  %v2409_v27 = vmul.f32 %v5390_v37, %v4368_v0  ;;  %v2425_v5 = vmul.f32 %v6482_v24, %v6274_v15  ;;  %6483 = vst [vmem:[#allocation13_spill] sm:$0xff] %v5688_v17  ;;  %v5695_v3 = vld [vmem:[#allocation2 + $0x148] sm:$0xff] }
 0x1f4   : > { %v2608_v43 = vadd.f32 %v2600_v7, %v2576_v12  ;;  %v2783_v35 = vadd.f32 %v2775_v9, %v5646_v48  ;;  %v2680_v12 = vmul.f32 %v4566_v42, %v6452_v56  ;;  %v2696_v7 = vmul.f32 %v6292_v18, %v6453_v29 }
 0x1f5   : > { %v2417_v40 = vadd.f32 %v2409_v27, %v2385_v20  ;;  %v2433_v16 = vadd.f32 %v2425_v5, %v2401_v25  ;;  %v2441_v39 = vmul.f32 %v5677_v62, %v4342_v22  ;;  %v2489_v32 = vmul.f32 %v6278_v19, %v5250_v11  ;;  %v6484_v27 = vld [vmem:[#allocation23_spill] sm:$0xff] }
 0x1f6   : > { %v2640_v57 = vadd.f32 %v2632_v63, %v2608_v43  ;;  %v3859_v21 = vpop.eup %3858  ;;  %v2791_v61 = vmul.f32 0.7978846, %v2783_v35  ;;  %v2688_v63 = vadd.f32 %v2680_v12, %v2624_v60  ;;  %v2473_v9 = vmul.f32 %v3891_v41, %v6469_v2  ;;  %v6485_v41 = vld [vmem:[#allocation58_spill] sm:$0xff] }
 0x1f7   : > { %v2814_v56 = vadd.f32 1.0, %v3859_v21  ;;  %v2449_v43 = vadd.f32 %v2441_v39, %v2417_v40  ;;  %v2497_v29 = vadd.f32 %v2489_v32, %v2433_v16  ;;  %v2521_v25 = vmul.f32 %v5549_v58, %v6281_v59  ;;  %v6486_v40 = vld [vmem:[#allocation19_spill] sm:$0xff]  ;;  %v3893_v21 = vld [vmem:[#allocation2 + $0xd0] sm:$0xff] }
 0x1f8   : > { %v2672_v26 = vadd.f32 %v2664_v46, %v2640_v57  ;;  %3860 = vtanh.f32 %v2791_v61  ;;  %v2712_v5 = vmul.f32 %v6484_v27, %v6438_v47  ;;  %v2728_v35 = vmul.f32 %v5485_v30, %v5688_v17  ;;  %v3894_v58 = vld [vmem:[#allocation2 + $0xc9] sm:$0xff] }
 0x1f9   : > { %v2822_v46 = vmul.f32 %v2814_v56, %v2798_v36  ;;  %v2481_v60 = vadd.f32 %v2473_v9, %v2449_v43  ;;  %v2505_v57 = vmul.f32 %v6485_v41, %v6283_v51  ;;  %v2529_v12 = vadd.f32 %v2521_v25, %v2497_v29  ;;  %v6487_v9 = vld [vmem:[#allocation65_spill] sm:$0xff]  ;;  %v6489_v25 = vld [vmem:[#allocation64_spill] sm:$0xff] }
 0x1fa   : > { %v2704_v20 = vadd.f32 %v2696_v7, %v2672_v26  ;;  %v5707_v16 = vmul.f32 %v6477_v6, %v6486_v40  ;;  %v2720_v39 = vadd.f32 %v2712_v5, %v2688_v63  ;;  %v2537_v7 = vmul.f32 %v5695_v3, %v6285_v54  ;;  %v5714_v29 = vld [vmem:[#allocation2 + $0x149] sm:$0xff] }
 0x1fb   : > { %v2839_v61 = vadd.f32 %v3893_v21, %v2822_v46  ;;  %v2513_v26 = vadd.f32 %v2505_v57, %v2481_v60  ;;  %v2569_v36 = vmul.f32 %v3894_v58, %v6323_v10  ;;  %v2585_v56 = vmul.f32 %v4515_v8, %v6487_v9  ;;  %6488 = vst [vmem:[#allocation14_spill] sm:$0xff] %v5714_v29  ;;  %v6490_v63 = vld [vmem:[#allocation53_spill] sm:$0xff]  ;;  %v6491_v60 = vld [vmem:[#allocation4_spill] sm:$0xff] }
 0x1fc   : > { %v2736_v32 = vadd.f32 %v2728_v35, %v2704_v20  ;;  %v2298_v6 = vmul.f32 %v6447_v34, %v6489_v25  ;;  %v2314_v20 = vmul.f32 %v6490_v63, %v6456_v44  ;;  %v2330_v5 = vmul.f32 %v5570_v14, %v4329_v13  ;;  %v6493_v14 = vld [vmem:[#allocation37_spill] sm:$0xff] }
 0x1fd   : > { %3548 = vmatmul.mubr.f32.vlgmr.msra.gmra.mrb[22].mxu1 %v2839_v61  ;;  %3592 = vmatmul.mubr.f32.vlgmr.msra.gmra.mrb[24].mxu0 %v2839_v61  ;;  %v2799_v35 = vmul.f32 0.5, %v5646_v48  ;;  %v2545_v58 = vadd.f32 %v2537_v7, %v2513_v26  ;;  %v2593_v46 = vadd.f32 %v2585_v56, %v2529_v12  ;;  %v2601_v57 = vmul.f32 %v6491_v60, %v4535_v50  ;;  %v6494_v12 = vld [vmem:[#allocation45_spill] sm:$0xff] }
 0x1fe   : > { %v2744_v43 = vadd.f32 %v2736_v32, %v2720_v39  ;;  %v6492_v32 = vld [vmem:[#allocation28_spill] sm:$0xff]  ;;  %v2338_v9 = vadd.f32 %v2330_v5, %v2298_v6  ;;  %v2394_v44 = vmul.f32 %v6466_v55, %v6273_v52  ;;  %v2617_v63 = vmul.f32 %v6493_v14, %v4551_v49 }
 0x1ff   : > { %v2322_v21 = vadd.f32 %v2314_v20, %v6492_v32  ;;  %v2577_v25 = vadd.f32 %v2569_v36, %v2545_v58  ;;  %v2633_v48 = vmul.f32 %v5714_v29, %v4555_v45  ;;  %v2378_v7 = vmul.f32 %v6494_v12, %v6461_v53  ;;  %v5736_v56 = vld [vmem:[#allocation2 + $0x14f] sm:$0xff]  ;;  %v6496_v32 = vld [vmem:[#allocation51_spill] sm:$0xff] }
 0x200   : > { %v2752_v39 = vadd.f32 %v5526_v33, %v2744_v43  ;;  %6495 = vst [vmem:[#allocation15_spill] sm:$0xff] %v5736_v56  ;;  %v2402_v43 = vadd.f32 %v2394_v44, %v2338_v9  ;;  %v2426_v6 = vmul.f32 %v5599_v1, %v6274_v15  ;;  %v2625_v36 = vadd.f32 %v2617_v63, %v2593_v46  ;;  %v3895_v5 = vld [vmem:[#allocation2 + $0xca] sm:$0xff]  ;;  %v6497_v44 = vld [vmem:[#allocation79_spill] sm:$0xff] }
 0x201   : > { %v2354_v26 = vadd.f32 %v5619_v28, %v2322_v21  ;;  %v2609_v20 = vadd.f32 %v2601_v57, %v2577_v25  ;;  %v2665_v58 = vmul.f32 %v3895_v5, %v4559_v38  ;;  %v2410_v55 = vmul.f32 %v6496_v32, %v4368_v0  ;;  %v5749_v25 = vld [vmem:[#allocation2 + $0x14a] sm:$0xff] }
 0x202   : > { %v2760_v61 = vmul.f32 0.044715, %v2752_v39  ;;  %v3861_v29 = vpop.eup %3860  ;;  %v2434_v40 = vadd.f32 %v2426_v6, %v2402_v43  ;;  %v2490_v28 = vmul.f32 %v6278_v19, %v6442_v23  ;;  %v2681_v1 = vmul.f32 %v4566_v42, %v6497_v44  ;;  %v6499_v44 = vld [vmem:[#allocation7_spill] sm:$0xff] }
 0x203   : > { %v2386_v12 = vadd.f32 %v2378_v7, %v2354_v26  ;;  %v2815_v21 = vadd.f32 1.0, %v3861_v29  ;;  %v2641_v9 = vadd.f32 %v2633_v48, %v2609_v20  ;;  %v2442_v46 = vmul.f32 %v5736_v56, %v4342_v22  ;;  %v6498_v29 = vld [vmem:[#allocation6_spill] sm:$0xff] }
 0x204   : > { %v2768_v14 = vmul.f32 %v2760_v61, %v2752_v39  ;;  %v2498_v5 = vadd.f32 %v2490_v28, %v2434_v40  ;;  %v2522_v7 = vmul.f32 %v5624_v4, %v6281_v59  ;;  %v2689_v43 = vadd.f32 %v2681_v1, %v2625_v36  ;;  %v6501_v28 = vld [vmem:[#allocation30_spill] sm:$0xff] }
 0x205   : > { %v2418_v63 = vadd.f32 %v2410_v55, %v2386_v12  ;;  %v2823_v61 = vmul.f32 %v2815_v21, %v2799_v35  ;;  %v2673_v26 = vadd.f32 %v2665_v58, %v2641_v9  ;;  %v2697_v48 = vmul.f32 %v6498_v29, %v6292_v18  ;;  %v6500_v55 = vld [vmem:[#allocation10_spill] sm:$0xff]  ;;  %v5762_v58 = vld [vmem:[#allocation2 + $0x150] sm:$0xff]  ;;  %v3896_v9 = vld [vmem:[#allocation2 + $0xe7] sm:$0xff] }
 0x206   : > { %v2776_v57 = vmul.f32 %v2768_v14, %v2752_v39  ;;  %v2474_v32 = vmul.f32 %v6499_v44, %v6469_v2  ;;  %v2530_v56 = vadd.f32 %v2522_v7, %v2498_v5  ;;  %v2713_v40 = vmul.f32 %v6500_v55, %v6438_v47 }
 0x207   : > { %v2450_v20 = vadd.f32 %v2442_v46, %v2418_v63  ;;  %v2840_v14 = vadd.f32 %v2823_v61, %v5250_v11  ;;  %v2705_v23 = vadd.f32 %v2697_v48, %v2673_v26  ;;  %v2729_v35 = vmul.f32 %v5485_v30, %v5749_v25  ;;  %v5773_v26 = vld [vmem:[#allocation2 + $0x151] sm:$0xff]  ;;  %v6502_v48 = vld [vmem:[#allocation71_spill] sm:$0xff] }
 0x208   : > { %v2784_v6 = vadd.f32 %v2776_v57, %v2752_v39  ;;  %v2506_v12 = vmul.f32 %v5499_v31, %v6283_v51  ;;  %v2586_v21 = vmul.f32 %v4515_v8, %v6501_v28  ;;  %v2379_v11 = vmul.f32 %v3896_v9, %v6461_v53 }
 0x209   : > { %v2482_v36 = vadd.f32 %v2474_v32, %v2450_v20  ;;  %3550 = vmatprep.mubr.f32.mxu1 %v2840_v14  ;;  %3594 = vmatprep.mubr.f32.mxu0 %v2840_v14  ;;  %v5769_v46 = vmul.f32 0.5, %v2752_v39  ;;  %v2721_v57 = vadd.f32 %v2713_v40, %v2689_v43  ;;  %v2737_v63 = vadd.f32 %v2729_v35, %v2705_v23  ;;  %v6503_v20 = vld [vmem:[#allocation60_spill] sm:$0xff]  ;;  %v6504_v39 = vld [vmem:[#allocation69_spill] sm:$0xff] }
 0x20a   : > { %v2792_v1 = vmul.f32 0.7978846, %v2784_v6  ;;  %v2538_v32 = vmul.f32 %v5762_v58, %v6285_v54  ;;  %v2594_v7 = vadd.f32 %v2586_v21, %v2530_v56  ;;  %v2299_v6 = vmul.f32 %v6502_v48, %v6447_v34  ;;  %v3897_v23 = vld [vmem:[#allocation2 + $0xd1] sm:$0xff]  ;;  %v6505_v35 = vld [vmem:[#allocation8_spill] sm:$0xff]  ;;  %v6507_v21 = vld [vmem:[#allocation11_spill] sm:$0xff] }
 0x20b   : > { %v2514_v5 = vadd.f32 %v2506_v12, %v2482_v36  ;;  %v2745_v61 = vadd.f32 %v2737_v63, %v2721_v57  ;;  %v2323_v44 = vadd.f32 %v6503_v20, %v5707_v16  ;;  %v2331_v14 = vmul.f32 %v6504_v39, %v4329_v13  ;;  %v6506_v56 = vld [vmem:[#allocation12_spill] sm:$0xff] }
 0x20c   : > { %3862 = vtanh.f32 %v2792_v1  ;;  %v2570_v40 = vmul.f32 %v3897_v23, %v6323_v10  ;;  %v2602_v1 = vmul.f32 %v6505_v35, %v4535_v50  ;;  %v2618_v36 = vmul.f32 %v6506_v56, %v4551_v49  ;;  %v2371_v16 = vld [vmem:[#allocation2 + $0x167] sm:$0xff] }
 0x20d   : > { %v2546_v43 = vadd.f32 %v2538_v32, %v2514_v5  ;;  %v5787_v12 = vadd.f32 %v5526_v33, %v2745_v61  ;;  %v2339_v28 = vadd.f32 %v2331_v14, %v2299_v6  ;;  %v2355_v9 = vadd.f32 %v6507_v21, %v2323_v44  ;;  %v3898_v14 = vld [vmem:[#allocation2 + $0xd2] sm:$0xff] }
 0x20e   : > { %v2395_v57 = vmul.f32 %v5390_v37, %v6273_v52  ;;  %v2626_v5 = vadd.f32 %v2618_v36, %v2594_v7  ;;  %v2634_v32 = vmul.f32 %v5773_v26, %v4555_v45  ;;  %v2411_v48 = vmul.f32 %v6482_v24, %v4368_v0  ;;  %v6508_v37 = vld [vmem:[#allocation47_spill] sm:$0xff]  ;;  %v5804_v36 = vld [vmem:[#allocation2 + $0x152] sm:$0xff] }
 0x20f   : > { %v2578_v63 = vadd.f32 %v2570_v40, %v2546_v43  ;;  %v2761_v20 = vmul.f32 0.044715, %v5787_v12  ;;  %v2387_v39 = vadd.f32 %v2379_v11, %v2355_v9  ;;  %v2427_v6 = vmul.f32 %v5677_v62, %v6274_v15  ;;  %6509 = vst [vmem:[#allocation16_spill] sm:$0xff] %v5804_v36  ;;  %v3899_v9 = vld [vmem:[#allocation2 + $0xe8] sm:$0xff] }
 0x210   : > { %v2403_v61 = vadd.f32 %v2395_v57, %v2339_v28  ;;  %v2666_v23 = vmul.f32 %v3898_v14, %v4559_v38  ;;  %v2682_v7 = vmul.f32 %v4566_v42, %v6508_v37  ;;  %v2443_v43 = vmul.f32 %v2371_v16, %v4342_v22  ;;  %v2467_v14 = vld [vmem:[#allocation2 + $0x168] sm:$0xff] }
 0x211   : > { %v2610_v44 = vadd.f32 %v2602_v1, %v2578_v63  ;;  %v2769_v40 = vmul.f32 %v2761_v20, %v5787_v12  ;;  %v2419_v24 = vadd.f32 %v2411_v48, %v2387_v39  ;;  %v2491_v11 = vmul.f32 %v6485_v41, %v6278_v19 }
 0x212   : > { %v2435_v21 = vadd.f32 %v2427_v6, %v2403_v61  ;;  %v2690_v62 = vadd.f32 %v2682_v7, %v2626_v5  ;;  %v2698_v1 = vmul.f32 %v6484_v27, %v6292_v18  ;;  %v2475_v57 = vmul.f32 %v3899_v9, %v6469_v2  ;;  %v6510_v6 = vld [vmem:[#allocation9_spill] sm:$0xff]  ;;  %v6511_v27 = vld [vmem:[#allocation19_spill] sm:$0xff] }
 0x213   : > { %v2642_v28 = vadd.f32 %v2634_v32, %v2610_v44  ;;  %v2777_v63 = vmul.f32 %v2769_v40, %v5787_v12  ;;  %v2451_v16 = vadd.f32 %v2443_v43, %v2419_v24  ;;  %v2523_v48 = vmul.f32 %v5695_v3, %v6281_v59 }
 0x214   : > { %v2499_v20 = vadd.f32 %v2491_v11, %v2435_v21  ;;  %v2714_v32 = vmul.f32 %v5688_v17, %v6438_v47  ;;  %v2730_v5 = vmul.f32 %v5485_v30, %v5804_v36  ;;  %v2507_v44 = vmul.f32 %v6510_v6, %v6283_v51  ;;  %v3900_v11 = vld [vmem:[#allocation2 + $0xe9] sm:$0xff] }
 0x215   : > { %v2674_v61 = vadd.f32 %v2666_v23, %v2642_v28  ;;  %v2785_v7 = vadd.f32 %v2777_v63, %v5787_v12  ;;  %v2483_v43 = vadd.f32 %v2475_v57, %v2451_v16  ;;  %v2539_v3 = vmul.f32 %v2467_v14, %v6285_v54  ;;  %v3902_v57 = vld [vmem:[#allocation2 + $0x10e] sm:$0xff] }
 0x216   : > { %v3863_v39 = vpop.eup %3862  ;;  %v2531_v40 = vadd.f32 %v2523_v48, %v2499_v20  ;;  %v2722_v21 = vadd.f32 %v2714_v32, %v2690_v62  ;;  %v2571_v23 = vmul.f32 %v3900_v11, %v6323_v10  ;;  %v2587_v36 = vmul.f32 %v6491_v60, %v4515_v8  ;;  %v6512_v62 = vld [vmem:[#allocation68_spill] sm:$0xff] }
 0x217   : > { %v2816_v37 = vadd.f32 1.0, %v3863_v39  ;;  %v2706_v24 = vadd.f32 %v2698_v1, %v2674_v61  ;;  %v2793_v9 = vmul.f32 0.7978846, %v2785_v7  ;;  %v2515_v17 = vadd.f32 %v2507_v44, %v2483_v43  ;;  %v3901_v39 = vld [vmem:[#allocation2 + $0xee] sm:$0xff] }
 0x218   : > { %v2284_v63 = vmul.f32 %v3901_v39, %v6511_v27  ;;  %v2300_v1 = vmul.f32 %v3902_v57, %v6447_v34  ;;  %v2332_v16 = vmul.f32 %v6512_v62, %v4329_v13  ;;  %v6513_v14 = vld [vmem:[#allocation36_spill] sm:$0xff]  ;;  %v2595_v61 = vadd.f32 %v2587_v36, %v2531_v40  ;;  %v6514_v44 = vld [vmem:[#allocation37_spill] sm:$0xff]  ;;  %v6516_v34 = vld [vmem:[#allocation14_spill] sm:$0xff] }
 0x219   : > { %v2824_v28 = vmul.f32 %v2816_v37, %v5769_v46  ;;  %v2738_v6 = vadd.f32 %v2730_v5, %v2706_v24  ;;  %3864 = vtanh.f32 %v2793_v9  ;;  %v2547_v48 = vadd.f32 %v2539_v3, %v2515_v17  ;;  %v2563_v46 = vld [vmem:[#allocation2 + $0x169] sm:$0xff]  ;;  %v6517_v13 = vld [vmem:[#allocation51_spill] sm:$0xff] }
 0x21a   : > { %v2603_v60 = vmul.f32 %v6514_v44, %v4535_v50  ;;  %v6515_v5 = vld [vmem:[#allocation24_spill] sm:$0xff]  ;;  %v2340_v7 = vadd.f32 %v2332_v16, %v2300_v1  ;;  %v2619_v43 = vmul.f32 %v6516_v34, %v4551_v49  ;;  %v2396_v24 = vmul.f32 %v6517_v13, %v6273_v52  ;;  %v6520_v39 = vld [vmem:[#allocation15_spill] sm:$0xff]  ;;  %v6521_v16 = vld [vmem:[#allocation50_spill] sm:$0xff] }
 0x21b   : > { %v2841_v20 = vadd.f32 %v2824_v28, %v6513_v14  ;;  %v2746_v32 = vadd.f32 %v2738_v6, %v2722_v21  ;;  %v2324_v37 = vadd.f32 %v6515_v5, %v2284_v63  ;;  %v2579_v27 = vadd.f32 %v2571_v23, %v2547_v48  ;;  %v6518_v6 = vld [vmem:[#allocation77_spill] sm:$0xff] }
 0x21c   : > { %v2635_v36 = vmul.f32 %v2563_v46, %v4555_v45  ;;  %v6519_v21 = vld [vmem:[#allocation5_spill] sm:$0xff]  ;;  %v2627_v28 = vadd.f32 %v2619_v43, %v2595_v61  ;;  %v2404_v23 = vadd.f32 %v2396_v24, %v2340_v7  ;;  %v2428_v63 = vmul.f32 %v6520_v39, %v6274_v15 }
 0x21d   : > { %3551 = vmatmul.mubr.f32.gmra.mrb[24].mxu1 %v2841_v20  ;;  %3595 = vmatmul.mubr.f32.gmra.mrb[26].mxu0 %v2841_v20  ;;  %v5839_v17 = vadd.f32 %v5526_v33, %v2746_v32  ;;  %v2356_v40 = vadd.f32 %v6518_v6, %v2324_v37  ;;  %v2380_v3 = vmul.f32 %v6519_v21, %v6461_v53  ;;  %v2372_v9 = vld [vmem:[#allocation2 + $0x16f] sm:$0xff]  ;;  %v2801_v61 = vmul.f32 0.5, %v5787_v12 }
 0x21e   : > { %v2611_v11 = vadd.f32 %v2603_v60, %v2579_v27  ;;  %v3903_v52 = vld [vmem:[#allocation2 + $0xea] sm:$0xff]  ;;  %v2412_v14 = vmul.f32 %v6521_v16, %v4368_v0  ;;  %v2683_v53 = vmul.f32 %v6498_v29, %v4566_v42  ;;  %v2436_v48 = vadd.f32 %v2428_v63, %v2404_v23 }
 0x21f   : > { %v2762_v57 = vmul.f32 0.044715, %v5839_v17  ;;  %v2667_v1 = vmul.f32 %v3903_v52, %v4559_v38  ;;  %v2388_v62 = vadd.f32 %v2380_v3, %v2356_v40  ;;  %v2492_v46 = vmul.f32 %v5499_v31, %v6278_v19  ;;  %v2659_v32 = vld [vmem:[#allocation2 + $0x16a] sm:$0xff] }
 0x220   : > { %v2643_v20 = vadd.f32 %v2635_v36, %v2611_v11  ;;  %v2444_v60 = vmul.f32 %v2372_v9, %v4342_v22  ;;  %v2691_v37 = vadd.f32 %v2683_v53, %v2627_v28  ;;  %v2699_v0 = vmul.f32 %v6500_v55, %v6292_v18  ;;  %v2468_v34 = vld [vmem:[#allocation2 + $0x170] sm:$0xff] }
 0x221   : > { %v2770_v15 = vmul.f32 %v2762_v57, %v5839_v17  ;;  %v2420_v44 = vadd.f32 %v2412_v14, %v2388_v62  ;;  %v2500_v7 = vadd.f32 %v2492_v46, %v2436_v48  ;;  %v3904_v43 = vld [vmem:[#allocation2 + $0xf0] sm:$0xff]  ;;  %v2524_v31 = vmul.f32 %v5762_v58, %v6281_v59  ;;  %v6522_v46 = vld [vmem:[#allocation23_spill] sm:$0xff] }
 0x222   : > { %v2675_v5 = vadd.f32 %v2667_v1, %v2643_v20  ;;  %v2476_v19 = vmul.f32 %v3904_v43, %v6469_v2  ;;  %v2715_v22 = vmul.f32 %v5749_v25, %v6438_v47  ;;  %v2731_v24 = vmul.f32 %v5485_v30, %v2659_v32  ;;  %v3905_v23 = vld [vmem:[#allocation2 + $0xf1] sm:$0xff] }
 0x223   : > { %v2778_v29 = vmul.f32 %v2770_v15, %v5839_v17  ;;  %v2452_v27 = vadd.f32 %v2444_v60, %v2420_v44  ;;  %v3865_v12 = vpop.eup %3864  ;;  %v2508_v55 = vmul.f32 %v5624_v4, %v6283_v51  ;;  %v2532_v21 = vadd.f32 %v2524_v31, %v2500_v7  ;;  %v2564_v1 = vld [vmem:[#allocation2 + $0x171] sm:$0xff] }
 0x224   : > { %v2707_v13 = vadd.f32 %v2699_v0, %v2675_v5  ;;  %v2817_v36 = vadd.f32 1.0, %v3865_v12  ;;  %v2723_v3 = vadd.f32 %v2715_v22, %v2691_v37  ;;  %v2540_v11 = vmul.f32 %v2468_v34, %v6285_v54  ;;  %v3906_v53 = vld [vmem:[#allocation2 + $0xf2] sm:$0xff] }
 0x225   : > { %v2786_v6 = vadd.f32 %v2778_v29, %v5839_v17  ;;  %v2484_v40 = vadd.f32 %v2476_v19, %v2452_v27  ;;  %v2588_v25 = vmul.f32 %v6505_v35, %v4515_v8  ;;  %v2572_v39 = vmul.f32 %v3905_v23, %v6323_v10  ;;  %v2660_v32 = vld [vmem:[#allocation2 + $0x172] sm:$0xff] }
 0x226   : > { %v2739_v2 = vadd.f32 %v2731_v24, %v2707_v13  ;;  %v2825_v59 = vmul.f32 %v2817_v36, %v2801_v61  ;;  %v2604_v62 = vmul.f32 %v6506_v56, %v4535_v50  ;;  %v2620_v8 = vmul.f32 %v5773_v26, %v4551_v49  ;;  %v6523_v56 = vld [vmem:[#allocation13_spill] sm:$0xff] }
 0x227   : > { %v2794_v58 = vmul.f32 0.7978846, %v2786_v6  ;;  %v2516_v28 = vadd.f32 %v2508_v55, %v2484_v40  ;;  %v2596_v57 = vadd.f32 %v2588_v25, %v2532_v21  ;;  %v2668_v48 = vmul.f32 %v3906_v53, %v4559_v38  ;;  %v2835_v43 = vld [vmem:[#allocation2 + $0x110] sm:$0xff] }
 0x228   : > { %v2747_v9 = vadd.f32 %v2739_v2, %v2723_v3  ;;  %v2842_v51 = vadd.f32 %v2825_v59, %v6485_v41  ;;  %v2636_v41 = vmul.f32 %v2564_v1, %v4555_v45  ;;  %v2684_v61 = vmul.f32 %v6522_v46, %v4566_v42  ;;  %v6524_v45 = vld [vmem:[#allocation16_spill] sm:$0xff]  ;;  %v6525_v6 = vld [vmem:[#allocation9_spill] sm:$0xff]  ;;  %v5896_v59 = vld [vmem:[%s6013_s9] ss:$0 sm:$0xff] }
 0x229   : > { %3866 = vtanh.f32 %v2794_v58  ;;  %v2548_v63 = vadd.f32 %v2540_v11, %v2516_v28  ;;  %v2628_v10 = vadd.f32 %v2620_v8, %v2596_v57  ;;  %v2700_v49 = vmul.f32 %v6523_v56, %v6292_v18 }
 0x22a   : > { %v2755_v52 = vadd.f32 %v5526_v33, %v2747_v9  ;;  %3553 = vmatprep.mubr.f32.mxu1 %v2842_v51  ;;  %3597 = vmatprep.mubr.f32.mxu0 %v2842_v51  ;;  %v2716_v37 = vmul.f32 %v6524_v45, %v6438_v47  ;;  %v2732_v0 = vmul.f32 %v5485_v30, %v2660_v32  ;;  %v2802_v38 = vmul.f32 0.5, %v5839_v17 }
 0x22b   : > { %v2580_v54 = vadd.f32 %v2572_v39, %v2548_v63  ;;  %v2692_v50 = vadd.f32 %v2684_v61, %v2628_v10 }
 0x22c   : > { %v2763_v35 = vmul.f32 0.044715, %v2755_v52  ;;  %v2803_v30 = vmul.f32 0.5, %v2755_v52 }
 0x22d   : > { %v2612_v16 = vadd.f32 %v2604_v62, %v2580_v54  ;;  %v2724_v42 = vadd.f32 %v2716_v37, %v2692_v50 }
 0x22e   : > { %v2771_v14 = vmul.f32 %v2763_v35, %v2755_v52 }
 0x22f   : > { %v2644_v20 = vadd.f32 %v2636_v41, %v2612_v16 }
 0x230   : > { %v2779_v15 = vmul.f32 %v2771_v14, %v2755_v52 }
 0x231   : > { %v2676_v44 = vadd.f32 %v2668_v48, %v2644_v20 }
 0x232   : > { %v2787_v26 = vadd.f32 %v2779_v15, %v2755_v52 }
 0x233   : > { %v3867_v60 = vpop.eup %3866  ;;  %v2708_v5 = vadd.f32 %v2700_v49, %v2676_v44 }
 0x234   : > { %v2818_v7 = vadd.f32 1.0, %v3867_v60  ;;  %v2795_v29 = vmul.f32 0.7978846, %v2787_v26 }
 0x235   : > { %v2740_v27 = vadd.f32 %v2732_v0, %v2708_v5 }
 0x236   : > { %v2826_v34 = vmul.f32 %v2818_v7, %v2802_v38  ;;  %3868 = vtanh.f32 %v2795_v29 }
 0x237   : > { %v2748_v19 = vadd.f32 %v2740_v27, %v2724_v42 }
 0x238   : > { %v2843_v31 = vadd.f32 %v2835_v43, %v2826_v34 }
 0x239   : > { %v2756_v18 = vadd.f32 %v5526_v33, %v2748_v19 }
 0x23a   : > { %3554 = vmatmul.mubr.f32.gmra.mrb[26].mxu1 %v2843_v31  ;;  %3598 = vmatmul.mubr.f32.gmra.mrb[28].mxu0 %v2843_v31 }
 0x23b   : > { %v2764_v12 = vmul.f32 0.044715, %v2756_v18  ;;  %v2804_v3 = vmul.f32 0.5, %v2756_v18 }
 0x23d   : > { %v2772_v13 = vmul.f32 %v2764_v12, %v2756_v18 }
 0x23f   : > { %v2780_v47 = vmul.f32 %v2772_v13, %v2756_v18 }
 0x240   : > { %v3869_v22 = vpop.eup %3868 }
 0x241   : > { %v2819_v24 = vadd.f32 1.0, %v3869_v22  ;;  %v2788_v17 = vadd.f32 %v2780_v47, %v2756_v18 }
 0x243   : > { %v2827_v55 = vmul.f32 %v2819_v24, %v2803_v30  ;;  %v2796_v36 = vmul.f32 0.7978846, %v2788_v17 }
 0x245   : > { %v2844_v40 = vadd.f32 %v2827_v55, %v6525_v6  ;;  %3870 = vtanh.f32 %v2796_v36 }
 0x247   : > { %3556 = vmatprep.mubr.f32.mxu1 %v2844_v40  ;;  %3600 = vmatprep.mubr.f32.mxu0 %v2844_v40 }
 0x24f   : > { %v3871_v21 = vpop.eup %3870 }
 0x250   : > { %v2820_v33 = vadd.f32 1.0, %v3871_v21 }
 0x252   : > { %v2828_v2 = vmul.f32 %v2820_v33, %v2804_v3 }
 0x254   : > { %v2845_v11 = vadd.f32 %v2828_v2, %v5624_v4 }
 0x256   : > { %3557 = vmatmul.mubr.f32.gmra.mrb[28].mxu1 %v2845_v11  ;;  %3601 = vmatmul.mubr.f32.gmra.mrb[30].mxu0 %v2845_v11 }
 0x25a   : > { %v3461_v58 = vpop.f32.mrb[14].mxu1  ;;  %v3505_v28 = vpop.f32.mrb[16].mxu0 }
 0x25b   : > { %v2106_v4 = vadd.f32 %v3461_v58, %v5896_v59  ;;  %v2211_v25 = vadd.f32 %v3505_v28, %v5896_v59  ;;  %v2100_v9 = vpop.f32.mrb[15].mxu1  ;;  %v2205_v23 = vpop.f32.mrb[17].mxu0 }
 0x25c   : > { %v2101_v39 = vadd.f32 %v5896_v59, %v2100_v9  ;;  %v2206_v51 = vadd.f32 %v5896_v59, %v2205_v23 }
 0x25d   : > { %2245 = vst.msk [vmem:[%s5903_s18 + $0x8] sm:$0xff] %vm475_vm0, %v2106_v4  ;;  %2253 = vst.msk [vmem:[%s5903_s18 + $0x88] sm:$0xff] %vm475_vm0, %v2211_v25 }
 0x25e   : > { %2244 = vst.msk [vmem:[%s5903_s18] sm:$0xff] %vm475_vm0, %v2101_v39  ;;  %2252 = vst.msk [vmem:[%s5903_s18 + $0x80] sm:$0xff] %vm475_vm0, %v2206_v51 }
 0x275   : > { %v3464_v63 = vpop.f32.mrb[16].mxu1  ;;  %v3508_v57 = vpop.f32.mrb[18].mxu0 }
 0x276   : > { %v2116_v52 = vadd.f32 %v3464_v63, %v5896_v59  ;;  %v2221_v1 = vadd.f32 %v3508_v57, %v5896_v59  ;;  %v2110_v54 = vpop.f32.mrb[17].mxu1  ;;  %v2215_v62 = vpop.f32.mrb[19].mxu0 }
 0x277   : > { %v2111_v8 = vadd.f32 %v5896_v59, %v2110_v54  ;;  %v2216_v35 = vadd.f32 %v5896_v59, %v2215_v62 }
 0x278   : > { %2247 = vst.msk [vmem:[%s5903_s18 + $0x18] sm:$0xff] %vm475_vm0, %v2116_v52  ;;  %2255 = vst.msk [vmem:[%s5903_s18 + $0x98] sm:$0xff] %vm475_vm0, %v2221_v1 }
 0x279   : > { %2246 = vst.msk [vmem:[%s5903_s18 + $0x10] sm:$0xff] %vm475_vm0, %v2111_v8  ;;  %2254 = vst.msk [vmem:[%s5903_s18 + $0x90] sm:$0xff] %vm475_vm0, %v2216_v35 }
 0x294   : > { %v3467_v16 = vpop.f32.mrb[18].mxu1  ;;  %v3511_v10 = vpop.f32.mrb[20].mxu0 }
 0x295   : > { %v2126_v41 = vadd.f32 %v3467_v16, %v5896_v59  ;;  %v2231_v14 = vadd.f32 %v3511_v10, %v5896_v59  ;;  %v2120_v20 = vpop.f32.mrb[19].mxu1  ;;  %v2225_v53 = vpop.f32.mrb[21].mxu0 }
 0x296   : > { %v2121_v48 = vadd.f32 %v5896_v59, %v2120_v20  ;;  %v2226_v46 = vadd.f32 %v5896_v59, %v2225_v53 }
 0x297   : > { %2249 = vst.msk [vmem:[%s5903_s18 + $0x28] sm:$0xff] %vm475_vm0, %v2126_v41  ;;  %2257 = vst.msk [vmem:[%s5903_s18 + $0xa8] sm:$0xff] %vm475_vm0, %v2231_v14 }
 0x298   : > { %2248 = vst.msk [vmem:[%s5903_s18 + $0x20] sm:$0xff] %vm475_vm0, %v2121_v48  ;;  %2256 = vst.msk [vmem:[%s5903_s18 + $0xa0] sm:$0xff] %vm475_vm0, %v2226_v46 }
 0x2b4   : > { %v3470_v61 = vpop.f32.mrb[20].mxu1  ;;  %v3514_v15 = vpop.f32.mrb[22].mxu0 }
 0x2b5   : > { %v2136_v32 = vadd.f32 %v3470_v61, %v5896_v59  ;;  %v2241_v44 = vadd.f32 %v3514_v15, %v5896_v59  ;;  %v2130_v50 = vpop.f32.mrb[21].mxu1  ;;  %v2235_v56 = vpop.f32.mrb[23].mxu0 }
 0x2b6   : > { %v2131_v49 = vadd.f32 %v5896_v59, %v2130_v50  ;;  %v2236_v26 = vadd.f32 %v5896_v59, %v2235_v56 }
 0x2b7   : > { %2251 = vst.msk [vmem:[%s5903_s18 + $0x38] sm:$0xff] %vm475_vm0, %v2136_v32  ;;  %2259 = vst.msk [vmem:[%s5903_s18 + $0xb8] sm:$0xff] %vm475_vm0, %v2241_v44 }
 0x2b8   : > { %2250 = vst.msk [vmem:[%s5903_s18 + $0x30] sm:$0xff] %vm475_vm0, %v2131_v49  ;;  %2258 = vst.msk [vmem:[%s5903_s18 + $0xb0] sm:$0xff] %vm475_vm0, %v2236_v26 }
 0x2d0   : > { %v3549_v60 = vpop.f32.mrb[22].mxu1  ;;  %v3593_v5 = vpop.f32.mrb[24].mxu0 }
 0x2d1   : > { %v2918_v45 = vadd.f32 %v3549_v60, %v5896_v59  ;;  %v3023_v37 = vadd.f32 %v3593_v5, %v5896_v59  ;;  %v2912_v0 = vpop.f32.mrb[23].mxu1  ;;  %v3017_v38 = vpop.f32.mrb[25].mxu0 }
 0x2d2   : > { %v2913_v7 = vadd.f32 %v5896_v59, %v2912_v0  ;;  %v3018_v29 = vadd.f32 %v5896_v59, %v3017_v38 }
 0x2d3   : > { %3057 = vst.msk [vmem:[%s5903_s18 + $0x48] sm:$0xff] %vm475_vm0, %v2918_v45  ;;  %3065 = vst.msk [vmem:[%s5903_s18 + $0xc8] sm:$0xff] %vm475_vm0, %v3023_v37 }
 0x2d4   : > { %3056 = vst.msk [vmem:[%s5903_s18 + $0x40] sm:$0xff] %vm475_vm0, %v2913_v7  ;;  %3064 = vst.msk [vmem:[%s5903_s18 + $0xc0] sm:$0xff] %vm475_vm0, %v3018_v29 }
 0x2f0   : > { %v3552_v42 = vpop.f32.mrb[24].mxu1  ;;  %v3596_v27 = vpop.f32.mrb[26].mxu0 }
 0x2f1   : > { %v2928_v34 = vadd.f32 %v3552_v42, %v5896_v59  ;;  %v3033_v43 = vadd.f32 %v3596_v27, %v5896_v59  ;;  %v2922_v19 = vpop.f32.mrb[25].mxu1  ;;  %v3027_v31 = vpop.f32.mrb[27].mxu0 }
 0x2f2   : > { %v2923_v18 = vadd.f32 %v5896_v59, %v2922_v19  ;;  %v3028_v12 = vadd.f32 %v5896_v59, %v3027_v31 }
 0x2f3   : > { %3059 = vst.msk [vmem:[%s5903_s18 + $0x58] sm:$0xff] %vm475_vm0, %v2928_v34  ;;  %3067 = vst.msk [vmem:[%s5903_s18 + $0xd8] sm:$0xff] %vm475_vm0, %v3033_v43 }
 0x2f4   : > { %3058 = vst.msk [vmem:[%s5903_s18 + $0x50] sm:$0xff] %vm475_vm0, %v2923_v18  ;;  %3066 = vst.msk [vmem:[%s5903_s18 + $0xd0] sm:$0xff] %vm475_vm0, %v3028_v12 }
 0x30d   : > { %v3555_v13 = vpop.f32.mrb[26].mxu1  ;;  %v3599_v47 = vpop.f32.mrb[28].mxu0 }
 0x30e   : > { %v2938_v22 = vadd.f32 %v3555_v13, %v5896_v59  ;;  %v3043_v30 = vadd.f32 %v3599_v47, %v5896_v59  ;;  %v2932_v24 = vpop.f32.mrb[27].mxu1  ;;  %v3037_v17 = vpop.f32.mrb[29].mxu0 }
 0x30f   : > { %v2933_v55 = vadd.f32 %v5896_v59, %v2932_v24  ;;  %v3038_v36 = vadd.f32 %v5896_v59, %v3037_v17 }
 0x310   : > { %3061 = vst.msk [vmem:[%s5903_s18 + $0x68] sm:$0xff] %vm475_vm0, %v2938_v22  ;;  %3069 = vst.msk [vmem:[%s5903_s18 + $0xe8] sm:$0xff] %vm475_vm0, %v3043_v30 }
 0x311   : > { %3060 = vst.msk [vmem:[%s5903_s18 + $0x60] sm:$0xff] %vm475_vm0, %v2933_v55  ;;  %3068 = vst.msk [vmem:[%s5903_s18 + $0xe0] sm:$0xff] %vm475_vm0, %v3038_v36 }
 0x329   : > { %v3558_v6 = vpop.f32.mrb[28].mxu1  ;;  %v3602_v40 = vpop.f32.mrb[30].mxu0 }
 0x32a   : > { %v2948_v21 = vadd.f32 %v3558_v6, %v5896_v59  ;;  %v3053_v3 = vadd.f32 %v3602_v40, %v5896_v59  ;;  %v2942_v33 = vpop.f32.mrb[29].mxu1  ;;  %v3047_v2 = vpop.f32.mrb[31].mxu0 }
 0x32b   : > { %v2943_v11 = vadd.f32 %v5896_v59, %v2942_v33  ;;  %v3048_v58 = vadd.f32 %v5896_v59, %v3047_v2 }
 0x32c   : > { %3063 = vst.msk [vmem:[%s5903_s18 + $0x78] sm:$0xff] %vm475_vm0, %v2948_v21  ;;  %3071 = vst.msk [vmem:[%s5903_s18 + $0xf8] sm:$0xff] %vm475_vm0, %v3053_v3 }
 0x32d   : > { %3062 = vst.msk [vmem:[%s5903_s18 + $0x70] sm:$0xff] %vm475_vm0, %v2943_v11  ;;  %3070 = vst.msk [vmem:[%s5903_s18 + $0xf0] sm:$0xff] %vm475_vm0, %v3048_v58 }
 0x32e PF: > { %s20_s13 = sadd.s32 1, %s3913_s13  }
 0x32f   : > { %p17_p4 = scmp.ge.s32.totalorder %s20_s13, 4  }
 0x331   :  { %19 = sbr.rel (!%p17_p4) target bundleno = 1 (0x1), region = 94 }

</bundles_post_ra>
